<compile_context>
chip_gen: v6e
topology: v6e:2x2x1
jax: 0.10.0
libtpu: 0.0.40
codegen_flags: <defaults>
</compile_context>

<pallas_src>
import functools
import math

import numpy as np
import jax
import jax.numpy as jnp
from jax.experimental import pallas as pl
from jax.experimental.pallas import tpu as pltpu


# ----------------------------- small helpers ---------------------------------


def _round_up(a, m):
    return ((a + m - 1) // m) * m


def _pick_batch_tile(n, cap=128):
    """Batch tile: multiple of 8, <= cap (VMEM-safe even on v7x's 64 MiB), and
    >= 2 grid steps whenever the batch allows it so the "parallel" grid axis
    can be split across two TensorCores."""
    n8 = _round_up(n, 8)
    steps = max(-(-n8 // cap), 2 if n8 > 8 else 1)
    return _round_up(-(-n8 // steps), 8)


# ----------------------------- weight packing (trace-time, tiny) -------------


def _band_matrix(w, win, wout):
    """Banded weight for conv-as-lane-matmul.

    w: (Cout, Cin, KH, KW) PyTorch conv weight.
    Returns B: (KH, win*Cin, wout*Cout) with
      B[kh, (wo+dj)*Cin + ci, wo*Cout + co] = w[co, ci, kh, dj]
    so a row with lanes ordered (w_in, ci) times B[kh] yields lanes (w_out, co),
    contracting over (dj, ci).  The caller flattens KH into the contraction dim.
    """
    cout, cin, kh, kw = w.shape
    wt = jnp.transpose(w, (2, 3, 1, 0))                        # (KH, KW, Cin, Cout)
    src = jnp.broadcast_to(wt[:, :, :, None, :], (kh, kw, cin, wout, cout))
    kh_i = np.arange(kh)[:, None, None, None, None]
    dj_i = np.arange(kw)[None, :, None, None, None]
    ci_i = np.arange(cin)[None, None, :, None, None]
    wo_i = np.arange(wout)[None, None, None, :, None]
    co_i = np.arange(cout)[None, None, None, None, :]
    B = jnp.zeros((kh, win * cin, wout * cout), w.dtype)
    return B.at[kh_i, (wo_i + dj_i) * cin + ci_i, wo_i * cout + co_i].set(src)


def _pool_matrix(w, c):
    """(w*c, (w//2)*c) matrix averaging adjacent width pairs per channel.

    Carries the full 0.25 factor of the 2x2 mean; the height pair-add in the
    kernel adds the two rows unscaled.
    """
    P = np.zeros((w * c, (w // 2) * c), np.float32)
    wi = np.arange(w)[:, None]
    ci = np.arange(c)[None, :]
    P[wi * c + ci, (wi // 2) * c + ci] = 0.25
    return jnp.asarray(P)


# ----------------------------- the fused kernel ------------------------------


def _lenet_kernel(x_ref, b1_ref, bias1_ref, pw1_ref, b2_ref, bias2_ref, pw2_ref,
                  wf1_ref, bf1_ref, wf2_ref, bf2_ref, wf3_ref, bf3_ref, out_ref,
                  *, tb, kh, h1, w1, c1, h2, w2, c2):
    f32 = jnp.float32
    bf16 = jnp.bfloat16

    def sigmoid(v):                         # one EUP op: 0.5*(1 + tanh(v/2))
        return 0.5 * jnp.tanh(0.5 * v) + 0.5

    x = x_ref[...]                          # (h1+kh-1, tb, wp*cin)  bf16

    # Conv2d(cin, c1, 5, padding=2) + Sigmoid: K-fused banded matmul.
    # LHS lanes = (kernel-row, w_in, cin); one dot with K = kh*wp*cin.
    lhs1 = jnp.concatenate([x[di:di + h1] for di in range(kh)], axis=-1)
    acc1 = jnp.dot(lhs1.reshape(h1 * tb, -1), b1_ref[...],
                   preferred_element_type=f32)
    a1 = sigmoid(acc1 + bias1_ref[...]).astype(bf16)         # (h1*tb, w1*c1)

    # AvgPool2d(2): width pairs via 0.25 pooling matmul, height pairs via add.
    a1w = jnp.dot(a1, pw1_ref[...], preferred_element_type=f32)
    a1r = a1w.reshape(h1 // 2, 2, tb, (w1 // 2) * c1)
    p1 = (a1r[:, 0] + a1r[:, 1]).astype(bf16)                # (h1//2, tb, (w1//2)*c1)

    # Conv2d(c1, c2, 5) + Sigmoid: K-fused banded matmul, K = kh*(w1//2)*c1.
    lhs2 = jnp.concatenate([p1[di:di + h2] for di in range(kh)], axis=-1)
    acc2 = jnp.dot(lhs2.reshape(h2 * tb, -1), b2_ref[...],
                   preferred_element_type=f32)
    a2 = sigmoid(acc2 + bias2_ref[...]).astype(bf16)         # (h2*tb, w2*c2)

    # AvgPool2d(2).
    a2w = jnp.dot(a2, pw2_ref[...], preferred_element_type=f32)
    a2r = a2w.reshape(h2 // 2, 2, tb, (w2 // 2) * c2)
    p2 = (a2r[:, 0] + a2r[:, 1]).astype(bf16)                # (h2//2, tb, (w2//2)*c2)

    # Linear(400,120)+Sigmoid as h2//2 accumulated dots (no 400-lane concat).
    # wf1_ref is pre-reshaped to (h2//2, (w2//2)*c2, 120) in kernel feature order.
    z = jnp.dot(p2[0], wf1_ref[0], preferred_element_type=f32)
    for i in range(1, h2 // 2):
        z = z + jnp.dot(p2[i], wf1_ref[i], preferred_element_type=f32)
    z = sigmoid(z + bf1_ref[...]).astype(bf16)

    # Linear(120,84)+Sigmoid, Linear(84, ncls_pad): lane-dense 128-wide logits.
    z = sigmoid(jnp.dot(z, wf2_ref[...], preferred_element_type=f32)
                + bf2_ref[...]).astype(bf16)
    z = jnp.dot(z, wf3_ref[...], preferred_element_type=f32) + bf3_ref[...]
    out_ref[...] = z.astype(out_ref.dtype)                   # (tb, 128)


# ----------------------------- forward wrapper -------------------------------


def lenet_forward(x, params):
    """x: (N, Cin, 28, 28) float32 NCHW -> logits (N, numClasses)."""
    n, cin, hin, win = x.shape
    w1 = params["conv1_w"].astype(jnp.float32)
    w2 = params["conv2_w"].astype(jnp.float32)
    c1, c2 = w1.shape[0], w2.shape[0]
    kh = w1.shape[2]
    pad = 2
    hp, wp = hin + 2 * pad, win + 2 * pad              # 32, 32
    h1, w1o = hp - kh + 1, wp - kh + 1                 # 28, 28
    h1p, w1p = h1 // 2, w1o // 2                       # 14, 14
    h2, w2o = h1p - kh + 1, w1p - kh + 1               # 10, 10
    h2p, w2p = h2 // 2, w2o // 2                       # 5, 5
    nfeat = c2 * h2p * w2p                             # 400
    d1 = params["fc1_w"].shape[0]                      # 120
    d2 = params["fc2_w"].shape[0]                      # 84
    ncls = params["fc3_w"].shape[0]
    ncls_pad = _round_up(ncls, 128)                    # lane-dense logits

    tb = _pick_batch_tile(n)
    n_pad = _round_up(n, tb)

    # Input layout: (H, N, W, Cin) -> zero-pad -> (Hp, Npad, Wp*Cin); lanes=(w,c).
    xt = jnp.transpose(x.astype(jnp.float32), (2, 0, 3, 1))
    xt = jnp.pad(xt, ((pad, pad), (0, n_pad - n), (pad, pad), (0, 0)))
    xt = xt.reshape(hp, n_pad, wp * cin).astype(jnp.bfloat16)

    # Conv weights as K-fused banded matrices (kernel-row folded into K); bf16.
    B1 = _band_matrix(w1, wp, w1o).reshape(kh * wp * cin, w1o * c1)
    B2 = _band_matrix(w2, w1p, w2o).reshape(kh * w1p * c1, w2o * c2)
    B1 = B1.astype(jnp.bfloat16)
    B2 = B2.astype(jnp.bfloat16)
    bias1 = jnp.tile(params["conv1_b"].astype(jnp.float32), w1o)[None, :]
    bias2 = jnp.tile(params["conv2_b"].astype(jnp.float32), w2o)[None, :]
    PW1 = _pool_matrix(w1o, c1).astype(jnp.bfloat16)
    PW2 = _pool_matrix(w2o, c2).astype(jnp.bfloat16)

    # FC weights: permute fc1 columns from torch (c,h,w) order to kernel (h,w,c)
    # and pre-split per output-height row for the accumulated fc1 dots.
    f = np.arange(nfeat)
    fh = f // (w2p * c2)
    fw = (f % (w2p * c2)) // c2
    fc = f % c2
    perm = fc * (h2p * w2p) + fh * w2p + fw
    wf1 = params["fc1_w"].astype(jnp.float32)[:, perm].T            # (nfeat, 120)
    wf1 = wf1.reshape(h2p, w2p * c2, d1).astype(jnp.bfloat16)       # (5, 80, 120)
    bf1 = params["fc1_b"].astype(jnp.float32)[None, :]
    wf2 = params["fc2_w"].astype(jnp.float32).T.astype(jnp.bfloat16)  # (120, 84)
    bf2 = params["fc2_b"].astype(jnp.float32)[None, :]
    wf3 = jnp.zeros((params["fc3_w"].shape[1], ncls_pad), jnp.float32)
    wf3 = wf3.at[:, :ncls].set(params["fc3_w"].astype(jnp.float32).T)
    wf3 = wf3.astype(jnp.bfloat16)                                   # (84, 128)
    bf3 = jnp.zeros((1, ncls_pad), jnp.float32).at[0, :ncls].set(
        params["fc3_b"].astype(jnp.float32))

    kern = functools.partial(_lenet_kernel, tb=tb, kh=kh,
                             h1=h1, w1=w1o, c1=c1, h2=h2, w2=w2o, c2=c2)

    def whole(a):  # resident weight: same (full) block at every grid step
        return pl.BlockSpec(a.shape, lambda b, _nd=a.ndim: (0,) * _nd)

    weights = (B1, bias1, PW1, B2, bias2, PW2, wf1, bf1, wf2, bf2, wf3, bf3)

    flops = 2 * n_pad * (h1 * w1o * c1 * kh * kh * cin
                         + h2 * w2o * c2 * kh * kh * c1
                         + h1 * w1o * c1 * w1p            # pool1 matmul
                         + h2 * w2o * c2 * w2p            # pool2 matmul
                         + nfeat * d1 + d1 * d2 + d2 * ncls)
    transcendentals = n_pad * (h1 * w1o * c1 + h2 * w2o * c2 + d1 + d2)
    bytes_accessed = (xt.size * xt.dtype.itemsize
                      + sum(a.size * a.dtype.itemsize for a in weights)
                      + n_pad * ncls_pad * 4)

    out = pl.pallas_call(
        kern,
        out_shape=jax.ShapeDtypeStruct((n_pad, ncls_pad), jnp.float32),
        grid=(n_pad // tb,),
        in_specs=[
            pl.BlockSpec((hp, tb, wp * cin), lambda b: (0, b, 0)),
            whole(B1), whole(bias1), whole(PW1),
            whole(B2), whole(bias2), whole(PW2),
            whole(wf1), whole(bf1), whole(wf2), whole(bf2), whole(wf3), whole(bf3),
        ],
        out_specs=pl.BlockSpec((tb, ncls_pad), lambda b: (b, 0)),
        compiler_params=pltpu.CompilerParams(
            dimension_semantics=("parallel",),
            vmem_limit_bytes=48 * 1024 * 1024),
        cost_estimate=pl.CostEstimate(flops=flops,
                                      transcendentals=transcendentals,
                                      bytes_accessed=bytes_accessed),
    )(xt, *weights)

    return out[:n, :ncls]


# ----------------------------- reference (pure JAX) --------------------------


def lenet_reference(x, params):
    dn = ("NCHW", "OIHW", "NCHW")
    prec = jax.lax.Precision.HIGHEST

    def pool(y):
        b, c, h, w = y.shape
        return y.reshape(b, c, h // 2, 2, w // 2, 2).mean(axis=(3, 5))

    y = jax.lax.conv_general_dilated(
        x, params["conv1_w"], (1, 1), ((2, 2), (2, 2)),
        dimension_numbers=dn, precision=prec) + params["conv1_b"][None, :, None, None]
    y = jax.nn.sigmoid(y)
    y = pool(y)
    y = jax.lax.conv_general_dilated(
        y, params["conv2_w"], (1, 1), ((0, 0), (0, 0)),
        dimension_numbers=dn, precision=prec) + params["conv2_b"][None, :, None, None]
    y = jax.nn.sigmoid(y)
    y = pool(y)
    y = y.reshape(y.shape[0], -1)
    y = jax.nn.sigmoid(y @ params["fc1_w"].T + params["fc1_b"])
    y = jax.nn.sigmoid(y @ params["fc2_w"].T + params["fc2_b"])
    return y @ params["fc3_w"].T + params["fc3_b"]


# ----------------------------- params & main ---------------------------------


def init_params(key, num_classes=10, datasize=28 * 28, in_channels=1):
    conv_out = int(math.sqrt(datasize) / 2 / 2 - 2)  # = 5 for 28x28

    def uniform(key, shape, fan_in):
        bound = 1.0 / math.sqrt(fan_in)
        return jax.random.uniform(key, shape, jnp.float32, -bound, bound)

    keys = jax.random.split(key, 10)
    return {
        "conv1_w": uniform(keys[0], (6, in_channels, 5, 5), in_channels * 25),
        "conv1_b": uniform(keys[1], (6,), in_channels * 25),
        "conv2_w": uniform(keys[2], (16, 6, 5, 5), 6 * 25),
        "conv2_b": uniform(keys[3], (16,), 6 * 25),
        "fc1_w": uniform(keys[4], (120, 16 * conv_out * conv_out), 16 * conv_out * conv_out),
        "fc1_b": uniform(keys[5], (120,), 16 * conv_out * conv_out),
        "fc2_w": uniform(keys[6], (84, 120), 120),
        "fc2_b": uniform(keys[7], (84,), 120),
        "fc3_w": uniform(keys[8], (num_classes, 84), 84),
        "fc3_b": uniform(keys[9], (num_classes,), 84),
    }


if __name__ == "__main__":
    key = jax.random.PRNGKey(0)
    k_x, k_p = jax.random.split(key)

    batch = 24  # adaptive tiling -> tb=16, 2 grid steps (exercises "parallel" axis)
    x = jax.random.normal(k_x, (batch, 1, 28, 28), dtype=jnp.float32)
    params = init_params(k_p)

    fwd = jax.jit(lenet_forward)
    logits = jax.block_until_ready(fwd(x, params))
    assert logits.shape == (batch, 10), logits.shape

    ref = jax.block_until_ready(lenet_reference(x, params))
    # bf16 matmul operands, f32 accumulation -> slightly looser tolerance.
    assert jnp.allclose(logits, ref, atol=2e-2, rtol=2e-2), (
        "mismatch vs reference", float(jnp.max(jnp.abs(logits - ref))))

    print("KERNEL_OK")
</pallas_src>

<mosaic_0001>
module attributes {stable_mosaic.version = 11 : i64} {
  func.func @_lenet_kernel(%arg0: i32, %arg1: memref<32x16x32xbf16, #tpu.memory_space<vmem>>, %arg2: memref<160x168xbf16, #tpu.memory_space<vmem>>, %arg3: memref<1x168xf32, #tpu.memory_space<vmem>>, %arg4: memref<168x84xbf16, #tpu.memory_space<vmem>>, %arg5: memref<420x160xbf16, #tpu.memory_space<vmem>>, %arg6: memref<1x160xf32, #tpu.memory_space<vmem>>, %arg7: memref<160x80xbf16, #tpu.memory_space<vmem>>, %arg8: memref<5x80x120xbf16, #tpu.memory_space<vmem>>, %arg9: memref<1x120xf32, #tpu.memory_space<vmem>>, %arg10: memref<120x84xbf16, #tpu.memory_space<vmem>>, %arg11: memref<1x84xf32, #tpu.memory_space<vmem>>, %arg12: memref<84x128xbf16, #tpu.memory_space<vmem>>, %arg13: memref<1x128xf32, #tpu.memory_space<vmem>>, %arg14: memref<16x128xf32, #tpu.memory_space<vmem>>) attributes {dimension_semantics = [#tpu.dimension_semantics<parallel>], iteration_bounds = array<i64: 2>, scalar_prefetch = 0 : i64, scratch_operands = 0 : i64, tpu.core_type = #tpu.core_type<tc>, window_params = [{transform_indices = @transform_0, window_bounds = array<i64: 32, 16, 32>}, {pipeline_mode = #tpu.pipeline_mode<synchronous>, transform_indices = @transform_1, window_bounds = array<i64: 160, 168>}, {pipeline_mode = #tpu.pipeline_mode<synchronous>, transform_indices = @transform_2, window_bounds = array<i64: 1, 168>}, {pipeline_mode = #tpu.pipeline_mode<synchronous>, transform_indices = @transform_3, window_bounds = array<i64: 168, 84>}, {pipeline_mode = #tpu.pipeline_mode<synchronous>, transform_indices = @transform_4, window_bounds = array<i64: 420, 160>}, {pipeline_mode = #tpu.pipeline_mode<synchronous>, transform_indices = @transform_5, window_bounds = array<i64: 1, 160>}, {pipeline_mode = #tpu.pipeline_mode<synchronous>, transform_indices = @transform_6, window_bounds = array<i64: 160, 80>}, {pipeline_mode = #tpu.pipeline_mode<synchronous>, transform_indices = @transform_7, window_bounds = array<i64: 5, 80, 120>}, {pipeline_mode = #tpu.pipeline_mode<synchronous>, transform_indices = @transform_8, window_bounds = array<i64: 1, 120>}, {pipeline_mode = #tpu.pipeline_mode<synchronous>, transform_indices = @transform_9, window_bounds = array<i64: 120, 84>}, {pipeline_mode = #tpu.pipeline_mode<synchronous>, transform_indices = @transform_10, window_bounds = array<i64: 1, 84>}, {pipeline_mode = #tpu.pipeline_mode<synchronous>, transform_indices = @transform_11, window_bounds = array<i64: 84, 128>}, {pipeline_mode = #tpu.pipeline_mode<synchronous>, transform_indices = @transform_12, window_bounds = array<i64: 1, 128>}, {transform_indices = @transform_13, window_bounds = array<i64: 16, 128>}]} {
    %c0 = arith.constant 0 : index
    %c0_0 = arith.constant 0 : index
    %c0_1 = arith.constant 0 : index
    %0 = vector.load %arg1[%c0, %c0_0, %c0_1] : memref<32x16x32xbf16, #tpu.memory_space<vmem>>, vector<32x16x32xbf16>
    %1 = vector.extract_strided_slice %0 {offsets = [0, 0, 0], sizes = [28, 16, 32], strides = [1, 1, 1]} : vector<32x16x32xbf16> to vector<28x16x32xbf16>
    %2 = vector.extract_strided_slice %0 {offsets = [1, 0, 0], sizes = [28, 16, 32], strides = [1, 1, 1]} : vector<32x16x32xbf16> to vector<28x16x32xbf16>
    %3 = vector.extract_strided_slice %0 {offsets = [2, 0, 0], sizes = [28, 16, 32], strides = [1, 1, 1]} : vector<32x16x32xbf16> to vector<28x16x32xbf16>
    %4 = vector.extract_strided_slice %0 {offsets = [3, 0, 0], sizes = [28, 16, 32], strides = [1, 1, 1]} : vector<32x16x32xbf16> to vector<28x16x32xbf16>
    %5 = vector.extract_strided_slice %0 {offsets = [4, 0, 0], sizes = [28, 16, 32], strides = [1, 1, 1]} : vector<32x16x32xbf16> to vector<28x16x32xbf16>
    %6 = tpu.concatenate %1, %2, %3, %4, %5 in 2 : vector<28x16x32xbf16>, vector<28x16x32xbf16>, vector<28x16x32xbf16>, vector<28x16x32xbf16>, vector<28x16x32xbf16> -> vector<28x16x160xbf16>
    %7 = vector.shape_cast %6 : vector<28x16x160xbf16> to vector<448x160xbf16>
    %c0_2 = arith.constant 0 : index
    %c0_3 = arith.constant 0 : index
    %8 = vector.load %arg2[%c0_2, %c0_3] : memref<160x168xbf16, #tpu.memory_space<vmem>>, vector<160x168xbf16>
    %cst = arith.constant dense<0.000000e+00> : vector<448x168xf32>
    %9 = tpu.matmul %7, %8, %cst {dimension_numbers = #tpu.dot_dimension_numbers<[1], [0], [0], [1], [0, 0, 1, 1], [], []>} : vector<448x160xbf16>, vector<160x168xbf16>, vector<448x168xf32> -> vector<448x168xf32>
    %c0_4 = arith.constant 0 : index
    %c0_5 = arith.constant 0 : index
    %10 = vector.load %arg3[%c0_4, %c0_5] : memref<1x168xf32, #tpu.memory_space<vmem>>, vector<1x168xf32>
    %11 = vector.broadcast %10 : vector<1x168xf32> to vector<448x168xf32>
    %12 = arith.addf %9, %11 : vector<448x168xf32>
    %cst_6 = arith.constant 5.000000e-01 : f32
    %13 = vector.broadcast %cst_6 : f32 to vector<448x168xf32>
    %14 = arith.mulf %13, %12 : vector<448x168xf32>
    %15 = math.tanh %14 : vector<448x168xf32>
    %cst_7 = arith.constant 5.000000e-01 : f32
    %16 = vector.broadcast %cst_7 : f32 to vector<448x168xf32>
    %17 = arith.mulf %16, %15 : vector<448x168xf32>
    %cst_8 = arith.constant 5.000000e-01 : f32
    %18 = vector.broadcast %cst_8 : f32 to vector<448x168xf32>
    %19 = arith.addf %17, %18 : vector<448x168xf32>
    %20 = arith.truncf %19 : vector<448x168xf32> to vector<448x168xbf16>
    %c0_9 = arith.constant 0 : index
    %c0_10 = arith.constant 0 : index
    %21 = vector.load %arg4[%c0_9, %c0_10] : memref<168x84xbf16, #tpu.memory_space<vmem>>, vector<168x84xbf16>
    %cst_11 = arith.constant dense<0.000000e+00> : vector<448x84xf32>
    %22 = tpu.matmul %20, %21, %cst_11 {dimension_numbers = #tpu.dot_dimension_numbers<[1], [0], [0], [1], [0, 0, 1, 1], [], []>} : vector<448x168xbf16>, vector<168x84xbf16>, vector<448x84xf32> -> vector<448x84xf32>
    %23 = vector.shape_cast %22 : vector<448x84xf32> to vector<14x2x16x84xf32>
    %24 = vector.extract_strided_slice %23 {offsets = [0, 0, 0, 0], sizes = [14, 1, 16, 84], strides = [1, 1, 1, 1]} : vector<14x2x16x84xf32> to vector<14x1x16x84xf32>
    %25 = vector.shape_cast %24 : vector<14x1x16x84xf32> to vector<14x16x84xf32>
    %26 = vector.extract_strided_slice %23 {offsets = [0, 1, 0, 0], sizes = [14, 1, 16, 84], strides = [1, 1, 1, 1]} : vector<14x2x16x84xf32> to vector<14x1x16x84xf32>
    %27 = vector.shape_cast %26 : vector<14x1x16x84xf32> to vector<14x16x84xf32>
    %28 = arith.addf %25, %27 : vector<14x16x84xf32>
    %29 = arith.truncf %28 : vector<14x16x84xf32> to vector<14x16x84xbf16>
    %30 = vector.extract_strided_slice %29 {offsets = [0, 0, 0], sizes = [10, 16, 84], strides = [1, 1, 1]} : vector<14x16x84xbf16> to vector<10x16x84xbf16>
    %31 = vector.extract_strided_slice %29 {offsets = [1, 0, 0], sizes = [10, 16, 84], strides = [1, 1, 1]} : vector<14x16x84xbf16> to vector<10x16x84xbf16>
    %32 = vector.extract_strided_slice %29 {offsets = [2, 0, 0], sizes = [10, 16, 84], strides = [1, 1, 1]} : vector<14x16x84xbf16> to vector<10x16x84xbf16>
    %33 = vector.extract_strided_slice %29 {offsets = [3, 0, 0], sizes = [10, 16, 84], strides = [1, 1, 1]} : vector<14x16x84xbf16> to vector<10x16x84xbf16>
    %34 = vector.extract_strided_slice %29 {offsets = [4, 0, 0], sizes = [10, 16, 84], strides = [1, 1, 1]} : vector<14x16x84xbf16> to vector<10x16x84xbf16>
    %35 = tpu.concatenate %30, %31, %32, %33, %34 in 2 : vector<10x16x84xbf16>, vector<10x16x84xbf16>, vector<10x16x84xbf16>, vector<10x16x84xbf16>, vector<10x16x84xbf16> -> vector<10x16x420xbf16>
    %36 = vector.shape_cast %35 : vector<10x16x420xbf16> to vector<160x420xbf16>
    %c0_12 = arith.constant 0 : index
    %c0_13 = arith.constant 0 : index
    %37 = vector.load %arg5[%c0_12, %c0_13] : memref<420x160xbf16, #tpu.memory_space<vmem>>, vector<420x160xbf16>
    %cst_14 = arith.constant dense<0.000000e+00> : vector<160x160xf32>
    %38 = tpu.matmul %36, %37, %cst_14 {dimension_numbers = #tpu.dot_dimension_numbers<[1], [0], [0], [1], [0, 0, 1, 1], [], []>} : vector<160x420xbf16>, vector<420x160xbf16>, vector<160x160xf32> -> vector<160x160xf32>
    %c0_15 = arith.constant 0 : index
    %c0_16 = arith.constant 0 : index
    %39 = vector.load %arg6[%c0_15, %c0_16] : memref<1x160xf32, #tpu.memory_space<vmem>>, vector<1x160xf32>
    %40 = vector.broadcast %39 : vector<1x160xf32> to vector<160x160xf32>
    %41 = arith.addf %38, %40 : vector<160x160xf32>
    %cst_17 = arith.constant 5.000000e-01 : f32
    %42 = vector.broadcast %cst_17 : f32 to vector<160x160xf32>
    %43 = arith.mulf %42, %41 : vector<160x160xf32>
    %44 = math.tanh %43 : vector<160x160xf32>
    %cst_18 = arith.constant 5.000000e-01 : f32
    %45 = vector.broadcast %cst_18 : f32 to vector<160x160xf32>
    %46 = arith.mulf %45, %44 : vector<160x160xf32>
    %cst_19 = arith.constant 5.000000e-01 : f32
    %47 = vector.broadcast %cst_19 : f32 to vector<160x160xf32>
    %48 = arith.addf %46, %47 : vector<160x160xf32>
    %49 = arith.truncf %48 : vector<160x160xf32> to vector<160x160xbf16>
    %c0_20 = arith.constant 0 : index
    %c0_21 = arith.constant 0 : index
    %50 = vector.load %arg7[%c0_20, %c0_21] : memref<160x80xbf16, #tpu.memory_space<vmem>>, vector<160x80xbf16>
    %cst_22 = arith.constant dense<0.000000e+00> : vector<160x80xf32>
    %51 = tpu.matmul %49, %50, %cst_22 {dimension_numbers = #tpu.dot_dimension_numbers<[1], [0], [0], [1], [0, 0, 1, 1], [], []>} : vector<160x160xbf16>, vector<160x80xbf16>, vector<160x80xf32> -> vector<160x80xf32>
    %52 = vector.shape_cast %51 : vector<160x80xf32> to vector<5x2x16x80xf32>
    %53 = vector.extract_strided_slice %52 {offsets = [0, 0, 0, 0], sizes = [5, 1, 16, 80], strides = [1, 1, 1, 1]} : vector<5x2x16x80xf32> to vector<5x1x16x80xf32>
    %54 = vector.shape_cast %53 : vector<5x1x16x80xf32> to vector<5x16x80xf32>
    %55 = vector.extract_strided_slice %52 {offsets = [0, 1, 0, 0], sizes = [5, 1, 16, 80], strides = [1, 1, 1, 1]} : vector<5x2x16x80xf32> to vector<5x1x16x80xf32>
    %56 = vector.shape_cast %55 : vector<5x1x16x80xf32> to vector<5x16x80xf32>
    %57 = arith.addf %54, %56 : vector<5x16x80xf32>
    %58 = arith.truncf %57 : vector<5x16x80xf32> to vector<5x16x80xbf16>
    %59 = vector.extract_strided_slice %58 {offsets = [0, 0, 0], sizes = [1, 16, 80], strides = [1, 1, 1]} : vector<5x16x80xbf16> to vector<1x16x80xbf16>
    %60 = vector.shape_cast %59 : vector<1x16x80xbf16> to vector<16x80xbf16>
    %c0_23 = arith.constant 0 : index
    %c0_24 = arith.constant 0 : index
    %c0_25 = arith.constant 0 : index
    %61 = vector.load %arg8[%c0_23, %c0_24, %c0_25] : memref<5x80x120xbf16, #tpu.memory_space<vmem>>, vector<1x80x120xbf16>
    %62 = vector.shape_cast %61 : vector<1x80x120xbf16> to vector<80x120xbf16>
    %cst_26 = arith.constant dense<0.000000e+00> : vector<16x120xf32>
    %63 = tpu.matmul %60, %62, %cst_26 {dimension_numbers = #tpu.dot_dimension_numbers<[1], [0], [0], [1], [0, 0, 1, 1], [], []>} : vector<16x80xbf16>, vector<80x120xbf16>, vector<16x120xf32> -> vector<16x120xf32>
    %64 = vector.extract_strided_slice %58 {offsets = [1, 0, 0], sizes = [1, 16, 80], strides = [1, 1, 1]} : vector<5x16x80xbf16> to vector<1x16x80xbf16>
    %65 = vector.shape_cast %64 : vector<1x16x80xbf16> to vector<16x80xbf16>
    %c1 = arith.constant 1 : index
    %c0_27 = arith.constant 0 : index
    %c0_28 = arith.constant 0 : index
    %66 = vector.load %arg8[%c1, %c0_27, %c0_28] : memref<5x80x120xbf16, #tpu.memory_space<vmem>>, vector<1x80x120xbf16>
    %67 = vector.shape_cast %66 : vector<1x80x120xbf16> to vector<80x120xbf16>
    %cst_29 = arith.constant dense<0.000000e+00> : vector<16x120xf32>
    %68 = tpu.matmul %65, %67, %cst_29 {dimension_numbers = #tpu.dot_dimension_numbers<[1], [0], [0], [1], [0, 0, 1, 1], [], []>} : vector<16x80xbf16>, vector<80x120xbf16>, vector<16x120xf32> -> vector<16x120xf32>
    %69 = arith.addf %63, %68 : vector<16x120xf32>
    %70 = vector.extract_strided_slice %58 {offsets = [2, 0, 0], sizes = [1, 16, 80], strides = [1, 1, 1]} : vector<5x16x80xbf16> to vector<1x16x80xbf16>
    %71 = vector.shape_cast %70 : vector<1x16x80xbf16> to vector<16x80xbf16>
    %c2 = arith.constant 2 : index
    %c0_30 = arith.constant 0 : index
    %c0_31 = arith.constant 0 : index
    %72 = vector.load %arg8[%c2, %c0_30, %c0_31] : memref<5x80x120xbf16, #tpu.memory_space<vmem>>, vector<1x80x120xbf16>
    %73 = vector.shape_cast %72 : vector<1x80x120xbf16> to vector<80x120xbf16>
    %cst_32 = arith.constant dense<0.000000e+00> : vector<16x120xf32>
    %74 = tpu.matmul %71, %73, %cst_32 {dimension_numbers = #tpu.dot_dimension_numbers<[1], [0], [0], [1], [0, 0, 1, 1], [], []>} : vector<16x80xbf16>, vector<80x120xbf16>, vector<16x120xf32> -> vector<16x120xf32>
    %75 = arith.addf %69, %74 : vector<16x120xf32>
    %76 = vector.extract_strided_slice %58 {offsets = [3, 0, 0], sizes = [1, 16, 80], strides = [1, 1, 1]} : vector<5x16x80xbf16> to vector<1x16x80xbf16>
    %77 = vector.shape_cast %76 : vector<1x16x80xbf16> to vector<16x80xbf16>
    %c3 = arith.constant 3 : index
    %c0_33 = arith.constant 0 : index
    %c0_34 = arith.constant 0 : index
    %78 = vector.load %arg8[%c3, %c0_33, %c0_34] : memref<5x80x120xbf16, #tpu.memory_space<vmem>>, vector<1x80x120xbf16>
    %79 = vector.shape_cast %78 : vector<1x80x120xbf16> to vector<80x120xbf16>
    %cst_35 = arith.constant dense<0.000000e+00> : vector<16x120xf32>
    %80 = tpu.matmul %77, %79, %cst_35 {dimension_numbers = #tpu.dot_dimension_numbers<[1], [0], [0], [1], [0, 0, 1, 1], [], []>} : vector<16x80xbf16>, vector<80x120xbf16>, vector<16x120xf32> -> vector<16x120xf32>
    %81 = arith.addf %75, %80 : vector<16x120xf32>
    %82 = vector.extract_strided_slice %58 {offsets = [4, 0, 0], sizes = [1, 16, 80], strides = [1, 1, 1]} : vector<5x16x80xbf16> to vector<1x16x80xbf16>
    %83 = vector.shape_cast %82 : vector<1x16x80xbf16> to vector<16x80xbf16>
    %c4 = arith.constant 4 : index
    %c0_36 = arith.constant 0 : index
    %c0_37 = arith.constant 0 : index
    %84 = vector.load %arg8[%c4, %c0_36, %c0_37] : memref<5x80x120xbf16, #tpu.memory_space<vmem>>, vector<1x80x120xbf16>
    %85 = vector.shape_cast %84 : vector<1x80x120xbf16> to vector<80x120xbf16>
    %cst_38 = arith.constant dense<0.000000e+00> : vector<16x120xf32>
    %86 = tpu.matmul %83, %85, %cst_38 {dimension_numbers = #tpu.dot_dimension_numbers<[1], [0], [0], [1], [0, 0, 1, 1], [], []>} : vector<16x80xbf16>, vector<80x120xbf16>, vector<16x120xf32> -> vector<16x120xf32>
    %87 = arith.addf %81, %86 : vector<16x120xf32>
    %c0_39 = arith.constant 0 : index
    %c0_40 = arith.constant 0 : index
    %88 = vector.load %arg9[%c0_39, %c0_40] : memref<1x120xf32, #tpu.memory_space<vmem>>, vector<1x120xf32>
    %89 = vector.broadcast %88 : vector<1x120xf32> to vector<16x120xf32>
    %90 = arith.addf %87, %89 : vector<16x120xf32>
    %cst_41 = arith.constant 5.000000e-01 : f32
    %91 = vector.broadcast %cst_41 : f32 to vector<16x120xf32>
    %92 = arith.mulf %91, %90 : vector<16x120xf32>
    %93 = math.tanh %92 : vector<16x120xf32>
    %cst_42 = arith.constant 5.000000e-01 : f32
    %94 = vector.broadcast %cst_42 : f32 to vector<16x120xf32>
    %95 = arith.mulf %94, %93 : vector<16x120xf32>
    %cst_43 = arith.constant 5.000000e-01 : f32
    %96 = vector.broadcast %cst_43 : f32 to vector<16x120xf32>
    %97 = arith.addf %95, %96 : vector<16x120xf32>
    %98 = arith.truncf %97 : vector<16x120xf32> to vector<16x120xbf16>
    %c0_44 = arith.constant 0 : index
    %c0_45 = arith.constant 0 : index
    %99 = vector.load %arg10[%c0_44, %c0_45] : memref<120x84xbf16, #tpu.memory_space<vmem>>, vector<120x84xbf16>
    %cst_46 = arith.constant dense<0.000000e+00> : vector<16x84xf32>
    %100 = tpu.matmul %98, %99, %cst_46 {dimension_numbers = #tpu.dot_dimension_numbers<[1], [0], [0], [1], [0, 0, 1, 1], [], []>} : vector<16x120xbf16>, vector<120x84xbf16>, vector<16x84xf32> -> vector<16x84xf32>
    %c0_47 = arith.constant 0 : index
    %c0_48 = arith.constant 0 : index
    %101 = vector.load %arg11[%c0_47, %c0_48] : memref<1x84xf32, #tpu.memory_space<vmem>>, vector<1x84xf32>
    %102 = vector.broadcast %101 : vector<1x84xf32> to vector<16x84xf32>
    %103 = arith.addf %100, %102 : vector<16x84xf32>
    %cst_49 = arith.constant 5.000000e-01 : f32
    %104 = vector.broadcast %cst_49 : f32 to vector<16x84xf32>
    %105 = arith.mulf %104, %103 : vector<16x84xf32>
    %106 = math.tanh %105 : vector<16x84xf32>
    %cst_50 = arith.constant 5.000000e-01 : f32
    %107 = vector.broadcast %cst_50 : f32 to vector<16x84xf32>
    %108 = arith.mulf %107, %106 : vector<16x84xf32>
    %cst_51 = arith.constant 5.000000e-01 : f32
    %109 = vector.broadcast %cst_51 : f32 to vector<16x84xf32>
    %110 = arith.addf %108, %109 : vector<16x84xf32>
    %111 = arith.truncf %110 : vector<16x84xf32> to vector<16x84xbf16>
    %c0_52 = arith.constant 0 : index
    %c0_53 = arith.constant 0 : index
    %112 = vector.load %arg12[%c0_52, %c0_53] : memref<84x128xbf16, #tpu.memory_space<vmem>>, vector<84x128xbf16>
    %cst_54 = arith.constant dense<0.000000e+00> : vector<16x128xf32>
    %113 = tpu.matmul %111, %112, %cst_54 {dimension_numbers = #tpu.dot_dimension_numbers<[1], [0], [0], [1], [0, 0, 1, 1], [], []>} : vector<16x84xbf16>, vector<84x128xbf16>, vector<16x128xf32> -> vector<16x128xf32>
    %c0_55 = arith.constant 0 : index
    %c0_56 = arith.constant 0 : index
    %114 = vector.load %arg13[%c0_55, %c0_56] : memref<1x128xf32, #tpu.memory_space<vmem>>, vector<1x128xf32>
    %115 = vector.broadcast %114 : vector<1x128xf32> to vector<16x128xf32>
    %116 = arith.addf %113, %115 : vector<16x128xf32>
    %c0_57 = arith.constant 0 : index
    %c0_58 = arith.constant 0 : index
    %117 = vector.load %arg14[%c0_57, %c0_58] : memref<16x128xf32, #tpu.memory_space<vmem>>, vector<16x128xf32>
    tpu.vector_store %arg14[%c0_57, %c0_58], %116 {strides = array<i32>} : memref<16x128xf32, #tpu.memory_space<vmem>>, vector<16x128xf32>,
    return
  }
  func.func @transform_0(%arg0: i32) -> (i32, i32, i32) {
    %c0_i32 = arith.constant 0 : i32
    %c0_i32_0 = arith.constant 0 : i32
    %c0_i32_1 = arith.constant 0 : i32
    return %c0_i32, %arg0, %c0_i32_0 : i32, i32, i32
  }
  func.func @transform_1(%arg0: i32) -> (i32, i32) {
    %c0_i32 = arith.constant 0 : i32
    %c0_i32_0 = arith.constant 0 : i32
    %c0_i32_1 = arith.constant 0 : i32
    return %c0_i32, %c0_i32_0 : i32, i32
  }
  func.func @transform_2(%arg0: i32) -> (i32, i32) {
    %c0_i32 = arith.constant 0 : i32
    %c0_i32_0 = arith.constant 0 : i32
    %c0_i32_1 = arith.constant 0 : i32
    return %c0_i32, %c0_i32_0 : i32, i32
  }
  func.func @transform_3(%arg0: i32) -> (i32, i32) {
    %c0_i32 = arith.constant 0 : i32
    %c0_i32_0 = arith.constant 0 : i32
    %c0_i32_1 = arith.constant 0 : i32
    return %c0_i32, %c0_i32_0 : i32, i32
  }
  func.func @transform_4(%arg0: i32) -> (i32, i32) {
    %c0_i32 = arith.constant 0 : i32
    %c0_i32_0 = arith.constant 0 : i32
    %c0_i32_1 = arith.constant 0 : i32
    return %c0_i32, %c0_i32_0 : i32, i32
  }
  func.func @transform_5(%arg0: i32) -> (i32, i32) {
    %c0_i32 = arith.constant 0 : i32
    %c0_i32_0 = arith.constant 0 : i32
    %c0_i32_1 = arith.constant 0 : i32
    return %c0_i32, %c0_i32_0 : i32, i32
  }
  func.func @transform_6(%arg0: i32) -> (i32, i32) {
    %c0_i32 = arith.constant 0 : i32
    %c0_i32_0 = arith.constant 0 : i32
    %c0_i32_1 = arith.constant 0 : i32
    return %c0_i32, %c0_i32_0 : i32, i32
  }
  func.func @transform_7(%arg0: i32) -> (i32, i32, i32) {
    %c0_i32 = arith.constant 0 : i32
    %c0_i32_0 = arith.constant 0 : i32
    %c0_i32_1 = arith.constant 0 : i32
    %c0_i32_2 = arith.constant 0 : i32
    return %c0_i32, %c0_i32_0, %c0_i32_1 : i32, i32, i32
  }
  func.func @transform_8(%arg0: i32) -> (i32, i32) {
    %c0_i32 = arith.constant 0 : i32
    %c0_i32_0 = arith.constant 0 : i32
    %c0_i32_1 = arith.constant 0 : i32
    return %c0_i32, %c0_i32_0 : i32, i32
  }
  func.func @transform_9(%arg0: i32) -> (i32, i32) {
    %c0_i32 = arith.constant 0 : i32
    %c0_i32_0 = arith.constant 0 : i32
    %c0_i32_1 = arith.constant 0 : i32
    return %c0_i32, %c0_i32_0 : i32, i32
  }
  func.func @transform_10(%arg0: i32) -> (i32, i32) {
    %c0_i32 = arith.constant 0 : i32
    %c0_i32_0 = arith.constant 0 : i32
    %c0_i32_1 = arith.constant 0 : i32
    return %c0_i32, %c0_i32_0 : i32, i32
  }
  func.func @transform_11(%arg0: i32) -> (i32, i32) {
    %c0_i32 = arith.constant 0 : i32
    %c0_i32_0 = arith.constant 0 : i32
    %c0_i32_1 = arith.constant 0 : i32
    return %c0_i32, %c0_i32_0 : i32, i32
  }
  func.func @transform_12(%arg0: i32) -> (i32, i32) {
    %c0_i32 = arith.constant 0 : i32
    %c0_i32_0 = arith.constant 0 : i32
    %c0_i32_1 = arith.constant 0 : i32
    return %c0_i32, %c0_i32_0 : i32, i32
  }
  func.func @transform_13(%arg0: i32) -> (i32, i32) {
    %c0_i32 = arith.constant 0 : i32
    %c0_i32_0 = arith.constant 0 : i32
    return %arg0, %c0_i32 : i32, i32
  }
}

</mosaic_0001>

<bundles_post_ra>
// kernel: tile.13
= control target key start
LH: loop header
LB: loop body
LE: loop exit
PB: predicated region body
PF: predicated region fallthrough
CT: control target
= control target key end

     0   :  { %s40_s0 = inlined_call_operand.vmem [shape: f32[6], index: 0, kind: input, shape index: {}]   ;;  %s41_s1 = inlined_call_operand.vmem [shape: f32[28,6], index: 1, kind: output, shape index: {}]  }
   0x1   :  { %v4_v0 = vld [vmem:[%s40_s0] ss:$0 sm:$0xff] }
   0x2   :  { %5 = vst [vmem:[%s41_s1] sm:$0xff] %v4_v0  ;;  %12 = vst [vmem:[%s41_s1 + $0x8] sm:$0xff] %v4_v0 }
   0x3   :  { %13 = vst [vmem:[%s41_s1 + $0x10] sm:$0xff] %v4_v0  ;;  %14 = vst [vmem:[%s41_s1 + $0x18] sm:$0xff] %v4_v0 }

// kernel: tile.14
= control target key start
LH: loop header
LB: loop body
LE: loop exit
PB: predicated region body
PF: predicated region fallthrough
CT: control target
= control target key end

     0   :  { %vm9_vm0 = vcmask 15360   ;;  %s250_s12 = smov 126   ;;  %s251_s13 = smov 114   ;;  %vm3_vm1 = vcmask 48128   ;;  %vm13_vm2 = vcmask 31744   ;;  %vm16_vm3 = vcmask 1048560   ;;  %s380_s0 = inlined_call_operand.vmem [shape: f32[28,6], index: 0, kind: input, shape index: {}]   ;;  %s381_s1 = inlined_call_operand.vmem [shape: f32[1,168], index: 1, kind: output, shape index: {}]  }
   0x1   :  { %v194_v0 = vld [vmem:[%s380_s0 + $0x15] sm:$0x1]   ;;  %v197_v3 = vld [vmem:[%s380_s0 + $0x13] sm:$0x1]   ;;  %v196_v4 = vld [vmem:[%s380_s0 + $0x14] sm:$0x1]  }
   0x2   :  { %v195_v1 = vld [vmem:[%s380_s0 + $0x15] sm:$0x1]   ;;  %26 = vrot.lane.b32.xlu1 %v197_v3, %s251_s13  ;;  %v198_v5 = vld [vmem:[%s380_s0 + $0x12] sm:$0x1]   ;;  %s252_s18 = smov 120   ;;  %s253_s19 = smov 108  }
   0x3   :  { %v10_v2 = vsel %vm9_vm0, %v195_v1, %v194_v0  ;;  %v199_v6 = vld [vmem:[%s380_s0 + $0x11] sm:$0x1]   ;;  %v200_v7 = vld [vmem:[%s380_s0 + $0x10] sm:$0x1]   ;;  %s254_s24 = smov 102   ;;  %s255_s25 = smov 96  }
   0x4   :  { %11 = vrot.lane.b32.xlu0 %v10_v2, %s250_s12  ;;  %v201_v8 = vld [vmem:[%s380_s0 + $0xf] sm:$0x1]   ;;  %v202_v9 = vld [vmem:[%s380_s0 + $0xe] sm:$0x1]   ;;  %s256_s30 = smov 90   ;;  %s257_s2 = smov 84  }
   0x5   :  { %v2_v10 = vld [vmem:[%s380_s0] sm:$0x1]   ;;  %v203_v11 = vld [vmem:[%s380_s0 + $0xd] sm:$0x1]   ;;  %v204_v12 = vld [vmem:[%s380_s0 + $0xc] sm:$0x1]  }
   0x6   :  { %32 = vrot.lane.b32.xlu1 %v198_v5, %s253_s19  ;;  %4 = vst.msk [vmem:[#allocation0] sm:$0x1] %vm3_vm1, %v2_v10   ;;  %s258_s9 = smov 78   ;;  %s259_s10 = smov 72   ;;  %v205_v13 = vld [vmem:[%s380_s0 + $0xb] sm:$0x1]  }
   0x7   :  { %v206_v14 = vld [vmem:[%s380_s0 + $0xa] sm:$0x1]   ;;  %s260_s15 = smov 66   ;;  %s261_s16 = smov 60   ;;  %v207_v15 = vld [vmem:[%s380_s0 + $0x9] sm:$0x1]  }
   0x8   :  { %20 = vrot.lane.b32.xlu0 %v196_v4, %s252_s18  ;;  %v208_v16 = vld [vmem:[%s380_s0 + $0x8] sm:$0x1]   ;;  %s262_s21 = smov 54   ;;  %s263_s22 = smov 48   ;;  %v209_v17 = vld [vmem:[%s380_s0 + $0x7] sm:$0x1]  }
   0x9   :  { %v210_v18 = vld [vmem:[%s380_s0 + $0x6] sm:$0x1]   ;;  %s264_s27 = smov 42   ;;  %s265_s28 = smov 36   ;;  %v211_v19 = vld [vmem:[%s380_s0 + $0x1b] sm:$0x1]  }
   0xa   :  { %44 = vrot.lane.b32.xlu1 %v200_v7, %s255_s25  ;;  %v212_v20 = vld [vmem:[%s380_s0 + $0x5] sm:$0x1]   ;;  %s266_s4 = smov 34   ;;  %s267_s5 = smov 30   ;;  %v213_v21 = vld [vmem:[%s380_s0 + $0x1a] sm:$0x1]  }
   0xb   :  { %v214_v22 = vld [vmem:[%s380_s0 + $0x4] sm:$0x1]   ;;  %s269_s11 = smov 24   ;;  %v215_v23 = vld [vmem:[%s380_s0 + $0x19] sm:$0x1]   ;;  %s271_s17 = smov 18  }
   0xc   :  { %38 = vrot.lane.b32.xlu0 %v199_v6, %s254_s24  ;;  %v216_v24 = vld [vmem:[%s380_s0 + $0x3] sm:$0x1]   ;;  %v217_v25 = vld [vmem:[%s380_s0 + $0x18] sm:$0x1]   ;;  %v218_v26 = vld [vmem:[%s380_s0 + $0x2] sm:$0x1]  }
   0xd   :  { %s273_s23 = smov 12   ;;  %v219_v27 = vld [vmem:[%s380_s0 + $0x17] sm:$0x1]   ;;  %v220_v28 = vld [vmem:[%s380_s0 + $0x1] sm:$0x1]   ;;  %s275_s29 = smov 6  }
   0xe   :  { %56 = vrot.lane.b32.xlu1 %v202_v9, %s257_s2  ;;  %v221_v29 = vld [vmem:[%s380_s0 + $0x16] sm:$0x1]   ;;  %s276_s0 = smov 4   ;;  %vm22_vm4 = vcmask 1032128   ;;  %vm28_vm5 = vcmask 982928   ;;  %vm34_vm6 = vcmask 933728  }
   0xf   :  { %vm40_vm7 = vcmask 884528   ;;  %vm46_vm8 = vcmask 835328   ;;  %vm52_vm9 = vcmask 786128   ;;  %vm58_vm10 = vcmask 736928  }
  0x10   :  { %50 = vrot.lane.b32.xlu0 %v201_v8, %s256_s30  ;;  %vm64_vm11 = vcmask 687728   ;;  %vm70_vm12 = vcmask 638528   ;;  %vm76_vm13 = vcmask 589328   ;;  %vm82_vm14 = vcmask 540128  }
  0x11   :  { %vm88_vm15 = vcmask 490928   ;;  %vm94_vm0 = vcmask 441728   ;;  %vm100_vm1 = vcmask 392528  }
  0x12   :  { %68 = vrot.lane.b32.xlu1 %v204_v12, %s259_s10  ;;  %s268_s10 = smov 28  }
  0x14   :  { %62 = vrot.lane.b32.xlu0 %v203_v11, %s258_s9 }
  0x16   :  { %80 = vrot.lane.b32.xlu1 %v206_v14, %s261_s16  ;;  %s270_s16 = smov 22  }
  0x18   :  { %74 = vrot.lane.b32.xlu0 %v205_v13, %s260_s15 }
  0x1a   :  { %92 = vrot.lane.b32.xlu1 %v208_v16, %s263_s22  ;;  %s272_s22 = smov 16  }
  0x1c   :  { %86 = vrot.lane.b32.xlu0 %v207_v15, %s262_s21 }
  0x1e   :  { %104 = vrot.lane.b32.xlu1 %v210_v18, %s265_s28  ;;  %s274_s28 = smov 10  }
  0x20   :  { %98 = vrot.lane.b32.xlu0 %v209_v17, %s264_s27 }
  0x22   :  { %117 = vrot.lane.b32.xlu1 %v212_v20, %s267_s5 }
  0x24   :  { %110 = vrot.lane.b32.xlu0 %v211_v19, %s266_s4 }
  0x26   :  { %130 = vrot.lane.b32.xlu1 %v214_v22, %s269_s11 }
  0x28   :  { %123 = vrot.lane.b32.xlu0 %v213_v21, %s268_s10 }
  0x2a   :  { %143 = vrot.lane.b32.xlu1 %v216_v24, %s271_s17 }
  0x2c   :  { %136 = vrot.lane.b32.xlu0 %v215_v23, %s270_s16 }
  0x2e   :  { %156 = vrot.lane.b32.xlu1 %v218_v26, %s273_s23 }
  0x30   :  { %149 = vrot.lane.b32.xlu0 %v217_v25, %s272_s22 }
  0x32   :  { %169 = vrot.lane.b32.xlu1 %v220_v28, %s275_s29 }
  0x34   :  { %162 = vrot.lane.b32.xlu0 %v219_v27, %s274_s28 }
  0x38   :  { %175 = vrot.lane.b32.xlu0 %v221_v29, %s276_s0 }
  0x74   :  { %v27_v31 = vpop.permute.xlu1 %26  }
  0x76   :  { %v12_v30 = vpop.permute.xlu0 %11  }
  0x77   :  { %15 = vst.msk [vmem:[#allocation0 + $0x8] sm:$0x1] %vm13_vm2, %v12_v30   ;;  %vm106_vm2 = vcmask 343328  }
  0x78   :  { %17 = vst.msk [vmem:[#allocation0] sm:$0x1] %vm16_vm3, %v12_v30   ;;  %v33_v33 = vpop.permute.xlu1 %32   ;;  %vm112_vm3 = vcmask 326928  }
  0x7a   :  { %v21_v32 = vpop.permute.xlu0 %20  }
  0x7b   :  { %23 = vst.msk [vmem:[#allocation0] sm:$0x1] %vm22_vm4, %v21_v32   ;;  %vm119_vm4 = vcmask 294128  }
  0x7c   :  { %29 = vst.msk [vmem:[#allocation0] sm:$0x1] %vm28_vm5, %v27_v31   ;;  %v45_v35 = vpop.permute.xlu1 %44   ;;  %vm125_vm5 = vcmask 277728  }
  0x7d   :  { %35 = vst.msk [vmem:[#allocation0] sm:$0x1] %vm34_vm6, %v33_v33   ;;  %vm132_vm6 = vcmask 244928  }
  0x7e   :  { %v39_v34 = vpop.permute.xlu0 %38  }
  0x7f   :  { %41 = vst.msk [vmem:[#allocation0] sm:$0x1] %vm40_vm7, %v39_v34   ;;  %vm138_vm7 = vcmask 228528  }
  0x80   :  { %47 = vst.msk [vmem:[#allocation0] sm:$0x1] %vm46_vm8, %v45_v35   ;;  %v57_v37 = vpop.permute.xlu1 %56   ;;  %vm145_vm8 = vcmask 195728  }
  0x82   :  { %v51_v36 = vpop.permute.xlu0 %50  }
  0x83   :  { %53 = vst.msk [vmem:[#allocation0] sm:$0x1] %vm52_vm9, %v51_v36   ;;  %vm151_vm9 = vcmask 179328  }
  0x84   :  { %59 = vst.msk [vmem:[#allocation0] sm:$0x1] %vm58_vm10, %v57_v37   ;;  %v69_v39 = vpop.permute.xlu1 %68   ;;  %vm158_vm10 = vcmask 146528  }
  0x86   :  { %v63_v38 = vpop.permute.xlu0 %62  }
  0x87   :  { %65 = vst.msk [vmem:[#allocation0] sm:$0x1] %vm64_vm11, %v63_v38   ;;  %vm164_vm11 = vcmask 130128  }
  0x88   :  { %71 = vst.msk [vmem:[#allocation0] sm:$0x1] %vm70_vm12, %v69_v39   ;;  %v81_v41 = vpop.permute.xlu1 %80   ;;  %vm171_vm12 = vcmask 97328  }
  0x8a   :  { %v75_v40 = vpop.permute.xlu0 %74  }
  0x8b   :  { %77 = vst.msk [vmem:[#allocation0] sm:$0x1] %vm76_vm13, %v75_v40   ;;  %vm177_vm13 = vcmask 80928  }
  0x8c   :  { %83 = vst.msk [vmem:[#allocation0] sm:$0x1] %vm82_vm14, %v81_v41   ;;  %v93_v43 = vpop.permute.xlu1 %92  }
  0x8e   :  { %v87_v42 = vpop.permute.xlu0 %86  }
  0x8f   :  { %89 = vst.msk [vmem:[#allocation0] sm:$0x1] %vm88_vm15, %v87_v42  }
  0x90   :  { %95 = vst.msk [vmem:[#allocation0] sm:$0x1] %vm94_vm0, %v93_v43   ;;  %v105_v45 = vpop.permute.xlu1 %104  }
  0x92   :  { %v99_v44 = vpop.permute.xlu0 %98  }
  0x93   :  { %101 = vst.msk [vmem:[#allocation0] sm:$0x1] %vm100_vm1, %v99_v44  }
  0x94   :  { %107 = vst.msk [vmem:[#allocation0] sm:$0x1] %vm106_vm2, %v105_v45   ;;  %v118_v47 = vpop.permute.xlu1 %117  }
  0x95   :  { %120 = vst.msk [vmem:[#allocation0] sm:$0x1] %vm119_vm4, %v118_v47  }
  0x96   :  { %v111_v46 = vpop.permute.xlu0 %110  }
  0x97   :  { %114 = vst.msk [vmem:[#allocation0 + $0x8] sm:$0x1] %vm112_vm3, %v111_v46  }
  0x98   :  { %v131_v49 = vpop.permute.xlu1 %130  }
  0x99   :  { %133 = vst.msk [vmem:[#allocation0] sm:$0x1] %vm132_vm6, %v131_v49  }
  0x9a   :  { %v124_v48 = vpop.permute.xlu0 %123  }
  0x9b   :  { %127 = vst.msk [vmem:[#allocation0 + $0x8] sm:$0x1] %vm125_vm5, %v124_v48  }
  0x9c   :  { %v144_v51 = vpop.permute.xlu1 %143  }
  0x9d   :  { %146 = vst.msk [vmem:[#allocation0] sm:$0x1] %vm145_vm8, %v144_v51  }
  0x9e   :  { %v137_v50 = vpop.permute.xlu0 %136  }
  0x9f   :  { %140 = vst.msk [vmem:[#allocation0 + $0x8] sm:$0x1] %vm138_vm7, %v137_v50  }
  0xa0   :  { %v157_v53 = vpop.permute.xlu1 %156  }
  0xa1   :  { %159 = vst.msk [vmem:[#allocation0] sm:$0x1] %vm158_vm10, %v157_v53  }
  0xa2   :  { %v150_v52 = vpop.permute.xlu0 %149  }
  0xa3   :  { %153 = vst.msk [vmem:[#allocation0 + $0x8] sm:$0x1] %vm151_vm9, %v150_v52  }
  0xa4   :  { %v170_v55 = vpop.permute.xlu1 %169  }
  0xa5   :  { %172 = vst.msk [vmem:[#allocation0] sm:$0x1] %vm171_vm12, %v170_v55  }
  0xa6   :  { %v163_v54 = vpop.permute.xlu0 %162  }
  0xa7   :  { %166 = vst.msk [vmem:[#allocation0 + $0x8] sm:$0x1] %vm164_vm11, %v163_v54  }
  0xaa   :  { %v176_v56 = vpop.permute.xlu0 %175  }
  0xab   :  { %179 = vst.msk [vmem:[#allocation0 + $0x8] sm:$0x1] %vm177_vm13, %v176_v56  }
  0xac   :  { %v184_v57 = vld [vmem:[#allocation0] sm:$0x1] }
  0xad   :  { %187 = vst [vmem:[%s381_s1] sm:$0x1] %v184_v57 }
  0xb2   :  { %v189_v58 = vld [vmem:[#allocation0 + $0x8] sm:$0x1] }
  0xb3   :  { %222 = vst [vmem:[%s381_s1 + $0x1] sm:$0x1] %v189_v58 }

// kernel: tile.18
= control target key start
LH: loop header
LB: loop body
LE: loop exit
PB: predicated region body
PF: predicated region fallthrough
CT: control target
= control target key end

     0   :  { %s28_s0 = inlined_call_operand.vmem [shape: f32[16], index: 0, kind: input, shape index: {}]   ;;  %s29_s1 = inlined_call_operand.vmem [shape: f32[10,16], index: 1, kind: output, shape index: {}]  }
   0x1   :  { %v4_v0 = vld [vmem:[%s28_s0] ss:$0 sm:$0xff] }
   0x2   :  { %5 = vst [vmem:[%s29_s1] sm:$0xff] %v4_v0  ;;  %8 = vst [vmem:[%s29_s1 + $0x8] sm:$0xff] %v4_v0 }

// kernel: tile.19
= control target key start
LH: loop header
LB: loop body
LE: loop exit
PB: predicated region body
PF: predicated region fallthrough
CT: control target
= control target key end

     0   :  { %s78_s10 = smov 112   ;;  %s79_s11 = smov 80   ;;  %vm4_vm0 = vcmask 130048   ;;  %vm10_vm1 = vcmask 1048448   ;;  %vm16_vm2 = vcmask 917248   ;;  %vm22_vm3 = vcmask 786048   ;;  %s125_s0 = inlined_call_operand.vmem [shape: f32[10,16], index: 0, kind: input, shape index: {}]   ;;  %s126_s1 = inlined_call_operand.vmem [shape: f32[1,160], index: 1, kind: output, shape index: {}]  }
   0x1   :  { %v63_v0 = vld [vmem:[%s125_s0 + $0x7] sm:$0x1]   ;;  %v65_v1 = vld [vmem:[%s125_s0 + $0x5] sm:$0x1]   ;;  %v64_v2 = vld [vmem:[%s125_s0 + $0x6] sm:$0x1]  }
   0x2   :  { %8 = vrot.lane.b32.xlu0 %v63_v0, %s78_s10  ;;  %20 = vrot.lane.b32.xlu1 %v65_v1, %s79_s11  ;;  %v66_v3 = vld [vmem:[%s125_s0 + $0x4] sm:$0x1]   ;;  %s2_s16 = smov 3  ;;  %s80_s17 = smov 96   ;;  %v67_v5 = vld [vmem:[%s125_s0 + $0x3] sm:$0x1]  }
   0x3   :  { %s81_s18 = smov 64   ;;  %v3_v4 = vld [vmem:[%s125_s0] ss:$8 sm:%s2_s16]   ;;  %v68_v6 = vld [vmem:[%s125_s0 + $0x2] sm:$0x1]   ;;  %s43_s25 = smov 3 }
   0x4   :  { %5 = vst.msk [vmem:[#allocation0] ss:$8 sm:$0x3] %vm4_vm0, %v3_v4   ;;  %s82_s26 = smov 48   ;;  %s83_s27 = smov 32   ;;  %vm28_vm4 = vcmask 654848  }
   0x5   :  { %v69_v7 = vld [vmem:[%s125_s0 + $0x1] ss:$8 sm:%s43_s25]   ;;  %s84_s0 = smov 16   ;;  %vm34_vm5 = vcmask 523648   ;;  %vm40_vm6 = vcmask 392448   ;;  %vm47_vm7 = vcmask 261248  }
   0x6   :  { %14 = vrot.lane.b32.xlu0 %v64_v2, %s80_s17  ;;  %26 = vrot.lane.b32.xlu1 %v66_v3, %s81_s18 }
   0xa   :  { %32 = vrot.lane.b32.xlu0 %v67_v5, %s82_s26  ;;  %38 = vrot.lane.b32.xlu1 %v68_v6, %s83_s27 }
   0xe   :  { %45 = vrot.lane.b32.xlu0 %v69_v7, %s84_s0 }
  0x74   :  { %v9_v8 = vpop.permute.xlu0 %8   ;;  %v21_v9 = vpop.permute.xlu1 %20  }
  0x75   :  { %11 = vst.msk [vmem:[#allocation0] sm:$0x1] %vm10_vm1, %v9_v8  }
  0x78   :  { %v15_v10 = vpop.permute.xlu0 %14   ;;  %v27_v11 = vpop.permute.xlu1 %26  }
  0x79   :  { %17 = vst.msk [vmem:[#allocation0] sm:$0x1] %vm16_vm2, %v15_v10  }
  0x7a   :  { %23 = vst.msk [vmem:[#allocation0] sm:$0x1] %vm22_vm3, %v21_v9  }
  0x7b   :  { %29 = vst.msk [vmem:[#allocation0] sm:$0x1] %vm28_vm4, %v27_v11  }
  0x7c   :  { %v33_v12 = vpop.permute.xlu0 %32   ;;  %v39_v13 = vpop.permute.xlu1 %38  }
  0x7d   :  { %35 = vst.msk [vmem:[#allocation0] sm:$0x1] %vm34_vm5, %v33_v12  }
  0x7e   :  { %41 = vst.msk [vmem:[#allocation0] sm:$0x1] %vm40_vm6, %v39_v13  }
  0x80   :  { %v46_v14 = vpop.permute.xlu0 %45  }
  0x81   :  { %48 = vst.msk [vmem:[#allocation0] ss:$8 sm:$0x3] %vm47_vm7, %v46_v14  }
  0x88   :  { %v53_v15 = vld [vmem:[#allocation0] sm:$0x1]  ;;  %v58_v16 = vld [vmem:[#allocation0 + $0x8] sm:$0x1] }
  0x89   :  { %56 = vst [vmem:[%s126_s1] sm:$0x1] %v53_v15  ;;  %70 = vst [vmem:[%s126_s1 + $0x1] sm:$0x1] %v58_v16 }

// kernel: lenet_forward.1
= control target key start
LH: loop header
LB: loop body
LE: loop exit
PB: predicated region body
PF: predicated region fallthrough
CT: control target
= control target key end

     0   :  { %s5943_s25 = smov 0   ;;  %s5945_s26 = smov 0   ;;  %s7356_s0 = inlined_call_operand.vmem [shape: bf16[32,32,32], index: 0, kind: input, shape index: {}]   ;;  %s7357_s1 = inlined_call_operand.vmem [shape: bf16[160,168], index: 1, kind: input, shape index: {}]   ;;  %s7358_s2 = inlined_call_operand.vmem [shape: f32[1,168], index: 2, kind: input, shape index: {}]   ;;  %s7359_s3 = inlined_call_operand.vmem [shape: bf16[168,84], index: 3, kind: input, shape index: {}]   ;;  %s7360_s4 = inlined_call_operand.vmem [shape: bf16[420,160], index: 4, kind: input, shape index: {}]   ;;  %s7361_s5 = inlined_call_operand.vmem [shape: f32[1,160], index: 5, kind: input, shape index: {}]   ;;  %s7362_s6 = inlined_call_operand.vmem [shape: bf16[160,80], index: 6, kind: input, shape index: {}]   ;;  %s7363_s7 = inlined_call_operand.vmem [shape: bf16[5,80,120], index: 7, kind: input, shape index: {}]   ;;  %s7364_s8 = inlined_call_operand.vmem [shape: f32[1,120], index: 8, kind: input, shape index: {}]   ;;  %s7365_s9 = inlined_call_operand.vmem [shape: bf16[120,84], index: 9, kind: input, shape index: {}]   ;;  %s7366_s10 = inlined_call_operand.vmem [shape: f32[1,84], index: 10, kind: input, shape index: {}]   ;;  %s7367_s11 = inlined_call_operand.vmem [shape: bf16[84,128], index: 11, kind: input, shape index: {}]   ;;  %s7368_s12 = inlined_call_operand.vmem [shape: f32[1,128], index: 12, kind: input, shape index: {}]   ;;  %s7369_s13 = inlined_call_operand.vmem [shape: f32[32,128], index: 13, kind: output, shape index: {}]  }
   0x1   :  { %s5947_s27 = smov 0  }
   0x2 LB: > { %s4832_s28 = sadd.s32 4294967295, %s5861_s27   ;;  %s5960_s29 = sadd.s32 1, %s5861_s27   ;;  %s5861_s27 = sphi %s5947_s27, %s7372_s27   ;;  %s5857_s26 = sphi %s5945_s26, %s7371_s26   ;;  %s5853_s25 = sphi %s5943_s25, %s7370_s25  }
   0x3   : > { %s27_s30 = ssub.s32 %s5861_s27, %s5960_s29  ;;  %s30_s14 = sadd.s32 1, %s5857_s26 }
   0x4   : > { %p28_p0 = scmp.eq.s32.totalorder %s27_s30, 0  ;;  %p37_p1 = scmp.ne.s32.totalorder %s5857_s26, %s5853_s25 }
   0x5   : > { %p38_p2 = scmp.eq.s32.totalorder %s5861_s27, 0  ;;  %p4835_p4 = scmp.ge.s32.totalorder %s5861_s27, 2 }
   0x6   : > { %s5969_s15 = scalar_select %p28_p0, %s5857_s26, %s30_s14  }
   0x7   : > { %p39_p3 = por %p38_p2, %p37_p1  ;;  %377 = sbr.rel (%p4835_p4) target bundleno = 32 (0x20), region = 64 }
   0xc   : > { %380 = sbr.rel (!%p39_p3) target bundleno = 32 (0x20), region = 68  ;;  %s382_s16 = sand.u32 (%p39_p3), 1, %s5857_s26  }
   0xd   : > { %s5138_s17 = sshll.u32 (%p39_p3), %s5861_s27, 3  ;;  %s4836_s18 = sshll.u32 (%p39_p3), %s382_s16, 8 }
   0xe   : > { %s5977_s21 = scalar_lea.vmem (%p39_p3), %s7356_s0, %s5138_s17  ;;  %s5982_s22 = scalar_lea.vmem (%p39_p3), [#allocation2], %s4836_s18 }
   0xf   : > { %v404_v0 = vld [vmem:[%s5977_s21] sm:$0xff] (%p39_p3)   ;;  %v408_v1 = vld [vmem:[%s5977_s21 + $0x10] sm:$0xff] (%p39_p3)  }
  0x10   : > { %v412_v2 = vld [vmem:[%s5977_s21 + $0x20] sm:$0xff] (%p39_p3)   ;;  %405 = vst [vmem:[%s5982_s22] sm:$0xff] (%p39_p3), %v404_v0   ;;  %409 = vst [vmem:[%s5982_s22 + $0x8] sm:$0xff] (%p39_p3), %v408_v1   ;;  %v416_v3 = vld [vmem:[%s5977_s21 + $0x30] sm:$0xff] (%p39_p3)  }
  0x11   : > { %413 = vst [vmem:[%s5982_s22 + $0x10] sm:$0xff] %v412_v2   ;;  %v420_v4 = vld [vmem:[%s5977_s21 + $0x40] sm:$0xff]   ;;  %v424_v5 = vld [vmem:[%s5977_s21 + $0x50] sm:$0xff]   ;;  %417 = vst [vmem:[%s5982_s22 + $0x18] sm:$0xff] %v416_v3  }
  0x12   : > { %421 = vst [vmem:[%s5982_s22 + $0x20] sm:$0xff] %v420_v4   ;;  %425 = vst [vmem:[%s5982_s22 + $0x28] sm:$0xff] %v424_v5   ;;  %v428_v6 = vld [vmem:[%s5977_s21 + $0x60] sm:$0xff]   ;;  %v432_v7 = vld [vmem:[%s5977_s21 + $0x70] sm:$0xff]  }
  0x13   : > { %v436_v8 = vld [vmem:[%s5977_s21 + $0x80] sm:$0xff]   ;;  %429 = vst [vmem:[%s5982_s22 + $0x30] sm:$0xff] %v428_v6   ;;  %433 = vst [vmem:[%s5982_s22 + $0x38] sm:$0xff] %v432_v7   ;;  %v440_v9 = vld [vmem:[%s5977_s21 + $0x90] sm:$0xff]  }
  0x14   : > { %437 = vst [vmem:[%s5982_s22 + $0x40] sm:$0xff] %v436_v8   ;;  %v444_v10 = vld [vmem:[%s5977_s21 + $0xa0] sm:$0xff]   ;;  %v448_v11 = vld [vmem:[%s5977_s21 + $0xb0] sm:$0xff]   ;;  %441 = vst [vmem:[%s5982_s22 + $0x48] sm:$0xff] %v440_v9  }
  0x15   : > { %445 = vst [vmem:[%s5982_s22 + $0x50] sm:$0xff] %v444_v10   ;;  %449 = vst [vmem:[%s5982_s22 + $0x58] sm:$0xff] %v448_v11   ;;  %v452_v12 = vld [vmem:[%s5977_s21 + $0xc0] sm:$0xff]   ;;  %v456_v13 = vld [vmem:[%s5977_s21 + $0xd0] sm:$0xff]  }
  0x16   : > { %v460_v14 = vld [vmem:[%s5977_s21 + $0xe0] sm:$0xff]   ;;  %453 = vst [vmem:[%s5982_s22 + $0x60] sm:$0xff] %v452_v12   ;;  %457 = vst [vmem:[%s5982_s22 + $0x68] sm:$0xff] %v456_v13   ;;  %v464_v15 = vld [vmem:[%s5977_s21 + $0xf0] sm:$0xff]  }
  0x17   : > { %461 = vst [vmem:[%s5982_s22 + $0x70] sm:$0xff] %v460_v14   ;;  %v468_v16 = vld [vmem:[%s5977_s21 + $0x100] sm:$0xff]   ;;  %v472_v17 = vld [vmem:[%s5977_s21 + $0x110] sm:$0xff]   ;;  %465 = vst [vmem:[%s5982_s22 + $0x78] sm:$0xff] %v464_v15  }
  0x18   : > { %469 = vst [vmem:[%s5982_s22 + $0x80] sm:$0xff] %v468_v16   ;;  %473 = vst [vmem:[%s5982_s22 + $0x88] sm:$0xff] %v472_v17   ;;  %v476_v18 = vld [vmem:[%s5977_s21 + $0x120] sm:$0xff]   ;;  %v480_v19 = vld [vmem:[%s5977_s21 + $0x130] sm:$0xff]  }
  0x19   : > { %v484_v20 = vld [vmem:[%s5977_s21 + $0x140] sm:$0xff]   ;;  %477 = vst [vmem:[%s5982_s22 + $0x90] sm:$0xff] %v476_v18   ;;  %481 = vst [vmem:[%s5982_s22 + $0x98] sm:$0xff] %v480_v19   ;;  %v488_v21 = vld [vmem:[%s5977_s21 + $0x150] sm:$0xff]  }
  0x1a   : > { %485 = vst [vmem:[%s5982_s22 + $0xa0] sm:$0xff] %v484_v20   ;;  %v492_v22 = vld [vmem:[%s5977_s21 + $0x160] sm:$0xff]   ;;  %v496_v23 = vld [vmem:[%s5977_s21 + $0x170] sm:$0xff]   ;;  %489 = vst [vmem:[%s5982_s22 + $0xa8] sm:$0xff] %v488_v21  }
  0x1b   : > { %493 = vst [vmem:[%s5982_s22 + $0xb0] sm:$0xff] %v492_v22   ;;  %497 = vst [vmem:[%s5982_s22 + $0xb8] sm:$0xff] %v496_v23   ;;  %v500_v24 = vld [vmem:[%s5977_s21 + $0x180] sm:$0xff]   ;;  %v504_v25 = vld [vmem:[%s5977_s21 + $0x190] sm:$0xff]  }
  0x1c   : > { %v508_v26 = vld [vmem:[%s5977_s21 + $0x1a0] sm:$0xff]   ;;  %501 = vst [vmem:[%s5982_s22 + $0xc0] sm:$0xff] %v500_v24   ;;  %505 = vst [vmem:[%s5982_s22 + $0xc8] sm:$0xff] %v504_v25   ;;  %v512_v27 = vld [vmem:[%s5977_s21 + $0x1b0] sm:$0xff]  }
  0x1d   : > { %509 = vst [vmem:[%s5982_s22 + $0xd0] sm:$0xff] %v508_v26   ;;  %v516_v28 = vld [vmem:[%s5977_s21 + $0x1c0] sm:$0xff]   ;;  %v520_v29 = vld [vmem:[%s5977_s21 + $0x1d0] sm:$0xff]   ;;  %513 = vst [vmem:[%s5982_s22 + $0xd8] sm:$0xff] %v512_v27  }
  0x1e   : > { %517 = vst [vmem:[%s5982_s22 + $0xe0] sm:$0xff] %v516_v28   ;;  %521 = vst [vmem:[%s5982_s22 + $0xe8] sm:$0xff] %v520_v29   ;;  %v524_v30 = vld [vmem:[%s5977_s21 + $0x1e0] sm:$0xff]   ;;  %v528_v31 = vld [vmem:[%s5977_s21 + $0x1f0] sm:$0xff]  }
  0x1f   : > { %525 = vst [vmem:[%s5982_s22 + $0xf0] sm:$0xff] %v524_v30   ;;  %529 = vst [vmem:[%s5982_s22 + $0xf8] sm:$0xff] %v528_v31  }
  0x20 PF: > { %p4839_p5 = scmp.ge.s32.totalorder %s5861_s27, 1  ;;  %p682_p6 = scmp.lt.s32.totalorder %s5861_s27, 3 }
  0x22   : > { %p683_p7 = pnand %p4839_p5, %p682_p6 }
  0x23   : > { %s689_s23 = sand.u32 (!%p683_p7), 1, %s5853_s25   ;;  %s5863_s25 = smov (!%p683_p7), 32  }
  0x24   : > { %686 = sbr.rel (%p683_p7) target bundleno = 1992 (0x7c8), region = 109  ;;  %s4840_s14 = sshll.u32 (!%p683_p7), %s689_s23, 8 }
  0x25   : > { %s6060_s22 = scalar_lea.vmem (!%p683_p7), [#allocation2], %s4840_s14  ;;  %s5864_s23 = smov (!%p683_p7), 96  }
  0x26   : > { %s5865_s24 = smov (!%p683_p7), 64   ;;  %s5869_s16 = smov (!%p683_p7), 124  }
  0x27   : > { %s5870_s17 = smov (!%p683_p7), 80  }
  0x29   : > { %v5337_v32 = vld [vmem:[%s7357_s1 + $0x74] ss:$8 sps:$4 sm:$0xff]   ;;  %v5339_v33 = vld [vmem:[%s7357_s1 + $0x70] ss:$8 sps:$4 sm:$0xff]   ;;  %v5341_v34 = vld [vmem:[%s7357_s1 + $0x64] ss:$8 sps:$4 sm:$0xff]  }
  0x2a   : > { %1551 = vmatprep.subr.bf16.mxu0 %v5337_v32  ;;  %v5343_v35 = vld [vmem:[%s7357_s1 + $0x60] ss:$8 sps:$4 sm:$0xff]   ;;  %v6066_v37 = vld [vmem:[%s6060_s22 + $0x18] sm:$0xff]   ;;  %v6071_v38 = vld [vmem:[%s6060_s22 + $0x10] sm:$0xff]   ;;  %vm1132_vm0 = vcmask 261120   ;;  %vm1217_vm1 = vcmask 523264  }
  0x2b   : > { %v6063_v36 = vld [vmem:[%s6060_s22 + $0x8] sm:$0xff]   ;;  %1552 = vmatpush1.bf16.msra.mxu0 %v5339_v33  ;;  %1071 = vrot.lane.b32.xlu1 %v6066_v37, %s5864_s23  ;;  %v6076_v39 = vld [vmem:[%s6060_s22 + $0x20] sm:$0xff]   ;;  %v5344_v41 = vld [vmem:[%s7357_s1 + $0x54] ss:$8 sps:$4 sm:$0xff]   ;;  %vm1274_vm2 = vcmask 785408   ;;  %vm2537_vm3 = vcmask 1043456  }
  0x2c   : > { %1553 = vmatprep.subr.bf16.mxu0 %v5341_v34  ;;  %949 = vrot.lane.b32.xlu0 %v6063_v36, %s5863_s25  ;;  %v6089_v40 = vld [vmem:[%s6060_s22 + $0x28] sm:$0xff]   ;;  %v5346_v42 = vld [vmem:[%s7357_s1 + $0x50] ss:$8 sps:$4 sm:$0xff]   ;;  %v5351_v45 = vld [vmem:[%s7357_s1 + $0x34] ss:$8 sps:$4 sm:$0xff]   ;;  %vm2452_vm4 = vcmask 326656  }
  0x2d   : > { %4895 = vmatprep.mubr.msk.bf16.mxu0 %vm1132_vm0, %v6076_v39  ;;  %v5348_v43 = vld [vmem:[%s7357_s1 + $0x44] ss:$8 sps:$4 sm:$0xff]   ;;  %v5350_v44 = vld [vmem:[%s7357_s1 + $0x40] ss:$8 sps:$4 sm:$0xff]   ;;  %v6115_v46 = vld [vmem:[%s6060_s22 + $0x30] sm:$0xff]   ;;  %vm3407_vm5 = vcmask 1041408  }
  0x2e   : > { %v5353_v47 = vld [vmem:[%s7357_s1 + $0x30] ss:$8 sps:$4 sm:$0xff]   ;;  %v5355_v48 = vld [vmem:[%s7357_s1 + $0x24] ss:$8 sps:$4 sm:$0xff]   ;;  %v5357_v49 = vld [vmem:[%s7357_s1 + $0x20] ss:$8 sps:$4 sm:$0xff]  }
  0x2f   : > { %1554 = vmatpush1.bf16.msra.mxu0 %v5343_v35  ;;  %951 = vrot.lane.b32.xlu1 %v6071_v38, %s5863_s25  ;;  %v5358_v50 = vld [vmem:[%s7357_s1 + $0x14] ss:$8 sps:$4 sm:$0xff]   ;;  %v5360_v52 = vld [vmem:[%s7357_s1 + $0x10] ss:$8 sps:$4 sm:$0xff]   ;;  %v5362_v53 = vld [vmem:[%s7357_s1 + $0x4] ss:$8 sps:$4 sm:$0xff]  }
  0x30   : > { %1010 = vrot.lane.b32.xlu0 %v6071_v38, %s5865_s24  ;;  %1555 = vmatprep.subr.bf16.mxu0 %v5344_v41  ;;  %v6136_v51 = vld [vmem:[%s6060_s22 + $0x38] sm:$0xff]   ;;  %v6151_v54 = vld [vmem:[%s6060_s22 + $0x40] sm:$0xff]   ;;  %v6170_v59 = vld [vmem:[%s6060_s22 + $0x48] sm:$0xff]   ;;  %vm2994_vm6 = vcmask 1014784   ;;  %vm2933_vm7 = vcmask 687104   ;;  %vm3025_vm8 = vcmask 654336  }
  0x31   : > { %v5364_v55 = vld [vmem:[%s7357_s1] ss:$8 sps:$4 sm:$0xff]   ;;  %v5365_v56 = vld [vmem:[%s7357_s1 + $0x94] ss:$8 sps:$4 sm:$0xff]   ;;  %v5367_v57 = vld [vmem:[%s7357_s1 + $0x90] ss:$8 sps:$4 sm:$0xff]  }
  0x32   : > { %v5370_v58 = vld [vmem:[%s7357_s1 + $0x84] ss:$8 sps:$4 sm:$0xff]   ;;  %v5372_v60 = vld [vmem:[%s7357_s1 + $0x80] ss:$8 sps:$4 sm:$0xff]   ;;  %v6184_v61 = vld [vmem:[%s6060_s22 + $0x50] sm:$0xff]   ;;  %vm3386_vm9 = vcmask 293888  }
  0x33   : > { %1073 = vrot.lane.b32.xlu1 %v6076_v39, %s5864_s23  ;;  %1556 = vmatpush1.bf16.msra.mxu0 %v5346_v42  ;;  %v6191_v62 = vld [vmem:[%s6060_s22 + $0x58] sm:$0xff]   ;;  %v6198_v63 = vld [vmem:[%s6060_s22 + $0x60] sm:$0xff]   ;;  %v6209_v0 = vld [vmem:[%s6060_s22 + $0x68] sm:$0xff]   ;;  %vm5872_vm10 = vmmov 0   ;;  %vm4613_vm11 = vcmask 982016  }
  0x34   : > { %1012 = vrot.lane.b32.xlu0 %v6066_v37, %s5865_s24  ;;  %1557 = vmatprep.subr.bf16.mxu0 %v5348_v43  ;;  %v6220_v1 = vld [vmem:[%s6060_s22 + $0x70] sm:$0xff]   ;;  %v6227_v2 = vld [vmem:[%s6060_s22 + $0x78] sm:$0xff]   ;;  %v6234_v3 = vld [vmem:[%s6060_s22 + $0x80] sm:$0xff]  }
  0x35   : > { %v6245_v4 = vld [vmem:[%s6060_s22 + $0x88] sm:$0xff]   ;;  %v6256_v5 = vld [vmem:[%s6060_s22 + $0x90] sm:$0xff]   ;;  %v6265_v6 = vld [vmem:[%s6060_s22 + $0x98] sm:$0xff]  }
  0x36   : > { %v6274_v7 = vld [vmem:[%s6060_s22 + $0xa0] sm:$0xff]   ;;  %v6283_v8 = vld [vmem:[%s6060_s22 + $0xa8] sm:$0xff]   ;;  %v6292_v9 = vld [vmem:[%s6060_s22 + $0xb0] sm:$0xff]  }
  0x37   : > { %1014 = vrot.lane.b32.xlu1 %v6076_v39, %s5865_s24  ;;  %1558 = vmatpush1.bf16.msra.mxu0 %v5350_v44  ;;  %v5368_v11 = vld [vmem:[%s6060_s22] sm:$0xff]   ;;  %v6305_v18 = vld [vmem:[%s6060_s22 + $0xb8] sm:$0xff]   ;;  %v6333_v28 = vld [vmem:[%s6060_s22 + $0xc8] sm:$0xff]  }
  0x38   : > { %953 = vrot.lane.b32.xlu0 %v6066_v37, %s5863_s25  ;;  %1559 = vmatprep.subr.bf16.mxu0 %v5351_v45  ;;  %v6319_v23 = vld [vmem:[%s6060_s22 + $0xc0] sm:$0xff]   ;;  %v6344_v34 = vld [vmem:[%s6060_s22 + $0xd0] sm:$0xff]  }
  0x3b   : > { %955 = vrot.lane.b32.xlu1 %v6076_v39, %s5863_s25  ;;  %1560 = vmatpush1.bf16.msra.mxu0 %v5353_v47 }
  0x3c   : > { %1075 = vrot.lane.b32.xlu0 %v6089_v40, %s5864_s23  ;;  %1561 = vmatprep.subr.bf16.mxu0 %v5355_v48  ;;  %v6373_v48 = vld [vmem:[%s6060_s22 + $0xe0] sm:$0xff]  }
  0x3f   : > { %1077 = vrot.lane.b32.xlu1 %v6115_v46, %s5864_s23  ;;  %1562 = vmatpush1.bf16.msra.mxu0 %v5357_v49 }
  0x40   : > { %1016 = vrot.lane.b32.xlu0 %v6089_v40, %s5865_s24  ;;  %1563 = vmatprep.subr.bf16.mxu0 %v5358_v50 }
  0x43   : > { %1018 = vrot.lane.b32.xlu1 %v6115_v46, %s5865_s24  ;;  %1564 = vmatpush1.bf16.msra.mxu0 %v5360_v52 }
  0x44   : > { %957 = vrot.lane.b32.xlu0 %v6089_v40, %s5863_s25  ;;  %1565 = vmatprep.subr.bf16.mxu0 %v5362_v53 }
  0x47   : > { %959 = vrot.lane.b32.xlu1 %v6115_v46, %s5863_s25  ;;  %1566 = vmatpush1.bf16.msra.mxu0 %v5364_v55  ;;  %v6387_v55 = vld [vmem:[%s6060_s22 + $0xe8] sm:$0xff]  }
  0x48   : > { %1079 = vrot.lane.b32.xlu0 %v6136_v51, %s5864_s23  ;;  %1579 = vmatprep.subr.bf16.mxu0 %v5365_v56 }
  0x4b   : > { %1081 = vrot.lane.b32.xlu1 %v6151_v54, %s5864_s23  ;;  %1580 = vmatpush2.bf16.msra.mxu0 %v5367_v57 }
  0x4c   : > { %1020 = vrot.lane.b32.xlu0 %v6136_v51, %s5865_s24  ;;  %1581 = vmatprep.subr.bf16.mxu0 %v5370_v58 }
  0x4f   : > { %1022 = vrot.lane.b32.xlu1 %v6151_v54, %s5865_s24  ;;  %1582 = vmatpush2.bf16.msra.mxu0 %v5372_v60 }
  0x50   : > { %961 = vrot.lane.b32.xlu0 %v6136_v51, %s5863_s25 }
  0x53   : > { %963 = vrot.lane.b32.xlu1 %v6151_v54, %s5863_s25 }
  0x54   : > { %1083 = vrot.lane.b32.xlu0 %v6170_v59, %s5864_s23 }
  0x57   : > { %1085 = vrot.lane.b32.xlu1 %v6184_v61, %s5864_s23 }
  0x58   : > { %1024 = vrot.lane.b32.xlu0 %v6170_v59, %s5865_s24 }
  0x5b   : > { %1026 = vrot.lane.b32.xlu1 %v6184_v61, %s5865_s24 }
  0x5c   : > { %965 = vrot.lane.b32.xlu0 %v6170_v59, %s5863_s25 }
  0x5f   : > { %967 = vrot.lane.b32.xlu1 %v6184_v61, %s5863_s25 }
  0x60   : > { %1087 = vrot.lane.b32.xlu0 %v6191_v62, %s5864_s23 }
  0x63   : > { %1089 = vrot.lane.b32.xlu1 %v6198_v63, %s5864_s23 }
  0x64   : > { %1028 = vrot.lane.b32.xlu0 %v6191_v62, %s5865_s24 }
  0x67   : > { %1030 = vrot.lane.b32.xlu1 %v6198_v63, %s5865_s24 }
  0x68   : > { %969 = vrot.lane.b32.xlu0 %v6191_v62, %s5863_s25 }
  0x6b   : > { %971 = vrot.lane.b32.xlu1 %v6198_v63, %s5863_s25 }
  0x6c   : > { %1091 = vrot.lane.b32.xlu0 %v6209_v0, %s5864_s23 }
  0x6f   : > { %1093 = vrot.lane.b32.xlu1 %v6220_v1, %s5864_s23 }
  0x70   : > { %1032 = vrot.lane.b32.xlu0 %v6209_v0, %s5865_s24 }
  0x73   : > { %1034 = vrot.lane.b32.xlu1 %v6220_v1, %s5865_s24 }
  0x74   : > { %973 = vrot.lane.b32.xlu0 %v6209_v0, %s5863_s25 }
  0x77   : > { %975 = vrot.lane.b32.xlu1 %v6220_v1, %s5863_s25 }
  0x78   : > { %1095 = vrot.lane.b32.xlu0 %v6227_v2, %s5864_s23 }
  0x7b   : > { %1097 = vrot.lane.b32.xlu1 %v6234_v3, %s5864_s23 }
  0x7c   : > { %1036 = vrot.lane.b32.xlu0 %v6227_v2, %s5865_s24 }
  0x7f   : > { %1038 = vrot.lane.b32.xlu1 %v6234_v3, %s5865_s24 }
  0x80   : > { %977 = vrot.lane.b32.xlu0 %v6227_v2, %s5863_s25 }
  0x83   : > { %979 = vrot.lane.b32.xlu1 %v6234_v3, %s5863_s25 }
  0x84   : > { %1099 = vrot.lane.b32.xlu0 %v6245_v4, %s5864_s23 }
  0x87   : > { %1101 = vrot.lane.b32.xlu1 %v6256_v5, %s5864_s23 }
  0x88   : > { %1040 = vrot.lane.b32.xlu0 %v6245_v4, %s5865_s24 }
  0x8b   : > { %1042 = vrot.lane.b32.xlu1 %v6256_v5, %s5865_s24 }
  0x8c   : > { %981 = vrot.lane.b32.xlu0 %v6245_v4, %s5863_s25 }
  0x8f   : > { %983 = vrot.lane.b32.xlu1 %v6256_v5, %s5863_s25 }
  0x90   : > { %1103 = vrot.lane.b32.xlu0 %v6265_v6, %s5864_s23 }
  0x93   : > { %1105 = vrot.lane.b32.xlu1 %v6274_v7, %s5864_s23 }
  0x94   : > { %1044 = vrot.lane.b32.xlu0 %v6265_v6, %s5865_s24 }
  0x97   : > { %1046 = vrot.lane.b32.xlu1 %v6274_v7, %s5865_s24 }
  0x98   : > { %985 = vrot.lane.b32.xlu0 %v6265_v6, %s5863_s25 }
  0x9b   : > { %987 = vrot.lane.b32.xlu1 %v6274_v7, %s5863_s25 }
  0x9c   : > { %1107 = vrot.lane.b32.xlu0 %v6283_v8, %s5864_s23 }
  0x9d   : > { %v1072_v12 = vpop.permute.xlu1 %1071 }
  0x9e   : > { %v950_v10 = vpop.permute.xlu0 %949 }
  0x9f   : > { %1109 = vrot.lane.b32.xlu1 %v6292_v9, %s5864_s23  ;;  %v1135_v13 = vsel %vm1132_vm0, %v5368_v11, %v950_v10 }
  0xa0   : > { %1048 = vrot.lane.b32.xlu0 %v6283_v8, %s5865_s24 }
  0xa1   : > { %v952_v16 = vpop.permute.xlu1 %951 }
  0xa2   : > { %v1011_v14 = vpop.permute.xlu0 %1010  ;;  %v1138_v19 = vsel %vm1132_vm0, %v6063_v36, %v952_v16 }
  0xa3   : > { %v1219_v15 = vsel %vm1217_vm1, %v1135_v13, %v1011_v14  ;;  %1050 = vrot.lane.b32.xlu1 %v6292_v9, %s5865_s24 }
  0xa4   : > { %v1276_v17 = vsel %vm1274_vm2, %v1219_v15, %v1072_v12  ;;  %989 = vrot.lane.b32.xlu0 %v6283_v8, %s5863_s25 }
  0xa5   : > { %1584 = vmatmul.mubr.bf16.vlgmr.msra.gmra.mxu0 %v1276_v17  ;;  %v1074_v21 = vpop.permute.xlu1 %1073  ;;  %v5866_v17 = vmov 0  }
  0xa6   : > { %v1013_v20 = vpop.permute.xlu0 %1012  ;;  %4896 = vmatprep.mubr.msk.bf16.mxu0 %vm1132_vm0, %v6089_v40  ;;  %2541 = vmatprep.subr.bf16.mxu1 %v5866_v17 }
  0xa7   : > { %v1221_v22 = vsel %vm1217_vm1, %v1138_v19, %v1013_v20  ;;  %991 = vrot.lane.b32.xlu1 %v6292_v9, %s5863_s25 }
  0xa8   : > { %1111 = vrot.lane.b32.xlu0 %v6305_v18, %s5864_s23  ;;  %v1279_v25 = vsel %vm1274_vm2, %v1221_v22, %v1074_v21 }
  0xa9   : > { %v1015_v26 = vpop.permute.xlu1 %1014 }
  0xaa   : > { %v954_v24 = vpop.permute.xlu0 %953 }
  0xab   : > { %1113 = vrot.lane.b32.xlu1 %v6319_v23, %s5864_s23  ;;  %v1141_v27 = vsel %vm1132_vm0, %v6071_v38, %v954_v24 }
  0xac   : > { %1052 = vrot.lane.b32.xlu0 %v6305_v18, %s5865_s24  ;;  %v1223_v29 = vsel %vm1217_vm1, %v1141_v27, %v1015_v26  ;;  %v5388_v26 = vld [vmem:[%s7359_s3 + $0x28] sm:$0xff]  }
  0xad   : > { %1594 = vmatmul.mubr.bf16.gmra.mxu0 %v1279_v25  ;;  %v956_v31 = vpop.permute.xlu1 %955 }
  0xae   : > { %4897 = vmatprep.mubr.msk.bf16.mxu0 %vm1132_vm0, %v6115_v46  ;;  %v1076_v30 = vpop.permute.xlu0 %1075  ;;  %v1144_v35 = vsel %vm1132_vm0, %v6066_v37, %v956_v31  ;;  %v6359_v37 = vld [vmem:[%s6060_s22 + $0xd8] sm:$0xff]  }
  0xaf   : > { %1054 = vrot.lane.b32.xlu1 %v6319_v23, %s5865_s24  ;;  %v1282_v32 = vsel %vm1274_vm2, %v1223_v29, %v1076_v30 }
  0xb0   : > { %993 = vrot.lane.b32.xlu0 %v6305_v18, %s5863_s25 }
  0xb1   : > { %v1078_v36 = vpop.permute.xlu1 %1077 }
  0xb2   : > { %v1017_v33 = vpop.permute.xlu0 %1016 }
  0xb3   : > { %995 = vrot.lane.b32.xlu1 %v6319_v23, %s5863_s25  ;;  %v1225_v38 = vsel %vm1217_vm1, %v1144_v35, %v1017_v33 }
  0xb4   : > { %1115 = vrot.lane.b32.xlu0 %v6333_v28, %s5864_s23  ;;  %v1285_v42 = vsel %vm1274_vm2, %v1225_v38, %v1078_v36  ;;  %v5390_v36 = vld [vmem:[%s7359_s3 + $0x18] sm:$0xff]  }
  0xb5   : > { %1604 = vmatmul.mubr.bf16.gmra.mxu0 %v1282_v32  ;;  %v1019_v43 = vpop.permute.xlu1 %1018 }
  0xb6   : > { %4898 = vmatprep.mubr.msk.bf16.mxu0 %vm1132_vm0, %v6136_v51  ;;  %v958_v41 = vpop.permute.xlu0 %957 }
  0xb7   : > { %1117 = vrot.lane.b32.xlu1 %v6344_v34, %s5864_s23  ;;  %v1147_v44 = vsel %vm1132_vm0, %v6076_v39, %v958_v41 }
  0xb8   : > { %1056 = vrot.lane.b32.xlu0 %v6333_v28, %s5865_s24  ;;  %v1227_v45 = vsel %vm1217_vm1, %v1147_v44, %v1019_v43  ;;  %v5391_v43 = vld [vmem:[%s7359_s3 + $0x10] sm:$0xff]  }
  0xb9   : > { %v960_v49 = vpop.permute.xlu1 %959 }
  0xba   : > { %v1080_v47 = vpop.permute.xlu0 %1079  ;;  %v1150_v52 = vsel %vm1132_vm0, %v6089_v40, %v960_v49  ;;  %v6398_v40 = vld [vmem:[%s6060_s22 + $0xf0] sm:$0xff]  }
  0xbb   : > { %1058 = vrot.lane.b32.xlu1 %v6344_v34, %s5865_s24  ;;  %v1288_v50 = vsel %vm1274_vm2, %v1227_v45, %v1080_v47  ;;  %v5392_v45 = vld [vmem:[%s7359_s3 + $0x8] sm:$0xff]  }
  0xbc   : > { %997 = vrot.lane.b32.xlu0 %v6333_v28, %s5863_s25 }
  0xbd   : > { %1614 = vmatmul.mubr.bf16.gmra.mxu0 %v1285_v42  ;;  %v1082_v53 = vpop.permute.xlu1 %1081 }
  0xbe   : > { %4899 = vmatprep.mubr.msk.bf16.mxu0 %vm1132_vm0, %v6151_v54  ;;  %v1021_v39 = vpop.permute.xlu0 %1020 }
  0xbf   : > { %999 = vrot.lane.b32.xlu1 %v6344_v34, %s5863_s25  ;;  %v1229_v56 = vsel %vm1217_vm1, %v1150_v52, %v1021_v39 }
  0xc0   : > { %1119 = vrot.lane.b32.xlu0 %v6359_v37, %s5864_s23  ;;  %v1291_v58 = vsel %vm1274_vm2, %v1229_v56, %v1082_v53  ;;  %v5394_v56 = vld [vmem:[%s7359_s3 + $0x50] ss:$0 sps:$4 sm:$0xff]  }
  0xc1   : > { %v1023_v60 = vpop.permute.xlu1 %1022 }
  0xc2   : > { %v962_v57 = vpop.permute.xlu0 %961 }
  0xc3   : > { %1121 = vrot.lane.b32.xlu1 %v6373_v48, %s5864_s23  ;;  %v1153_v10 = vsel %vm1132_vm0, %v6115_v46, %v962_v57  ;;  %v5386_v46 = vld [vmem:[%s7359_s3 + $0x38] sm:$0xff]  }
  0xc4   : > { %1060 = vrot.lane.b32.xlu0 %v6359_v37, %s5865_s24  ;;  %v1231_v11 = vsel %vm1217_vm1, %v1153_v10, %v1023_v60  ;;  %2542 = vmatpush1.bf16.msra.mxu1 %v5386_v46  ;;  %v2539_v60 = vsel %vm2537_vm3, %v5394_v56, 0  ;;  %v5397_v46 = vld [vmem:[%s7359_s3 + $0x40] sm:$0xff]  }
  0xc5   : > { %1624 = vmatmul.mubr.bf16.gmra.mxu0 %v1288_v50  ;;  %v964_v13 = vpop.permute.xlu1 %963  ;;  %2543 = vmatprep.subr.bf16.mxu1 %v5866_v17 }
  0xc6   : > { %4900 = vmatprep.mubr.msk.bf16.mxu0 %vm1132_vm0, %v6170_v59  ;;  %v1084_v12 = vpop.permute.xlu0 %1083  ;;  %v1156_v16 = vsel %vm1132_vm0, %v6136_v51, %v964_v13  ;;  %v5387_v51 = vld [vmem:[%s7359_s3 + $0x30] sm:$0xff]  }
  0xc7   : > { %1062 = vrot.lane.b32.xlu1 %v6373_v48, %s5865_s24  ;;  %v1294_v14 = vsel %vm1274_vm2, %v1231_v11, %v1084_v12  ;;  %v5396_v12 = vld [vmem:[%s7359_s3 + $0x48] sm:$0xff]  }
  0xc8   : > { %1001 = vrot.lane.b32.xlu0 %v6359_v37, %s5863_s25  ;;  %2544 = vmatpush1.bf16.msra.mxu1 %v5387_v51 }
  0xc9   : > { %v1086_v19 = vpop.permute.xlu1 %1085  ;;  %2545 = vmatprep.subr.bf16.mxu1 %v5866_v17 }
  0xca   : > { %v1025_v15 = vpop.permute.xlu0 %1024 }
  0xcb   : > { %1003 = vrot.lane.b32.xlu1 %v6373_v48, %s5863_s25  ;;  %v1233_v20 = vsel %vm1217_vm1, %v1156_v16, %v1025_v15 }
  0xcc   : > { %1123 = vrot.lane.b32.xlu0 %v6387_v55, %s5864_s23  ;;  %v1297_v22 = vsel %vm1274_vm2, %v1233_v20, %v1086_v19  ;;  %2546 = vmatpush1.bf16.msra.mxu1 %v5388_v26 }
  0xcd   : > { %1634 = vmatmul.mubr.bf16.gmra.mxu0 %v1291_v58  ;;  %v1027_v24 = vpop.permute.xlu1 %1026  ;;  %2547 = vmatprep.subr.bf16.mxu1 %v5866_v17 }
  0xce   : > { %4901 = vmatprep.mubr.msk.bf16.mxu0 %vm1132_vm0, %v6184_v61  ;;  %v966_v21 = vpop.permute.xlu0 %965 }
  0xcf   : > { %1125 = vrot.lane.b32.xlu1 %v6398_v40, %s5864_s23  ;;  %v1159_v25 = vsel %vm1132_vm0, %v6151_v54, %v966_v21  ;;  %v5389_v54 = vld [vmem:[%s7359_s3 + $0x20] sm:$0xff]   ;;  %s4841_s23 = sshll.u32 %s4832_s28, 1 }
  0xd0   : > { %1064 = vrot.lane.b32.xlu0 %v6387_v55, %s5865_s24  ;;  %v1235_v27 = vsel %vm1217_vm1, %v1159_v25, %v1027_v24  ;;  %2548 = vmatpush1.bf16.msra.mxu1 %v5389_v54  ;;  %s5867_s24 = smov 84   ;;  %p734_p8 = scmp.lt.s32.totalorder %s4841_s23, 3 }
  0xd1   : > { %v968_v30 = vpop.permute.xlu1 %967  ;;  %2549 = vmatprep.subr.bf16.mxu1 %v5866_v17 }
  0xd2   : > { %v1088_v29 = vpop.permute.xlu0 %1087  ;;  %v1162_v33 = vsel %vm1132_vm0, %v6170_v59, %v968_v30  ;;  %s7374_s23 = smov (!%p734_p8, %s4841_s23), 3 }
  0xd3   : > { %v1300_v31 = vsel %vm1274_vm2, %v1235_v27, %v1088_v29  ;;  %s4842_s14 = sshll.u32 %s7374_s23, 3 }
  0xd4   : > { %2550 = vmatpush1.bf16.msra.mxu1 %v5390_v36  ;;  %s737_s18 = scalar_lea.vmem %s7369_s13, %s4842_s14 }
  0xd5   : > { %1644 = vmatmul.mubr.bf16.gmra.mxu0 %v1294_v14  ;;  %v1090_v35 = vpop.permute.xlu1 %1089  ;;  %2551 = vmatprep.subr.bf16.mxu1 %v5866_v17 }
  0xd6   : > { %4902 = vmatprep.mubr.msk.bf16.mxu0 %vm1132_vm0, %v6191_v62  ;;  %v1029_v32 = vpop.permute.xlu0 %1028 }
  0xd7   : > { %v1237_v38 = vsel %vm1217_vm1, %v1162_v33, %v1029_v32 }
  0xd8   : > { %v1303_v42 = vsel %vm1274_vm2, %v1237_v38, %v1090_v35  ;;  %2552 = vmatpush1.bf16.msra.mxu1 %v5391_v43 }
  0xd9   : > { %v1031_v59 = vpop.permute.xlu1 %1030  ;;  %2553 = vmatprep.subr.bf16.mxu1 %v5866_v17 }
  0xda   : > { %v970_v41 = vpop.permute.xlu0 %969 }
  0xdb   : > { %v1165_v44 = vsel %vm1132_vm0, %v6184_v61, %v970_v41  ;;  %v5393_v61 = vld [vmem:[%s7359_s3] sm:$0xff]  }
  0xdc   : > { %v1239_v47 = vsel %vm1217_vm1, %v1165_v44, %v1031_v59  ;;  %2554 = vmatpush1.bf16.msra.mxu1 %v5392_v45 }
  0xdd   : > { %1654 = vmatmul.mubr.bf16.gmra.mxu0 %v1297_v22  ;;  %v972_v50 = vpop.permute.xlu1 %971  ;;  %2555 = vmatprep.subr.bf16.mxu1 %v5866_v17 }
  0xde   : > { %4903 = vmatprep.mubr.msk.bf16.mxu0 %vm1132_vm0, %v6198_v63  ;;  %v1092_v49 = vpop.permute.xlu0 %1091  ;;  %v1168_v53 = vsel %vm1132_vm0, %v6191_v62, %v972_v50 }
  0xdf   : > { %v1306_v39 = vsel %vm1274_vm2, %v1239_v47, %v1092_v49 }
  0xe0   : > { %2556 = vmatpush1.bf16.msra.mxu1 %v5393_v61 }
  0xe1   : > { %2567 = vmatprep.subr.bf16.mxu1 %v5866_v17  ;;  %v1094_v57 = vpop.permute.xlu1 %1093 }
  0xe2   : > { %v1033_v52 = vpop.permute.xlu0 %1032 }
  0xe3   : > { %v1241_v58 = vsel %vm1217_vm1, %v1168_v53, %v1033_v52 }
  0xe4   : > { %2568 = vmatpush2.bf16.msra.mxu1 %v2539_v60  ;;  %v1309_v62 = vsel %vm1274_vm2, %v1241_v58, %v1094_v57 }
  0xe5   : > { %1664 = vmatmul.mubr.bf16.gmra.mxu0 %v1300_v31  ;;  %2569 = vmatprep.subr.bf16.mxu1 %v5866_v17  ;;  %v1035_v11 = vpop.permute.xlu1 %1034 }
  0xe6   : > { %4904 = vmatprep.mubr.msk.bf16.mxu0 %vm1132_vm0, %v6209_v0  ;;  %v974_v10 = vpop.permute.xlu0 %973 }
  0xe7   : > { %v1171_v13 = vsel %vm1132_vm0, %v6198_v63, %v974_v10 }
  0xe8   : > { %2570 = vmatpush2.bf16.msra.mxu1 %v5396_v12  ;;  %v1243_v14 = vsel %vm1217_vm1, %v1171_v13, %v1035_v11 }
  0xe9   : > { %2571 = vmatprep.subr.bf16.mxu1 %v5866_v17  ;;  %v976_v16 = vpop.permute.xlu1 %975 }
  0xea   : > { %v1096_v15 = vpop.permute.xlu0 %1095  ;;  %v1174_v63 = vsel %vm1132_vm0, %v6209_v0, %v976_v16 }
  0xeb   : > { %v1312_v19 = vsel %vm1274_vm2, %v1243_v14, %v1096_v15 }
  0xec   : > { %2572 = vmatpush2.bf16.msra.mxu1 %v5397_v46 }
  0xed   : > { %1674 = vmatmul.mubr.bf16.gmra.mxu0 %v1303_v42  ;;  %v1098_v21 = vpop.permute.xlu1 %1097 }
  0xee   : > { %4905 = vmatprep.mubr.msk.bf16.mxu0 %vm1132_vm0, %v6220_v1  ;;  %v1037_v20 = vpop.permute.xlu0 %1036 }
  0xef   : > { %v1245_v22 = vsel %vm1217_vm1, %v1174_v63, %v1037_v20 }
  0xf0   : > { %v1315_v51 = vsel %vm1274_vm2, %v1245_v22, %v1098_v21 }
  0xf1   : > { %v1039_v25 = vpop.permute.xlu1 %1038 }
  0xf2   : > { %v978_v24 = vpop.permute.xlu0 %977 }
  0xf3   : > { %v1177_v26 = vsel %vm1132_vm0, %v6220_v1, %v978_v24 }
  0xf4   : > { %v1247_v27 = vsel %vm1217_vm1, %v1177_v26, %v1039_v25 }
  0xf5   : > { %1684 = vmatmul.mubr.bf16.gmra.mxu0 %v1306_v39  ;;  %v980_v29 = vpop.permute.xlu1 %979 }
  0xf6   : > { %4906 = vmatprep.mubr.msk.bf16.mxu0 %vm1132_vm0, %v6227_v2  ;;  %v1100_v0 = vpop.permute.xlu0 %1099  ;;  %v1180_v54 = vsel %vm1132_vm0, %v6227_v2, %v980_v29 }
  0xf7   : > { %v1318_v30 = vsel %vm1274_vm2, %v1247_v27, %v1100_v0  ;;  %v1381_v27 = vlaneseq }
  0xf9   : > { %v1102_v32 = vpop.permute.xlu1 %1101  ;;  %v6556_v29 = vshrl.u32 %v1381_v27, 7 }
  0xfa   : > { %v1041_v31 = vpop.permute.xlu0 %1040 }
  0xfb   : > { %v1249_v1 = vsel %vm1217_vm1, %v1180_v54, %v1041_v31 }
  0xfc   : > { %v1321_v35 = vsel %vm1274_vm2, %v1249_v1, %v1102_v32  ;;  %v1379_v1 = vld [vmem:[%s7358_s2] sm:$0x3] }
  0xfd   : > { %1694 = vmatmul.mubr.bf16.gmra.mxu0 %v1309_v62  ;;  %v1043_v36 = vpop.permute.xlu1 %1042 }
  0xfe   : > { %4907 = vmatprep.mubr.msk.bf16.mxu0 %vm1132_vm0, %v6234_v3  ;;  %v982_v33 = vpop.permute.xlu0 %981 }
  0xff   : > { %v1183_v38 = vsel %vm1132_vm0, %v6234_v3, %v982_v33  ;;  %v1387_v33 = vsub.s32 1, %v6556_v29 }
 0x100   : > { %v1251_v41 = vsel %vm1217_vm1, %v1183_v38, %v1043_v36 }
 0x101   : > { %v984_v42 = vpop.permute.xlu1 %983 }
 0x102   : > { %v1104_v2 = vpop.permute.xlu0 %1103  ;;  %v1186_v44 = vsel %vm1132_vm0, %v6245_v4, %v984_v42 }
 0x103   : > { %v1324_v59 = vsel %vm1274_vm2, %v1251_v41, %v1104_v2 }
 0x105   : > { %1704 = vmatmul.mubr.bf16.gmra.mxu0 %v1312_v19  ;;  %v1106_v45 = vpop.permute.xlu1 %1105 }
 0x106   : > { %4908 = vmatprep.mubr.msk.bf16.mxu0 %vm1132_vm0, %v6245_v4  ;;  %v1045_v43 = vpop.permute.xlu0 %1044 }
 0x107   : > { %v1253_v3 = vsel %vm1217_vm1, %v1186_v44, %v1045_v43 }
 0x108   : > { %v1327_v49 = vsel %vm1274_vm2, %v1253_v3, %v1106_v45 }
 0x109   : > { %v1047_v50 = vpop.permute.xlu1 %1046 }
 0x10a   : > { %v986_v47 = vpop.permute.xlu0 %985 }
 0x10b   : > { %v1189_v39 = vsel %vm1132_vm0, %v6256_v5, %v986_v47 }
 0x10c   : > { %v1255_v61 = vsel %vm1217_vm1, %v1189_v39, %v1047_v50 }
 0x10d   : > { %1714 = vmatmul.mubr.bf16.gmra.mxu0 %v1315_v51  ;;  %v988_v52 = vpop.permute.xlu1 %987 }
 0x10e   : > { %4909 = vmatprep.mubr.msk.bf16.mxu0 %vm1132_vm0, %v6256_v5  ;;  %v1108_v4 = vpop.permute.xlu0 %1107  ;;  %v1192_v57 = vsel %vm1132_vm0, %v6265_v6, %v988_v52 }
 0x10f   : > { %v1330_v53 = vsel %vm1274_vm2, %v1255_v61, %v1108_v4 }
 0x111   : > { %v1110_v58 = vpop.permute.xlu1 %1109 }
 0x112   : > { %v1049_v56 = vpop.permute.xlu0 %1048 }
 0x113   : > { %v1257_v5 = vsel %vm1217_vm1, %v1192_v57, %v1049_v56 }
 0x114   : > { %v1333_v10 = vsel %vm1274_vm2, %v1257_v5, %v1110_v58 }
 0x115   : > { %1724 = vmatmul.mubr.bf16.gmra.mxu0 %v1318_v30  ;;  %v1051_v62 = vpop.permute.xlu1 %1050 }
 0x116   : > { %4910 = vmatprep.mubr.msk.bf16.mxu0 %vm1132_vm0, %v6265_v6  ;;  %v990_v60 = vpop.permute.xlu0 %989 }
 0x117   : > { %v1195_v11 = vsel %vm1132_vm0, %v6274_v7, %v990_v60 }
 0x118   : > { %v1259_v12 = vsel %vm1217_vm1, %v1195_v11, %v1051_v62 }
 0x119   : > { %v992_v13 = vpop.permute.xlu1 %991 }
 0x11a   : > { %v1112_v6 = vpop.permute.xlu0 %1111  ;;  %v1198_v46 = vsel %vm1132_vm0, %v6283_v8, %v992_v13 }
 0x11b   : > { %v1336_v14 = vsel %vm1274_vm2, %v1259_v12, %v1112_v6 }
 0x11d   : > { %1734 = vmatmul.mubr.bf16.gmra.mxu0 %v1321_v35  ;;  %v1114_v16 = vpop.permute.xlu1 %1113 }
 0x11e   : > { %4911 = vmatprep.mubr.msk.bf16.mxu0 %vm1132_vm0, %v6274_v7  ;;  %v1053_v15 = vpop.permute.xlu0 %1052 }
 0x11f   : > { %v1261_v7 = vsel %vm1217_vm1, %v1198_v46, %v1053_v15 }
 0x120   : > { %v1339_v20 = vsel %vm1274_vm2, %v1261_v7, %v1114_v16  ;;  %v5395_v16 = vld [vmem:[%s6060_s22 + $0xf8] sm:$0xff]   ;;  %s5868_s22 = smov 40  }
 0x121   : > { %v1055_v63 = vpop.permute.xlu1 %1054 }
 0x122   : > { %v994_v19 = vpop.permute.xlu0 %993 }
 0x123   : > { %v1201_v21 = vsel %vm1132_vm0, %v6292_v9, %v994_v19 }
 0x124   : > { %v1263_v22 = vsel %vm1217_vm1, %v1201_v21, %v1055_v63 }
 0x125   : > { %1744 = vmatmul.mubr.bf16.gmra.mxu0 %v1324_v59  ;;  %v996_v24 = vpop.permute.xlu1 %995 }
 0x126   : > { %4912 = vmatprep.mubr.msk.bf16.mxu0 %vm1132_vm0, %v6283_v8  ;;  %v1116_v8 = vpop.permute.xlu0 %1115  ;;  %v1204_v26 = vsel %vm1132_vm0, %v6305_v18, %v996_v24 }
 0x127   : > { %v1342_v51 = vsel %vm1274_vm2, %v1263_v22, %v1116_v8 }
 0x129   : > { %v1118_v0 = vpop.permute.xlu1 %1117 }
 0x12a   : > { %v1057_v25 = vpop.permute.xlu0 %1056 }
 0x12d   : > { %1754 = vmatmul.mubr.bf16.gmra.mxu0 %v1327_v49  ;;  %v1059_v54 = vpop.permute.xlu1 %1058 }
 0x12e   : > { %4913 = vmatprep.mubr.msk.bf16.mxu0 %vm1132_vm0, %v6292_v9  ;;  %v1265_v9 = vsel %vm1217_vm1, %v1204_v26, %v1057_v25  ;;  %v998_v30 = vpop.permute.xlu0 %997 }
 0x12f   : > { %v1345_v31 = vsel %vm1274_vm2, %v1265_v9, %v1118_v0  ;;  %v1207_v32 = vsel %vm1132_vm0, %v6319_v23, %v998_v30 }
 0x130   : > { %v1267_v35 = vsel %vm1217_vm1, %v1207_v32, %v1059_v54 }
 0x131   : > { %v1000_v38 = vpop.permute.xlu1 %999 }
 0x132   : > { %v1120_v36 = vpop.permute.xlu0 %1119  ;;  %v1210_v59 = vsel %vm1132_vm0, %v6333_v28, %v1000_v38 }
 0x135   : > { %1764 = vmatmul.mubr.bf16.gmra.mxu0 %v1330_v53  ;;  %v1122_v47 = vpop.permute.xlu1 %1121 }
 0x136   : > { %4914 = vmatprep.mubr.msk.bf16.mxu0 %vm1132_vm0, %v6305_v18  ;;  %v1383_v18 = vsub.s32 0, %v6556_v29  ;;  %v1061_v42 = vpop.permute.xlu0 %1060 }
 0x137   : > { %v1269_v49 = vsel %vm1217_vm1, %v1210_v59, %v1061_v42 }
 0x138   : > { %v6571_v41 = vrot.slane %v1379_v1, %v1383_v18  ;;  %v1351_v56 = vsel %vm1274_vm2, %v1269_v49, %v1122_v47 }
 0x13a   : > { %v1002_v52 = vpop.permute.xlu0 %1001 }
 0x13b   : > { %v1213_v5 = vsel %vm1132_vm0, %v6344_v34, %v1002_v52 }
 0x13d   : > { %1774 = vmatmul.mubr.bf16.gmra.mxu0 %v1333_v10 }
 0x13e   : > { %4915 = vmatprep.mubr.msk.bf16.mxu0 %vm1132_vm0, %v6319_v23  ;;  %v1348_v23 = vsel %vm1274_vm2, %v1267_v35, %v1120_v36  ;;  %v1124_v6 = vpop.permute.xlu0 %1123 }
 0x142   : > { %v1065_v21 = vpop.permute.xlu0 %1064 }
 0x145   : > { %1784 = vmatmul.mubr.bf16.gmra.mxu0 %v1336_v14 }
 0x146   : > { %4916 = vmatprep.mubr.msk.bf16.mxu0 %vm1132_vm0, %v6333_v28 }
 0x14d   : > { %1794 = vmatmul.mubr.bf16.gmra.mxu0 %v1339_v20 }
 0x14e   : > { %4917 = vmatprep.mubr.msk.bf16.mxu0 %vm1132_vm0, %v6344_v34 }
 0x155   : > { %1804 = vmatmul.mubr.bf16.gmra.mxu0 %v1342_v51 }
 0x156   : > { %4918 = vmatprep.mubr.msk.bf16.mxu0 %vm1132_vm0, %v6359_v37 }
 0x15d   : > { %1814 = vmatmul.mubr.bf16.gmra.mxu0 %v1345_v31 }
 0x15e   : > { %4919 = vmatprep.mubr.msk.bf16.mxu0 %vm1132_vm0, %v6373_v48  ;;  %v6576_v48 = vrot.slane %v1379_v1, %v1387_v33 }
 0x165   : > { %v1585_v2 = vpop.f32.mrf.mxu0  ;;  %1824 = vmatmul.mubr.bf16.gmra.mxu0 %v1348_v23 }
 0x166   : > { %v1586_v43 = vadd.f32 %v1585_v2, %v6571_v41  ;;  %4920 = vmatprep.mubr.msk.bf16.mxu0 %vm1132_vm0, %v6387_v55  ;;  %v1063_v55 = vpop.permute.xlu1 %1062 }
 0x167   : > { %v1587_v44 = vpop.f32.mrf.mxu0  ;;  %v1271_v12 = vsel %vm1217_vm1, %v1213_v5, %v1063_v55 }
 0x168   : > { %v1864_v45 = vmul.f32 0.5, %v1586_v43  ;;  %v1588_v3 = vadd.f32 %v1587_v44, %v6576_v48 }
 0x169   : > { %v1589_v50 = vpop.f32.mrf.mxu0 }
 0x16a   : > { %v1865_v39 = vmul.f32 0.5, %v1588_v3  ;;  %v1590_v61 = vadd.f32 %v1589_v50, %v6571_v41  ;;  %5527 = vtanh.f32 %v1864_v45  ;;  %v1004_v46 = vpop.permute.xlu1 %1003 }
 0x16b   : > { %v1591_v4 = vpop.f32.mrf.mxu0  ;;  %v1216_v20 = vsel %vm1132_vm0, %v6359_v37, %v1004_v46 }
 0x16c   : > { %v1866_v28 = vmul.f32 0.5, %v1590_v61  ;;  %v1592_v53 = vadd.f32 %v1591_v4, %v6576_v48  ;;  %5529 = vtanh.f32 %v1865_v39  ;;  %v1273_v26 = vsel %vm1217_vm1, %v1216_v20, %v1065_v21 }
 0x16d   : > { %v1595_v57 = vpop.f32.mrf.mxu0  ;;  %1834 = vmatmul.mubr.bf16.gmra.mxu0 %v1351_v56 }
 0x16e   : > { %5531 = vtanh.f32 %v1866_v28  ;;  %v1867_v58 = vmul.f32 0.5, %v1592_v53  ;;  %v1596_v60 = vadd.f32 %v1595_v57, %v6571_v41  ;;  %4921 = vmatprep.mubr.msk.bf16.mxu0 %vm1132_vm0, %v6398_v40  ;;  %v1354_v40 = vsel %vm1274_vm2, %v1271_v12, %v1124_v6  ;;  %v1126_v27 = vpop.permute.xlu1 %1125 }
 0x16f   : > { %v1597_v10 = vpop.f32.mrf.mxu0  ;;  %v1357_v1 = vsel %vm1274_vm2, %v1273_v26, %v1126_v27 }
 0x170   : > { %5533 = vtanh.f32 %v1867_v58  ;;  %v1868_v62 = vmul.f32 0.5, %v1596_v60  ;;  %v1598_v11 = vadd.f32 %v1597_v10, %v6576_v48 }
 0x171   : > { %v1599_v13 = vpop.f32.mrf.mxu0 }
 0x172   : > { %v1869_v14 = vmul.f32 0.5, %v1598_v11  ;;  %v1600_v15 = vadd.f32 %v1599_v13, %v6571_v41  ;;  %5535 = vtanh.f32 %v1868_v62 }
 0x173   : > { %v1601_v34 = vpop.f32.mrf.mxu0 }
 0x174   : > { %v1870_v7 = vmul.f32 0.5, %v1600_v15  ;;  %v1602_v19 = vadd.f32 %v1601_v34, %v6576_v48  ;;  %5537 = vtanh.f32 %v1869_v14 }
 0x175   : > { %v1605_v63 = vpop.f32.mrf.mxu0  ;;  %1844 = vmatmul.mubr.bf16.gmra.mxu0 %v1354_v40 }
 0x176   : > { %5539 = vtanh.f32 %v1870_v7  ;;  %v1871_v22 = vmul.f32 0.5, %v1602_v19  ;;  %v1606_v8 = vadd.f32 %v1605_v63, %v6571_v41  ;;  %4922 = vmatprep.mubr.msk.bf16.mxu0 %vm1132_vm0, %v5395_v16 }
 0x177   : > { %v1607_v24 = vpop.f32.mrf.mxu0  ;;  %v5528_v0 = vpop.eup %5527 }
 0x178   : > { %5541 = vtanh.f32 %v1871_v22  ;;  %v1872_v51 = vmul.f32 0.5, %v1606_v8  ;;  %v1608_v25 = vadd.f32 %v1607_v24, %v6576_v48  ;;  %v2088_v59 = vmul.f32 0.5, %v5528_v0 }
 0x179   : > { %v1609_v9 = vpop.f32.mrf.mxu0  ;;  %v5530_v37 = vpop.eup %5529 }
 0x17a   : > { %v1873_v30 = vmul.f32 0.5, %v1608_v25  ;;  %v1610_v31 = vadd.f32 %v1609_v9, %v6571_v41  ;;  %5543 = vtanh.f32 %v1872_v51  ;;  %v2089_v42 = vmul.f32 0.5, %v5530_v37 }
 0x17b   : > { %v5532_v54 = vpop.eup %5531  ;;  %v1611_v32 = vpop.f32.mrf.mxu0  ;;  %v2200_v53 = vadd.f32 0.5, %v2088_v59 }
 0x17c   : > { %v2090_v35 = vmul.f32 0.5, %v5532_v54  ;;  %v1874_v36 = vmul.f32 0.5, %v1610_v31  ;;  %v1612_v38 = vadd.f32 %v1611_v32, %v6576_v48  ;;  %5545 = vtanh.f32 %v1873_v30 }
 0x17d   : > { %v5534_v23 = vpop.eup %5533  ;;  %v1615_v2 = vpop.f32.mrf.mxu0  ;;  %1854 = vmatmul.mubr.bf16.gmra.mxu0 %v1357_v1  ;;  %v2201_v4 = vadd.f32 0.5, %v2089_v42 }
 0x17e   : > { %5547 = vtanh.f32 %v1874_v36  ;;  %v1875_v43 = vmul.f32 0.5, %v1612_v38  ;;  %v1616_v44 = vadd.f32 %v1615_v2, %v6571_v41  ;;  %v2091_v3 = vmul.f32 0.5, %v5534_v23 }
 0x17f   : > { %v1617_v45 = vpop.f32.mrf.mxu0  ;;  %v2202_v47 = vadd.f32 0.5, %v2090_v35  ;;  %v5536_v50 = vpop.eup %5535 }
 0x180   : > { %5549 = vtanh.f32 %v1875_v43  ;;  %v1618_v49 = vadd.f32 %v1617_v45, %v6576_v48  ;;  %v1876_v39 = vmul.f32 0.5, %v1616_v44  ;;  %v2203_v52 = vadd.f32 0.5, %v2091_v3 }
 0x181   : > { %v1619_v61 = vpop.f32.mrf.mxu0  ;;  %v5538_v28 = vpop.eup %5537  ;;  %v2312_v62 = vpack.c.bf16 %v2202_v47, %v2200_v53  ;;  %v2092_v12 = vmul.f32 0.5, %v5536_v50 }
 0x182   : > { %v1877_v56 = vmul.f32 0.5, %v1618_v49  ;;  %v1620_v57 = vadd.f32 %v1619_v61, %v6571_v41  ;;  %v2313_v5 = vpack.c.bf16 %v2203_v52, %v2201_v4  ;;  %v2093_v6 = vmul.f32 0.5, %v5538_v28 }
 0x183   : > { %v5540_v55 = vpop.eup %5539  ;;  %v1621_v58 = vpop.f32.mrf.mxu0  ;;  %v2204_v63 = vadd.f32 0.5, %v2092_v12 }
 0x184   : > { %v2094_v60 = vmul.f32 0.5, %v5540_v55  ;;  %5551 = vtanh.f32 %v1877_v56  ;;  %v1622_v10 = vadd.f32 %v1621_v58, %v6576_v48  ;;  %v1878_v13 = vmul.f32 0.5, %v1620_v57  ;;  %4934 = vmatprep.mubr.msk.bf16.mxu1 %vm2452_vm4, %v2313_v5 }
 0x185   : > { %v5542_v11 = vpop.eup %5541  ;;  %5553 = vtanh.f32 %v1876_v39  ;;  %v1625_v14 = vpop.f32.mrf.mxu0  ;;  %2574 = vmatmul.mubr.bf16.vlgmr.msra.gmra.mxu1 %v2312_v62  ;;  %v2205_v21 = vadd.f32 0.5, %v2093_v6 }
 0x186   : > { %v2095_v15 = vmul.f32 0.5, %v5542_v11  ;;  %v1879_v46 = vmul.f32 0.5, %v1622_v10  ;;  %v1626_v16 = vadd.f32 %v1625_v14, %v6571_v41  ;;  %v2206_v34 = vadd.f32 0.5, %v2094_v60 }
 0x187   : > { %5555 = vtanh.f32 %v1878_v13  ;;  %v1627_v7 = vpop.f32.mrf.mxu0  ;;  %v5544_v20 = vpop.eup %5543 }
 0x188   : > { %v2207_v19 = vadd.f32 0.5, %v2095_v15  ;;  %5557 = vtanh.f32 %v1879_v46  ;;  %v1880_v40 = vmul.f32 0.5, %v1626_v16  ;;  %v1628_v22 = vadd.f32 %v1627_v7, %v6576_v48 }
 0x189   : > { %v1629_v8 = vpop.f32.mrf.mxu0  ;;  %v5546_v24 = vpop.eup %5545  ;;  %v2314_v9 = vpack.c.bf16 %v2206_v34, %v2204_v63  ;;  %v2096_v32 = vmul.f32 0.5, %v5544_v20 }
 0x18a   : > { %v1630_v51 = vadd.f32 %v1629_v8, %v6571_v41  ;;  %v1881_v26 = vmul.f32 0.5, %v1628_v22  ;;  %v2315_v0 = vpack.c.bf16 %v2207_v19, %v2205_v21  ;;  %5559 = vtanh.f32 %v1880_v40 }
 0x18b   : > { %v5548_v25 = vpop.eup %5547  ;;  %v1631_v27 = vpop.f32.mrf.mxu0  ;;  %v2097_v1 = vmul.f32 0.5, %v5546_v24  ;;  %v2208_v45 = vadd.f32 0.5, %v2096_v32 }
 0x18c   : > { %v2098_v37 = vmul.f32 0.5, %v5548_v25  ;;  %v1882_v30 = vmul.f32 0.5, %v1630_v51  ;;  %v1632_v31 = vadd.f32 %v1631_v27, %v6576_v48  ;;  %5561 = vtanh.f32 %v1881_v26  ;;  %4935 = vmatprep.mubr.msk.bf16.mxu1 %vm2452_vm4, %v2315_v0 }
 0x18d   : > { %v5550_v54 = vpop.eup %5549  ;;  %v1635_v35 = vpop.f32.mrf.mxu0  ;;  %2582 = vmatmul.mubr.bf16.gmra.mxu1 %v2314_v9  ;;  %v2209_v3 = vadd.f32 0.5, %v2097_v1 }
 0x18e   : > { %v2099_v36 = vmul.f32 0.5, %v5550_v54  ;;  %5563 = vtanh.f32 %v1882_v30  ;;  %v1883_v38 = vmul.f32 0.5, %v1632_v31  ;;  %v2210_v23 = vadd.f32 0.5, %v2098_v37 }
 0x18f   : > { %v1636_v2 = vadd.f32 %v1635_v35, %v6571_v41  ;;  %v1637_v42 = vpop.f32.mrf.mxu0 }
 0x190   : > { %v2211_v59 = vadd.f32 0.5, %v2099_v36  ;;  %5565 = vtanh.f32 %v1883_v38  ;;  %v1638_v43 = vadd.f32 %v1637_v42, %v6576_v48  ;;  %v2316_v28 = vpack.c.bf16 %v2210_v23, %v2208_v45 }
 0x191   : > { %v5552_v44 = vpop.eup %5551  ;;  %v1884_v47 = vmul.f32 0.5, %v1636_v2  ;;  %v1639_v49 = vpop.f32.mrf.mxu0 }
 0x192   : > { %v5554_v50 = vpop.eup %5553  ;;  %v1885_v39 = vmul.f32 0.5, %v1638_v43  ;;  %v1640_v61 = vadd.f32 %v1639_v49, %v6571_v41  ;;  %v2317_v52 = vpack.c.bf16 %v2211_v59, %v2209_v3  ;;  %v2101_v56 = vmul.f32 0.5, %v5552_v44 }
 0x193   : > { %v1641_v4 = vpop.f32.mrf.mxu0  ;;  %5567 = vtanh.f32 %v1884_v47  ;;  %v2100_v5 = vmul.f32 0.5, %v5554_v50 }
 0x194   : > { %v5556_v53 = vpop.eup %5555  ;;  %v1886_v55 = vmul.f32 0.5, %v1640_v61  ;;  %v1642_v57 = vadd.f32 %v1641_v4, %v6576_v48  ;;  %5569 = vtanh.f32 %v1885_v39  ;;  %4936 = vmatprep.mubr.msk.bf16.mxu1 %vm2452_vm4, %v2317_v52  ;;  %v2213_v14 = vadd.f32 0.5, %v2101_v56 }
 0x195   : > { %v5558_v58 = vpop.eup %5557  ;;  %v2102_v60 = vmul.f32 0.5, %v5556_v53  ;;  %v1645_v10 = vpop.f32.mrf.mxu0  ;;  %2590 = vmatmul.mubr.bf16.gmra.mxu1 %v2316_v28  ;;  %v2212_v34 = vadd.f32 0.5, %v2100_v5 }
 0x196   : > { %v2103_v62 = vmul.f32 0.5, %v5558_v58  ;;  %5571 = vtanh.f32 %v1886_v55  ;;  %v1887_v11 = vmul.f32 0.5, %v1642_v57  ;;  %v1646_v12 = vadd.f32 %v1645_v10, %v6571_v41 }
 0x197   : > { %v2214_v6 = vadd.f32 0.5, %v2102_v60  ;;  %v1647_v13 = vpop.f32.mrf.mxu0  ;;  %v5560_v16 = vpop.eup %5559 }
 0x198   : > { %v2215_v15 = vadd.f32 0.5, %v2103_v62  ;;  %5573 = vtanh.f32 %v1887_v11  ;;  %v1888_v46 = vmul.f32 0.5, %v1646_v12  ;;  %v1648_v7 = vadd.f32 %v1647_v13, %v6576_v48 }
 0x199   : > { %v1649_v19 = vpop.f32.mrf.mxu0  ;;  %v5562_v40 = vpop.eup %5561  ;;  %v2318_v51 = vpack.c.bf16 %v2214_v6, %v2212_v34  ;;  %v2104_v37 = vmul.f32 0.5, %v5560_v16 }
 0x19a   : > { %v1650_v20 = vadd.f32 %v1649_v19, %v6571_v41  ;;  %v2319_v63 = vpack.c.bf16 %v2215_v15, %v2213_v14  ;;  %v2105_v22 = vmul.f32 0.5, %v5562_v40  ;;  %v1889_v8 = vmul.f32 0.5, %v1648_v7 }
 0x19b   : > { %v5564_v21 = vpop.eup %5563  ;;  %v1651_v24 = vpop.f32.mrf.mxu0  ;;  %5575 = vtanh.f32 %v1888_v46  ;;  %v2216_v43 = vadd.f32 0.5, %v2104_v37 }
 0x19c   : > { %v2106_v25 = vmul.f32 0.5, %v5564_v21  ;;  %v1890_v26 = vmul.f32 0.5, %v1650_v20  ;;  %v1652_v27 = vadd.f32 %v1651_v24, %v6576_v48  ;;  %4937 = vmatprep.mubr.msk.bf16.mxu1 %vm2452_vm4, %v2319_v63  ;;  %5577 = vtanh.f32 %v1889_v8 }
 0x19d   : > { %v5566_v0 = vpop.eup %5565  ;;  %v1655_v9 = vpop.f32.mrf.mxu0  ;;  %2598 = vmatmul.mubr.bf16.gmra.mxu1 %v2318_v51  ;;  %v2217_v54 = vadd.f32 0.5, %v2105_v22 }
 0x19e   : > { %v2107_v30 = vmul.f32 0.5, %v5566_v0  ;;  %5579 = vtanh.f32 %v1890_v26  ;;  %v1891_v31 = vmul.f32 0.5, %v1652_v27  ;;  %v1656_v32 = vadd.f32 %v1655_v9, %v6571_v41 }
 0x19f   : > { %v1657_v1 = vpop.f32.mrf.mxu0  ;;  %v2218_v35 = vadd.f32 0.5, %v2106_v25 }
 0x1a0   : > { %v2219_v36 = vadd.f32 0.5, %v2107_v30  ;;  %5581 = vtanh.f32 %v1891_v31  ;;  %v1658_v38 = vadd.f32 %v1657_v1, %v6576_v48  ;;  %v5568_v23 = vpop.eup %5567  ;;  %v1892_v2 = vmul.f32 0.5, %v1656_v32 }
 0x1a1   : > { %v1659_v42 = vpop.f32.mrf.mxu0  ;;  %v5570_v59 = vpop.eup %5569  ;;  %v2320_v61 = vpack.c.bf16 %v2218_v35, %v2216_v43  ;;  %v2108_v52 = vmul.f32 0.5, %v5568_v23 }
 0x1a2   : > { %v1893_v44 = vmul.f32 0.5, %v1658_v38  ;;  %v1660_v45 = vadd.f32 %v1659_v42, %v6571_v41  ;;  %v2321_v3 = vpack.c.bf16 %v2219_v36, %v2217_v54  ;;  %5583 = vtanh.f32 %v1892_v2 }
 0x1a3   : > { %v5572_v47 = vpop.eup %5571  ;;  %v1661_v49 = vpop.f32.mrf.mxu0  ;;  %v2109_v28 = vmul.f32 0.5, %v5570_v59  ;;  %v2220_v6 = vadd.f32 0.5, %v2108_v52 }
 0x1a4   : > { %v2110_v50 = vmul.f32 0.5, %v5572_v47  ;;  %v1894_v39 = vmul.f32 0.5, %v1660_v45  ;;  %4938 = vmatprep.mubr.msk.bf16.mxu1 %vm2452_vm4, %v2321_v3  ;;  %5585 = vtanh.f32 %v1893_v44  ;;  %v1662_v53 = vadd.f32 %v1661_v49, %v6576_v48 }
 0x1a5   : > { %v5574_v4 = vpop.eup %5573  ;;  %v1665_v56 = vpop.f32.mrf.mxu0  ;;  %2606 = vmatmul.mubr.bf16.gmra.mxu1 %v2320_v61  ;;  %v2221_v13 = vadd.f32 0.5, %v2109_v28 }
 0x1a6   : > { %v2111_v55 = vmul.f32 0.5, %v5574_v4  ;;  %5587 = vtanh.f32 %v1894_v39  ;;  %v1666_v57 = vadd.f32 %v1665_v56, %v6571_v41  ;;  %v2222_v58 = vadd.f32 0.5, %v2110_v50 }
 0x1a7   : > { %v1895_v5 = vmul.f32 0.5, %v1662_v53  ;;  %v1667_v60 = vpop.f32.mrf.mxu0 }
 0x1a8   : > { %v2223_v10 = vadd.f32 0.5, %v2111_v55  ;;  %v1896_v62 = vmul.f32 0.5, %v1666_v57  ;;  %v1668_v11 = vadd.f32 %v1667_v60, %v6576_v48  ;;  %v5576_v12 = vpop.eup %5575  ;;  %v2322_v20 = vpack.c.bf16 %v2222_v58, %v2220_v6 }
 0x1a9   : > { %5589 = vtanh.f32 %v1895_v5  ;;  %v1669_v14 = vpop.f32.mrf.mxu0  ;;  %v5578_v15 = vpop.eup %5577  ;;  %v2112_v51 = vmul.f32 0.5, %v5576_v12 }
 0x1aa   : > { %v1897_v46 = vmul.f32 0.5, %v1668_v11  ;;  %v1670_v16 = vadd.f32 %v1669_v14, %v6571_v41  ;;  %v2113_v7 = vmul.f32 0.5, %v5578_v15  ;;  %v2323_v40 = vpack.c.bf16 %v2223_v10, %v2221_v13 }
 0x1ab   : > { %v5580_v34 = vpop.eup %5579  ;;  %v1671_v19 = vpop.f32.mrf.mxu0  ;;  %5591 = vtanh.f32 %v1896_v62  ;;  %v2224_v36 = vadd.f32 0.5, %v2112_v51 }
 0x1ac   : > { %v2114_v63 = vmul.f32 0.5, %v5580_v34  ;;  %v1898_v21 = vmul.f32 0.5, %v1670_v16  ;;  %v1672_v22 = vadd.f32 %v1671_v19, %v6576_v48  ;;  %5593 = vtanh.f32 %v1897_v46  ;;  %4939 = vmatprep.mubr.msk.bf16.mxu1 %vm2452_vm4, %v2323_v40 }
 0x1ad   : > { %v5582_v8 = vpop.eup %5581  ;;  %v1675_v24 = vpop.f32.mrf.mxu0  ;;  %2614 = vmatmul.mubr.bf16.gmra.mxu1 %v2322_v20  ;;  %v2225_v27 = vadd.f32 0.5, %v2113_v7 }
 0x1ae   : > { %v2115_v25 = vmul.f32 0.5, %v5582_v8  ;;  %5595 = vtanh.f32 %v1898_v21  ;;  %v1899_v26 = vmul.f32 0.5, %v1672_v22  ;;  %v1676_v0 = vadd.f32 %v1675_v24, %v6571_v41 }
 0x1af   : > { %v1677_v9 = vpop.f32.mrf.mxu0  ;;  %v2226_v37 = vadd.f32 0.5, %v2114_v63  ;;  %v5584_v54 = vpop.eup %5583 }
 0x1b0   : > { %v2227_v30 = vadd.f32 0.5, %v2115_v25  ;;  %5597 = vtanh.f32 %v1899_v26  ;;  %v1678_v31 = vadd.f32 %v1677_v9, %v6576_v48  ;;  %v1900_v32 = vmul.f32 0.5, %v1676_v0 }
 0x1b1   : > { %v1679_v1 = vpop.f32.mrf.mxu0  ;;  %v5586_v35 = vpop.eup %5585  ;;  %v2324_v45 = vpack.c.bf16 %v2226_v37, %v2224_v36  ;;  %v2116_v39 = vmul.f32 0.5, %v5584_v54 }
 0x1b2   : > { %v1901_v38 = vmul.f32 0.5, %v1678_v31  ;;  %v1680_v23 = vadd.f32 %v1679_v1, %v6571_v41  ;;  %v2325_v2 = vpack.c.bf16 %v2227_v30, %v2225_v27  ;;  %5599 = vtanh.f32 %v1900_v32 }
 0x1b3   : > { %v5588_v42 = vpop.eup %5587  ;;  %v1681_v59 = vpop.f32.mrf.mxu0  ;;  %v2117_v3 = vmul.f32 0.5, %v5586_v35  ;;  %v2228_v62 = vadd.f32 0.5, %v2116_v39 }
 0x1b4   : > { %v2118_v43 = vmul.f32 0.5, %v5588_v42  ;;  %v1902_v44 = vmul.f32 0.5, %v1680_v23  ;;  %4940 = vmatprep.mubr.msk.bf16.mxu1 %vm2452_vm4, %v2325_v2  ;;  %5601 = vtanh.f32 %v1901_v38  ;;  %v1682_v47 = vadd.f32 %v1681_v59, %v6576_v48 }
 0x1b5   : > { %v1685_v49 = vpop.f32.mrf.mxu0  ;;  %2622 = vmatmul.mubr.bf16.gmra.mxu1 %v2324_v45  ;;  %v2229_v58 = vadd.f32 0.5, %v2117_v3 }
 0x1b6   : > { %v5590_v50 = vpop.eup %5589  ;;  %5603 = vtanh.f32 %v1902_v44  ;;  %v1686_v61 = vadd.f32 %v1685_v49, %v6571_v41  ;;  %v1903_v52 = vmul.f32 0.5, %v1682_v47  ;;  %v2230_v53 = vadd.f32 0.5, %v2118_v43 }
 0x1b7   : > { %v2119_v4 = vmul.f32 0.5, %v5590_v50  ;;  %v1687_v28 = vpop.f32.mrf.mxu0 }
 0x1b8   : > { %v1904_v56 = vmul.f32 0.5, %v1686_v61  ;;  %v1688_v55 = vadd.f32 %v1687_v28, %v6576_v48  ;;  %v5592_v57 = vpop.eup %5591  ;;  %5605 = vtanh.f32 %v1903_v52  ;;  %v2326_v16 = vpack.c.bf16 %v2230_v53, %v2228_v62 }
 0x1b9   : > { %v2231_v5 = vadd.f32 0.5, %v2119_v4  ;;  %v1689_v60 = vpop.f32.mrf.mxu0  ;;  %v5594_v10 = vpop.eup %5593  ;;  %v2120_v20 = vmul.f32 0.5, %v5592_v57 }
 0x1ba   : > { %v1905_v11 = vmul.f32 0.5, %v1688_v55  ;;  %v1690_v6 = vadd.f32 %v1689_v60, %v6571_v41  ;;  %5607 = vtanh.f32 %v1904_v56  ;;  %v2121_v7 = vmul.f32 0.5, %v5594_v10 }
 0x1bb   : > { %v5596_v12 = vpop.eup %5595  ;;  %v1691_v13 = vpop.f32.mrf.mxu0  ;;  %v2327_v14 = vpack.c.bf16 %v2231_v5, %v2229_v58  ;;  %v2232_v30 = vadd.f32 0.5, %v2120_v20 }
 0x1bc   : > { %v2122_v15 = vmul.f32 0.5, %v5596_v12  ;;  %v1692_v46 = vadd.f32 %v1691_v13, %v6576_v48  ;;  %5609 = vtanh.f32 %v1905_v11  ;;  %v1906_v19 = vmul.f32 0.5, %v1690_v6 }
 0x1bd   : > { %v5598_v34 = vpop.eup %5597  ;;  %4941 = vmatprep.mubr.msk.bf16.mxu1 %vm2452_vm4, %v2327_v14  ;;  %v1695_v40 = vpop.f32.mrf.mxu0  ;;  %v2233_v0 = vadd.f32 0.5, %v2121_v7 }
 0x1be   : > { %v2123_v63 = vmul.f32 0.5, %v5598_v34  ;;  %v1907_v21 = vmul.f32 0.5, %v1692_v46  ;;  %v1696_v22 = vadd.f32 %v1695_v40, %v6571_v41  ;;  %2630 = vmatmul.mubr.bf16.gmra.mxu1 %v2326_v16  ;;  %v2234_v8 = vadd.f32 0.5, %v2122_v15 }
 0x1bf   : > { %5611 = vtanh.f32 %v1906_v19  ;;  %v1697_v24 = vpop.f32.mrf.mxu0  ;;  %v5600_v27 = vpop.eup %5599 }
 0x1c0   : > { %v2235_v51 = vadd.f32 0.5, %v2123_v63  ;;  %5613 = vtanh.f32 %v1907_v21  ;;  %v1908_v25 = vmul.f32 0.5, %v1696_v22  ;;  %v1698_v26 = vadd.f32 %v1697_v24, %v6576_v48 }
 0x1c1   : > { %v1699_v9 = vpop.f32.mrf.mxu0  ;;  %v5602_v37 = vpop.eup %5601  ;;  %v2328_v23 = vpack.c.bf16 %v2234_v8, %v2232_v30  ;;  %v2124_v44 = vmul.f32 0.5, %v5600_v27 }
 0x1c2   : > { %v1909_v31 = vmul.f32 0.5, %v1698_v26  ;;  %v1700_v54 = vadd.f32 %v1699_v9, %v6571_v41  ;;  %v2329_v35 = vpack.c.bf16 %v2235_v51, %v2233_v0  ;;  %5615 = vtanh.f32 %v1908_v25 }
 0x1c3   : > { %v5604_v32 = vpop.eup %5603  ;;  %v1701_v1 = vpop.f32.mrf.mxu0  ;;  %v2125_v2 = vmul.f32 0.5, %v5602_v37  ;;  %v2236_v55 = vadd.f32 0.5, %v2124_v44 }
 0x1c4   : > { %v2126_v36 = vmul.f32 0.5, %v5604_v32  ;;  %v1910_v38 = vmul.f32 0.5, %v1700_v54  ;;  %5617 = vtanh.f32 %v1909_v31  ;;  %v1702_v42 = vadd.f32 %v1701_v1, %v6576_v48  ;;  %4942 = vmatprep.mubr.msk.bf16.mxu1 %vm2452_vm4, %v2329_v35 }
 0x1c5   : > { %v1705_v59 = vpop.f32.mrf.mxu0  ;;  %v5606_v43 = vpop.eup %5605  ;;  %v2237_v4 = vadd.f32 0.5, %v2125_v2 }
 0x1c6   : > { %5619 = vtanh.f32 %v1910_v38  ;;  %v1706_v45 = vadd.f32 %v1705_v59, %v6571_v41  ;;  %2638 = vmatmul.mubr.bf16.gmra.mxu1 %v2328_v23  ;;  %v2127_v3 = vmul.f32 0.5, %v5606_v43  ;;  %v1911_v47 = vmul.f32 0.5, %v1702_v42 }
 0x1c7   : > { %v1707_v49 = vpop.f32.mrf.mxu0  ;;  %v2238_v50 = vadd.f32 0.5, %v2126_v36  ;;  %v5608_v61 = vpop.eup %5607 }
 0x1c8   : > { %v1708_v39 = vadd.f32 %v1707_v49, %v6576_v48  ;;  %v2239_v52 = vadd.f32 0.5, %v2127_v3  ;;  %5621 = vtanh.f32 %v1911_v47  ;;  %v1912_v28 = vmul.f32 0.5, %v1706_v45 }
 0x1c9   : > { %v1709_v53 = vpop.f32.mrf.mxu0  ;;  %v5610_v56 = vpop.eup %5609  ;;  %v2128_v62 = vmul.f32 0.5, %v5608_v61  ;;  %v2330_v12 = vpack.c.bf16 %v2238_v50, %v2236_v55 }
 0x1ca   : > { %v1913_v57 = vmul.f32 0.5, %v1708_v39  ;;  %v1710_v58 = vadd.f32 %v1709_v53, %v6571_v41  ;;  %v2331_v60 = vpack.c.bf16 %v2239_v52, %v2237_v4  ;;  %v2129_v13 = vmul.f32 0.5, %v5610_v56 }
 0x1cb   : > { %v1711_v5 = vpop.f32.mrf.mxu0  ;;  %v2240_v22 = vadd.f32 0.5, %v2128_v62 }
 0x1cc   : > { %v5612_v10 = vpop.eup %5611  ;;  %5623 = vtanh.f32 %v1913_v57  ;;  %v1712_v11 = vadd.f32 %v1711_v5, %v6576_v48  ;;  %v1914_v15 = vmul.f32 0.5, %v1710_v58  ;;  %4943 = vmatprep.mubr.msk.bf16.mxu1 %vm2452_vm4, %v2331_v60  ;;  %v2241_v8 = vadd.f32 0.5, %v2129_v13 }
 0x1cd   : > { %v5614_v6 = vpop.eup %5613  ;;  %v2130_v14 = vmul.f32 0.5, %v5612_v10  ;;  %5625 = vtanh.f32 %v1912_v28  ;;  %v1715_v46 = vpop.f32.mrf.mxu0 }
 0x1ce   : > { %v2131_v16 = vmul.f32 0.5, %v5614_v6  ;;  %v1915_v34 = vmul.f32 0.5, %v1712_v11  ;;  %v1716_v7 = vadd.f32 %v1715_v46, %v6571_v41  ;;  %2646 = vmatmul.mubr.bf16.gmra.mxu1 %v2330_v12  ;;  %5627 = vtanh.f32 %v1914_v15 }
 0x1cf   : > { %v2242_v19 = vadd.f32 0.5, %v2130_v14  ;;  %v1717_v40 = vpop.f32.mrf.mxu0  ;;  %v5616_v21 = vpop.eup %5615 }
 0x1d0   : > { %v2243_v20 = vadd.f32 0.5, %v2131_v16  ;;  %5629 = vtanh.f32 %v1915_v34  ;;  %v1916_v63 = vmul.f32 0.5, %v1716_v7  ;;  %v1718_v24 = vadd.f32 %v1717_v40, %v6576_v48 }
 0x1d1   : > { %v1719_v51 = vpop.f32.mrf.mxu0  ;;  %v5618_v25 = vpop.eup %5617  ;;  %v2332_v30 = vpack.c.bf16 %v2242_v19, %v2240_v22  ;;  %v2132_v38 = vmul.f32 0.5, %v5616_v21 }
 0x1d2   : > { %v1720_v26 = vadd.f32 %v1719_v51, %v6571_v41  ;;  %v1917_v0 = vmul.f32 0.5, %v1718_v24  ;;  %v2333_v37 = vpack.c.bf16 %v2243_v20, %v2241_v8  ;;  %5631 = vtanh.f32 %v1916_v63 }
 0x1d3   : > { %v5620_v27 = vpop.eup %5619  ;;  %v1721_v9 = vpop.f32.mrf.mxu0  ;;  %v2133_v1 = vmul.f32 0.5, %v5618_v25  ;;  %v2244_v61 = vadd.f32 0.5, %v2132_v38 }
 0x1d4   : > { %v2134_v31 = vmul.f32 0.5, %v5620_v27  ;;  %v1918_v54 = vmul.f32 0.5, %v1720_v26  ;;  %v1722_v32 = vadd.f32 %v1721_v9, %v6576_v48  ;;  %5633 = vtanh.f32 %v1917_v0  ;;  %4944 = vmatprep.mubr.msk.bf16.mxu1 %vm2452_vm4, %v2333_v37 }
 0x1d5   : > { %v1725_v35 = vpop.f32.mrf.mxu0  ;;  %v5622_v36 = vpop.eup %5621  ;;  %v2245_v3 = vadd.f32 0.5, %v2133_v1 }
 0x1d6   : > { %5635 = vtanh.f32 %v1918_v54  ;;  %v1919_v23 = vmul.f32 0.5, %v1722_v32  ;;  %v1726_v2 = vadd.f32 %v1725_v35, %v6571_v41  ;;  %2654 = vmatmul.mubr.bf16.gmra.mxu1 %v2332_v30  ;;  %v2135_v42 = vmul.f32 0.5, %v5622_v36  ;;  %v5398_v54 = vld [vmem:[%s7360_s4 + $0x70] ss:$8 sps:$4 sm:$0xff]   ;;  %v5400_v32 = vld [vmem:[%s7360_s4 + $0x74] ss:$8 sps:$4 sm:$0xff]  }
 0x1d7   : > { %v1727_v59 = vpop.f32.mrf.mxu0  ;;  %v2246_v43 = vadd.f32 0.5, %v2134_v31  ;;  %v5401_v36 = vld [vmem:[%s7360_s4 + $0x170] ss:$8 sps:$4 sm:$0xff]   ;;  %3414 = vmatprep.subr.bf16.mxu0 %v5400_v32 }
 0x1d8   : > { %5637 = vtanh.f32 %v1919_v23  ;;  %v1728_v44 = vadd.f32 %v1727_v59, %v6576_v48  ;;  %v2247_v47 = vadd.f32 0.5, %v2135_v42  ;;  %v1920_v49 = vmul.f32 0.5, %v1726_v2  ;;  %v5403_v42 = vld [vmem:[%s7360_s4 + $0x174] ss:$8 sps:$4 sm:$0xff]   ;;  %3415 = vmatpush1.bf16.msra.mxu0 %v5398_v54 }
 0x1d9   : > { %v5624_v45 = vpop.eup %5623  ;;  %v1729_v50 = vpop.f32.mrf.mxu0  ;;  %v2334_v58 = vpack.c.bf16 %v2246_v43, %v2244_v61  ;;  %3547 = vmatprep.subr.bf16.mxu1 %v5403_v42 }
 0x1da   : > { %v5626_v39 = vpop.eup %5625  ;;  %v1921_v4 = vmul.f32 0.5, %v1728_v44  ;;  %v1730_v52 = vadd.f32 %v1729_v50, %v6571_v41  ;;  %v2335_v53 = vpack.c.bf16 %v2247_v47, %v2245_v3  ;;  %v2137_v55 = vmul.f32 0.5, %v5624_v45  ;;  %3548 = vmatpush1.bf16.msra.mxu1 %v5401_v36 }
 0x1db   : > { %v1731_v28 = vpop.f32.mrf.mxu0  ;;  %v5628_v56 = vpop.eup %5627  ;;  %v2136_v60 = vmul.f32 0.5, %v5626_v39 }
 0x1dc   : > { %5639 = vtanh.f32 %v1921_v4  ;;  %v1732_v57 = vadd.f32 %v1731_v28, %v6576_v48  ;;  %v2138_v10 = vmul.f32 0.5, %v5628_v56  ;;  %v1922_v62 = vmul.f32 0.5, %v1730_v52  ;;  %4945 = vmatprep.mubr.msk.bf16.mxu1 %vm2452_vm4, %v2335_v53 }
 0x1dd   : > { %v5630_v5 = vpop.eup %5629  ;;  %5641 = vtanh.f32 %v1920_v49  ;;  %v1735_v11 = vpop.f32.mrf.mxu0  ;;  %v2249_v46 = vadd.f32 0.5, %v2137_v55  ;;  %v2248_v19 = vadd.f32 0.5, %v2136_v60 }
 0x1de   : > { %v2139_v12 = vmul.f32 0.5, %v5630_v5  ;;  %v1923_v6 = vmul.f32 0.5, %v1732_v57  ;;  %v1736_v13 = vadd.f32 %v1735_v11, %v6571_v41  ;;  %2662 = vmatmul.mubr.bf16.gmra.mxu1 %v2334_v58  ;;  %v2250_v14 = vadd.f32 0.5, %v2138_v10 }
 0x1df   : > { %5643 = vtanh.f32 %v1922_v62  ;;  %v1737_v15 = vpop.f32.mrf.mxu0  ;;  %v5632_v7 = vpop.eup %5631 }
 0x1e0   : > { %v2251_v16 = vadd.f32 0.5, %v2139_v12  ;;  %5645 = vtanh.f32 %v1923_v6  ;;  %v1924_v34 = vmul.f32 0.5, %v1736_v13  ;;  %v1738_v40 = vadd.f32 %v1737_v15, %v6576_v48 }
 0x1e1   : > { %v1739_v20 = vpop.f32.mrf.mxu0  ;;  %v5634_v63 = vpop.eup %5633  ;;  %v2336_v25 = vpack.c.bf16 %v2250_v14, %v2248_v19  ;;  %v2140_v37 = vmul.f32 0.5, %v5632_v7 }
 0x1e2   : > { %v1740_v21 = vadd.f32 %v1739_v20, %v6571_v41  ;;  %v2337_v22 = vpack.c.bf16 %v2251_v16, %v2249_v46  ;;  %v1925_v24 = vmul.f32 0.5, %v1738_v40  ;;  %5647 = vtanh.f32 %v1924_v34  ;;  %v5404_v16 = vld [vmem:[%s7360_s4 + $0x60] ss:$8 sps:$4 sm:$0xff]   ;;  %v5406_v20 = vld [vmem:[%s7360_s4 + $0x64] ss:$8 sps:$4 sm:$0xff]  }
 0x1e3   : > { %v5636_v8 = vpop.eup %5635  ;;  %v1741_v51 = vpop.f32.mrf.mxu0  ;;  %v2141_v30 = vmul.f32 0.5, %v5634_v63  ;;  %v2252_v45 = vadd.f32 0.5, %v2140_v37  ;;  %3416 = vmatprep.subr.bf16.mxu0 %v5406_v20 }
 0x1e4   : > { %v2142_v26 = vmul.f32 0.5, %v5636_v8  ;;  %v1926_v27 = vmul.f32 0.5, %v1740_v21  ;;  %v1742_v0 = vadd.f32 %v1741_v51, %v6576_v48  ;;  %4946 = vmatprep.mubr.msk.bf16.mxu1 %vm2452_vm4, %v2337_v22  ;;  %5649 = vtanh.f32 %v1925_v24  ;;  %3417 = vmatpush1.bf16.msra.mxu0 %v5404_v16 }
 0x1e5   : > { %v5638_v9 = vpop.eup %5637  ;;  %v1745_v31 = vpop.f32.mrf.mxu0  ;;  %v2253_v3 = vadd.f32 0.5, %v2141_v30 }
 0x1e6   : > { %v2143_v1 = vmul.f32 0.5, %v5638_v9  ;;  %5651 = vtanh.f32 %v1926_v27  ;;  %v1927_v35 = vmul.f32 0.5, %v1742_v0  ;;  %2670 = vmatmul.mubr.bf16.gmra.mxu1 %v2336_v25  ;;  %v2254_v38 = vadd.f32 0.5, %v2142_v26 }
 0x1e7   : > { %v1746_v23 = vadd.f32 %v1745_v31, %v6571_v41  ;;  %v1747_v2 = vpop.f32.mrf.mxu0 }
 0x1e8   : > { %v2255_v59 = vadd.f32 0.5, %v2143_v1  ;;  %5653 = vtanh.f32 %v1927_v35  ;;  %v1748_v43 = vadd.f32 %v1747_v2, %v6576_v48  ;;  %v2338_v28 = vpack.c.bf16 %v2254_v38, %v2252_v45 }
 0x1e9   : > { %v5640_v44 = vpop.eup %5639  ;;  %v1928_v47 = vmul.f32 0.5, %v1746_v23  ;;  %v1749_v49 = vpop.f32.mrf.mxu0 }
 0x1ea   : > { %v5642_v50 = vpop.eup %5641  ;;  %v1929_v39 = vmul.f32 0.5, %v1748_v43  ;;  %v1750_v61 = vadd.f32 %v1749_v49, %v6571_v41  ;;  %v2339_v52 = vpack.c.bf16 %v2255_v59, %v2253_v3  ;;  %v2145_v56 = vmul.f32 0.5, %v5640_v44 }
 0x1eb   : > { %v1751_v4 = vpop.f32.mrf.mxu0  ;;  %5655 = vtanh.f32 %v1928_v47  ;;  %v2144_v5 = vmul.f32 0.5, %v5642_v50  ;;  %v5407_v50 = vld [vmem:[%s7360_s4 + $0x160] ss:$8 sps:$4 sm:$0xff]  }
 0x1ec   : > { %v5644_v53 = vpop.eup %5643  ;;  %v1930_v55 = vmul.f32 0.5, %v1750_v61  ;;  %v1752_v57 = vadd.f32 %v1751_v4, %v6576_v48  ;;  %5657 = vtanh.f32 %v1929_v39  ;;  %4947 = vmatprep.mubr.msk.bf16.mxu1 %vm2452_vm4, %v2339_v52  ;;  %v2257_v14 = vadd.f32 0.5, %v2145_v56  ;;  %v5409_v39 = vld [vmem:[%s7360_s4 + $0x164] ss:$8 sps:$4 sm:$0xff]  }
 0x1ed   : > { %v5646_v58 = vpop.eup %5645  ;;  %v2146_v60 = vmul.f32 0.5, %v5644_v53  ;;  %v1755_v10 = vpop.f32.mrf.mxu0  ;;  %v2256_v7 = vadd.f32 0.5, %v2144_v5  ;;  %3549 = vmatprep.subr.bf16.mxu1 %v5409_v39 }
 0x1ee   : > { %v2147_v62 = vmul.f32 0.5, %v5646_v58  ;;  %5659 = vtanh.f32 %v1930_v55  ;;  %v1931_v11 = vmul.f32 0.5, %v1752_v57  ;;  %v1756_v12 = vadd.f32 %v1755_v10, %v6571_v41  ;;  %2678 = vmatmul.mubr.bf16.gmra.mxu1 %v2338_v28 }
 0x1ef   : > { %v2258_v6 = vadd.f32 0.5, %v2146_v60  ;;  %v1757_v13 = vpop.f32.mrf.mxu0  ;;  %v5648_v34 = vpop.eup %5647  ;;  %3550 = vmatpush1.bf16.msra.mxu1 %v5407_v50 }
 0x1f0   : > { %v2259_v15 = vadd.f32 0.5, %v2147_v62  ;;  %5661 = vtanh.f32 %v1931_v11  ;;  %v1932_v46 = vmul.f32 0.5, %v1756_v12  ;;  %v1758_v19 = vadd.f32 %v1757_v13, %v6576_v48  ;;  %v5412_v13 = vld [vmem:[%s7360_s4 + $0x54] ss:$8 sps:$4 sm:$0xff]  }
 0x1f1   : > { %v1759_v40 = vpop.f32.mrf.mxu0  ;;  %v5650_v63 = vpop.eup %5649  ;;  %v2340_v26 = vpack.c.bf16 %v2258_v6, %v2256_v7  ;;  %v2148_v31 = vmul.f32 0.5, %v5648_v34  ;;  %v5410_v6 = vld [vmem:[%s7360_s4 + $0x50] ss:$8 sps:$4 sm:$0xff]   ;;  %3418 = vmatprep.subr.bf16.mxu0 %v5412_v13 }
 0x1f2   : > { %v1760_v21 = vadd.f32 %v1759_v40, %v6571_v41  ;;  %v2341_v22 = vpack.c.bf16 %v2259_v15, %v2257_v14  ;;  %v2149_v24 = vmul.f32 0.5, %v5650_v63  ;;  %v1933_v51 = vmul.f32 0.5, %v1758_v19  ;;  %3419 = vmatpush1.bf16.msra.mxu0 %v5410_v6 }
 0x1f3   : > { %v5652_v8 = vpop.eup %5651  ;;  %v1761_v25 = vpop.f32.mrf.mxu0  ;;  %5663 = vtanh.f32 %v1932_v46  ;;  %v2260_v45 = vadd.f32 0.5, %v2148_v31 }
 0x1f4   : > { %v2150_v27 = vmul.f32 0.5, %v5652_v8  ;;  %v1934_v0 = vmul.f32 0.5, %v1760_v21  ;;  %v1762_v9 = vadd.f32 %v1761_v25, %v6576_v48  ;;  %4948 = vmatprep.mubr.msk.bf16.mxu1 %vm2452_vm4, %v2341_v22  ;;  %5665 = vtanh.f32 %v1933_v51 }
 0x1f5   : > { %v5654_v37 = vpop.eup %5653  ;;  %v1765_v30 = vpop.f32.mrf.mxu0  ;;  %v2261_v1 = vadd.f32 0.5, %v2149_v24 }
 0x1f6   : > { %v2151_v54 = vmul.f32 0.5, %v5654_v37  ;;  %5667 = vtanh.f32 %v1934_v0  ;;  %v1935_v32 = vmul.f32 0.5, %v1762_v9  ;;  %2686 = vmatmul.mubr.bf16.gmra.mxu1 %v2340_v26  ;;  %v1766_v35 = vadd.f32 %v1765_v30, %v6571_v41 }
 0x1f7   : > { %v1767_v36 = vpop.f32.mrf.mxu0  ;;  %v2262_v38 = vadd.f32 0.5, %v2150_v27 }
 0x1f8   : > { %v2263_v23 = vadd.f32 0.5, %v2151_v54  ;;  %5669 = vtanh.f32 %v1935_v32  ;;  %v1768_v2 = vadd.f32 %v1767_v36, %v6576_v48  ;;  %v5656_v42 = vpop.eup %5655  ;;  %v1936_v59 = vmul.f32 0.5, %v1766_v35 }
 0x1f9   : > { %v1769_v43 = vpop.f32.mrf.mxu0  ;;  %v5658_v44 = vpop.eup %5657  ;;  %v2342_v53 = vpack.c.bf16 %v2262_v38, %v2260_v45  ;;  %v2152_v55 = vmul.f32 0.5, %v5656_v42 }
 0x1fa   : > { %v1937_v3 = vmul.f32 0.5, %v1768_v2  ;;  %v1770_v47 = vadd.f32 %v1769_v43, %v6571_v41  ;;  %v2343_v49 = vpack.c.bf16 %v2263_v23, %v2261_v1  ;;  %5671 = vtanh.f32 %v1936_v59 }
 0x1fb   : > { %v5660_v61 = vpop.eup %5659  ;;  %v1771_v4 = vpop.f32.mrf.mxu0  ;;  %v2153_v57 = vmul.f32 0.5, %v5658_v44  ;;  %v2264_v34 = vadd.f32 0.5, %v2152_v55 }
 0x1fc   : > { %v2154_v52 = vmul.f32 0.5, %v5660_v61  ;;  %v1938_v28 = vmul.f32 0.5, %v1770_v47  ;;  %4949 = vmatprep.mubr.msk.bf16.mxu1 %vm2452_vm4, %v2343_v49  ;;  %5673 = vtanh.f32 %v1937_v3  ;;  %v1772_v58 = vadd.f32 %v1771_v4, %v6576_v48  ;;  %v5413_v4 = vld [vmem:[%s7360_s4 + $0x40] ss:$8 sps:$4 sm:$0xff]  }
 0x1fd   : > { %v5662_v56 = vpop.eup %5661  ;;  %v1775_v5 = vpop.f32.mrf.mxu0  ;;  %v2265_v7 = vadd.f32 0.5, %v2153_v57 }
 0x1fe   : > { %v2155_v60 = vmul.f32 0.5, %v5662_v56  ;;  %5675 = vtanh.f32 %v1938_v28  ;;  %v1776_v10 = vadd.f32 %v1775_v5, %v6571_v41  ;;  %2694 = vmatmul.mubr.bf16.gmra.mxu1 %v2342_v53  ;;  %v2266_v62 = vadd.f32 0.5, %v2154_v52  ;;  %v5415_v56 = vld [vmem:[%s7360_s4 + $0x44] ss:$8 sps:$4 sm:$0xff]  }
 0x1ff   : > { %v1939_v11 = vmul.f32 0.5, %v1772_v58  ;;  %v1777_v12 = vpop.f32.mrf.mxu0  ;;  %3420 = vmatprep.subr.bf16.mxu0 %v5415_v56 }
 0x200   : > { %v2267_v14 = vadd.f32 0.5, %v2155_v60  ;;  %v1940_v15 = vmul.f32 0.5, %v1776_v10  ;;  %v1778_v46 = vadd.f32 %v1777_v12, %v6576_v48  ;;  %v5664_v16 = vpop.eup %5663  ;;  %v2344_v51 = vpack.c.bf16 %v2266_v62, %v2264_v34  ;;  %v5416_v62 = vld [vmem:[%s7360_s4 + $0x150] ss:$8 sps:$4 sm:$0xff]   ;;  %3421 = vmatpush1.bf16.msra.mxu0 %v5413_v4 }
 0x201   : > { %5677 = vtanh.f32 %v1939_v11  ;;  %v1779_v19 = vpop.f32.mrf.mxu0  ;;  %v5666_v40 = vpop.eup %5665  ;;  %v2156_v37 = vmul.f32 0.5, %v5664_v16  ;;  %v5418_v11 = vld [vmem:[%s7360_s4 + $0x154] ss:$8 sps:$4 sm:$0xff]  }
 0x202   : > { %v1941_v20 = vmul.f32 0.5, %v1778_v46  ;;  %v1780_v63 = vadd.f32 %v1779_v19, %v6571_v41  ;;  %v2157_v22 = vmul.f32 0.5, %v5666_v40  ;;  %v2345_v24 = vpack.c.bf16 %v2267_v14, %v2265_v7  ;;  %3551 = vmatprep.subr.bf16.mxu1 %v5418_v11 }
 0x203   : > { %v5668_v21 = vpop.eup %5667  ;;  %v1781_v8 = vpop.f32.mrf.mxu0  ;;  %5679 = vtanh.f32 %v1940_v15  ;;  %v2268_v43 = vadd.f32 0.5, %v2156_v37  ;;  %3552 = vmatpush1.bf16.msra.mxu1 %v5416_v62 }
 0x204   : > { %v2158_v25 = vmul.f32 0.5, %v5668_v21  ;;  %v1942_v26 = vmul.f32 0.5, %v1780_v63  ;;  %v1782_v27 = vadd.f32 %v1781_v8, %v6576_v48  ;;  %5681 = vtanh.f32 %v1941_v20  ;;  %4950 = vmatprep.mubr.msk.bf16.mxu1 %vm2452_vm4, %v2345_v24 }
 0x205   : > { %v5670_v0 = vpop.eup %5669  ;;  %v1785_v9 = vpop.f32.mrf.mxu0  ;;  %v2269_v54 = vadd.f32 0.5, %v2157_v22 }
 0x206   : > { %v2159_v30 = vmul.f32 0.5, %v5670_v0  ;;  %5683 = vtanh.f32 %v1942_v26  ;;  %v1943_v31 = vmul.f32 0.5, %v1782_v27  ;;  %2702 = vmatmul.mubr.bf16.gmra.mxu1 %v2344_v51  ;;  %v1786_v32 = vadd.f32 %v1785_v9, %v6571_v41 }
 0x207   : > { %v1787_v1 = vpop.f32.mrf.mxu0  ;;  %v2270_v35 = vadd.f32 0.5, %v2158_v25  ;;  %v5672_v23 = vpop.eup %5671 }
 0x208   : > { %v2271_v36 = vadd.f32 0.5, %v2159_v30  ;;  %5685 = vtanh.f32 %v1943_v31  ;;  %v1788_v38 = vadd.f32 %v1787_v1, %v6576_v48  ;;  %v1944_v2 = vmul.f32 0.5, %v1786_v32 }
 0x209   : > { %v1789_v42 = vpop.f32.mrf.mxu0  ;;  %v5674_v59 = vpop.eup %5673  ;;  %v2346_v61 = vpack.c.bf16 %v2270_v35, %v2268_v43  ;;  %v2160_v57 = vmul.f32 0.5, %v5672_v23 }
 0x20a   : > { %v1945_v44 = vmul.f32 0.5, %v1788_v38  ;;  %v1790_v45 = vadd.f32 %v1789_v42, %v6571_v41  ;;  %v2347_v3 = vpack.c.bf16 %v2271_v36, %v2269_v54  ;;  %5687 = vtanh.f32 %v1944_v2 }
 0x20b   : > { %v5676_v47 = vpop.eup %5675  ;;  %v1791_v49 = vpop.f32.mrf.mxu0  ;;  %v2161_v52 = vmul.f32 0.5, %v5674_v59  ;;  %v2272_v7 = vadd.f32 0.5, %v2160_v57 }
 0x20c   : > { %v2162_v50 = vmul.f32 0.5, %v5676_v47  ;;  %v1946_v39 = vmul.f32 0.5, %v1790_v45  ;;  %4951 = vmatprep.mubr.msk.bf16.mxu1 %vm2452_vm4, %v2347_v3  ;;  %5689 = vtanh.f32 %v1945_v44  ;;  %v1792_v28 = vadd.f32 %v1791_v49, %v6576_v48  ;;  %v5419_v44 = vld [vmem:[%s7360_s4 + $0x30] ss:$8 sps:$4 sm:$0xff]   ;;  %v5421_v45 = vld [vmem:[%s7360_s4 + $0x34] ss:$8 sps:$4 sm:$0xff]  }
 0x20d   : > { %v1795_v53 = vpop.f32.mrf.mxu0  ;;  %v2273_v15 = vadd.f32 0.5, %v2161_v52  ;;  %3422 = vmatprep.subr.bf16.mxu0 %v5421_v45 }
 0x20e   : > { %v5678_v55 = vpop.eup %5677  ;;  %5691 = vtanh.f32 %v1946_v39  ;;  %v1796_v58 = vadd.f32 %v1795_v53, %v6571_v41  ;;  %2710 = vmatmul.mubr.bf16.gmra.mxu1 %v2346_v61  ;;  %v1947_v60 = vmul.f32 0.5, %v1792_v28  ;;  %v2274_v12 = vadd.f32 0.5, %v2162_v50  ;;  %3423 = vmatpush1.bf16.msra.mxu0 %v5419_v44 }
 0x20f   : > { %v2163_v5 = vmul.f32 0.5, %v5678_v55  ;;  %v1797_v10 = vpop.f32.mrf.mxu0 }
 0x210   : > { %v1948_v6 = vmul.f32 0.5, %v1796_v58  ;;  %v1798_v13 = vadd.f32 %v1797_v10, %v6576_v48  ;;  %v5680_v14 = vpop.eup %5679  ;;  %5693 = vtanh.f32 %v1947_v60  ;;  %v2348_v24 = vpack.c.bf16 %v2274_v12, %v2272_v7 }
 0x211   : > { %v2275_v46 = vadd.f32 0.5, %v2163_v5  ;;  %v1799_v16 = vpop.f32.mrf.mxu0  ;;  %v5682_v34 = vpop.eup %5681  ;;  %v2164_v0 = vmul.f32 0.5, %v5680_v14 }
 0x212   : > { %v1949_v19 = vmul.f32 0.5, %v1798_v13  ;;  %5695 = vtanh.f32 %v1948_v6  ;;  %v1800_v20 = vadd.f32 %v1799_v16, %v6571_v41  ;;  %v2165_v25 = vmul.f32 0.5, %v5682_v34 }
 0x213   : > { %v5684_v40 = vpop.eup %5683  ;;  %v1801_v63 = vpop.f32.mrf.mxu0  ;;  %v2349_v21 = vpack.c.bf16 %v2275_v46, %v2273_v15  ;;  %v2276_v42 = vadd.f32 0.5, %v2164_v0 }
 0x214   : > { %v2166_v22 = vmul.f32 0.5, %v5684_v40  ;;  %5697 = vtanh.f32 %v1949_v19  ;;  %v1802_v8 = vadd.f32 %v1801_v63, %v6576_v48  ;;  %v1950_v26 = vmul.f32 0.5, %v1800_v20 }
 0x215   : > { %v5686_v51 = vpop.eup %5685  ;;  %4952 = vmatprep.mubr.msk.bf16.mxu1 %vm2452_vm4, %v2349_v21  ;;  %v1805_v27 = vpop.f32.mrf.mxu0  ;;  %v2277_v38 = vadd.f32 0.5, %v2165_v25  ;;  %v5422_v25 = vld [vmem:[%s7360_s4 + $0x140] ss:$8 sps:$4 sm:$0xff]  }
 0x216   : > { %v2167_v9 = vmul.f32 0.5, %v5686_v51  ;;  %v1951_v37 = vmul.f32 0.5, %v1802_v8  ;;  %v1806_v30 = vadd.f32 %v1805_v27, %v6571_v41  ;;  %2718 = vmatmul.mubr.bf16.gmra.mxu1 %v2348_v24  ;;  %v2278_v31 = vadd.f32 0.5, %v2166_v22 }
 0x217   : > { %5699 = vtanh.f32 %v1950_v26  ;;  %v1807_v54 = vpop.f32.mrf.mxu0  ;;  %v5688_v36 = vpop.eup %5687  ;;  %v5424_v26 = vld [vmem:[%s7360_s4 + $0x144] ss:$8 sps:$4 sm:$0xff]  }
 0x218   : > { %v2279_v32 = vadd.f32 0.5, %v2167_v9  ;;  %5701 = vtanh.f32 %v1951_v37  ;;  %v1952_v1 = vmul.f32 0.5, %v1806_v30  ;;  %v1808_v35 = vadd.f32 %v1807_v54, %v6576_v48  ;;  %3553 = vmatprep.subr.bf16.mxu1 %v5424_v26  ;;  %v5428_v26 = vld [vmem:[%s7360_s4 + $0x10] ss:$8 sps:$4 sm:$0xff]  }
 0x219   : > { %v1809_v23 = vpop.f32.mrf.mxu0  ;;  %v5690_v2 = vpop.eup %5689  ;;  %v2350_v61 = vpack.c.bf16 %v2278_v31, %v2276_v42  ;;  %v2168_v56 = vmul.f32 0.5, %v5688_v36  ;;  %3554 = vmatpush1.bf16.msra.mxu1 %v5422_v25 }
 0x21a   : > { %v1953_v59 = vmul.f32 0.5, %v1808_v35  ;;  %v1810_v43 = vadd.f32 %v1809_v23, %v6571_v41  ;;  %v2351_v49 = vpack.c.bf16 %v2279_v32, %v2277_v38  ;;  %5703 = vtanh.f32 %v1952_v1  ;;  %v5425_v32 = vld [vmem:[%s7360_s4 + $0x20] ss:$8 sps:$4 sm:$0xff]  }
 0x21b   : > { %v5692_v3 = vpop.eup %5691  ;;  %v1811_v47 = vpop.f32.mrf.mxu0  ;;  %v2169_v4 = vmul.f32 0.5, %v5690_v2  ;;  %v2280_v15 = vadd.f32 0.5, %v2168_v56  ;;  %v5427_v2 = vld [vmem:[%s7360_s4 + $0x24] ss:$8 sps:$4 sm:$0xff]  }
 0x21c   : > { %v2170_v50 = vmul.f32 0.5, %v5692_v3  ;;  %v1954_v39 = vmul.f32 0.5, %v1810_v43  ;;  %5705 = vtanh.f32 %v1953_v59  ;;  %v1812_v52 = vadd.f32 %v1811_v47, %v6576_v48  ;;  %4953 = vmatprep.mubr.msk.bf16.mxu1 %vm2452_vm4, %v2351_v49  ;;  %3424 = vmatprep.subr.bf16.mxu0 %v5427_v2 }
 0x21d   : > { %v1815_v28 = vpop.f32.mrf.mxu0  ;;  %v5694_v53 = vpop.eup %5693  ;;  %v2281_v12 = vadd.f32 0.5, %v2169_v4  ;;  %3425 = vmatpush1.bf16.msra.mxu0 %v5425_v32 }
 0x21e   : > { %5707 = vtanh.f32 %v1954_v39  ;;  %v1816_v55 = vadd.f32 %v1815_v28, %v6571_v41  ;;  %2726 = vmatmul.mubr.bf16.gmra.mxu1 %v2350_v61  ;;  %v2171_v57 = vmul.f32 0.5, %v5694_v53  ;;  %v1955_v58 = vmul.f32 0.5, %v1812_v52 }
 0x21f   : > { %v1817_v5 = vpop.f32.mrf.mxu0  ;;  %v5696_v60 = vpop.eup %5695  ;;  %v2282_v10 = vadd.f32 0.5, %v2170_v50 }
 0x220   : > { %v1818_v62 = vadd.f32 %v1817_v5, %v6576_v48  ;;  %v2283_v6 = vadd.f32 0.5, %v2171_v57  ;;  %5709 = vtanh.f32 %v1955_v58  ;;  %v1956_v13 = vmul.f32 0.5, %v1816_v55 }
 0x221   : > { %v5698_v11 = vpop.eup %5697  ;;  %v1819_v14 = vpop.f32.mrf.mxu0  ;;  %v2172_v16 = vmul.f32 0.5, %v5696_v60  ;;  %v2352_v21 = vpack.c.bf16 %v2282_v10, %v2280_v15 }
 0x222   : > { %v1957_v46 = vmul.f32 0.5, %v1818_v62  ;;  %v1820_v34 = vadd.f32 %v1819_v14, %v6571_v41  ;;  %v2353_v19 = vpack.c.bf16 %v2283_v6, %v2281_v12  ;;  %v2173_v20 = vmul.f32 0.5, %v5698_v11 }
 0x223   : > { %v1821_v7 = vpop.f32.mrf.mxu0  ;;  %v2284_v35 = vadd.f32 0.5, %v2172_v16 }
 0x224   : > { %v5700_v40 = vpop.eup %5699  ;;  %5711 = vtanh.f32 %v1957_v46  ;;  %v1822_v63 = vadd.f32 %v1821_v7, %v6576_v48  ;;  %v1958_v24 = vmul.f32 0.5, %v1820_v34  ;;  %4954 = vmatprep.mubr.msk.bf16.mxu1 %vm2452_vm4, %v2353_v19  ;;  %v2285_v36 = vadd.f32 0.5, %v2173_v20 }
 0x225   : > { %v5702_v22 = vpop.eup %5701  ;;  %v2174_v8 = vmul.f32 0.5, %v5700_v40  ;;  %5713 = vtanh.f32 %v1956_v13  ;;  %v1825_v51 = vpop.f32.mrf.mxu0 }
 0x226   : > { %v2175_v27 = vmul.f32 0.5, %v5702_v22  ;;  %v1959_v0 = vmul.f32 0.5, %v1822_v63  ;;  %v1826_v9 = vadd.f32 %v1825_v51, %v6571_v41  ;;  %2734 = vmatmul.mubr.bf16.gmra.mxu1 %v2352_v21  ;;  %5715 = vtanh.f32 %v1958_v24 }
 0x227   : > { %v2286_v37 = vadd.f32 0.5, %v2174_v8  ;;  %v1827_v30 = vpop.f32.mrf.mxu0  ;;  %v5704_v1 = vpop.eup %5703 }
 0x228   : > { %v2287_v31 = vadd.f32 0.5, %v2175_v27  ;;  %5717 = vtanh.f32 %v1959_v0  ;;  %v1960_v54 = vmul.f32 0.5, %v1826_v9  ;;  %v1828_v38 = vadd.f32 %v1827_v30, %v6576_v48  ;;  %v5430_v27 = vld [vmem:[%s7360_s4 + $0x14] ss:$8 sps:$4 sm:$0xff]  }
 0x229   : > { %v1829_v23 = vpop.f32.mrf.mxu0  ;;  %v5706_v42 = vpop.eup %5705  ;;  %v2354_v47 = vpack.c.bf16 %v2286_v37, %v2284_v35  ;;  %v2176_v28 = vmul.f32 0.5, %v5704_v1  ;;  %v5431_v37 = vld [vmem:[%s7360_s4 + $0x130] ss:$8 sps:$4 sm:$0xff]   ;;  %v5433_v30 = vld [vmem:[%s7360_s4 + $0x134] ss:$8 sps:$4 sm:$0xff]   ;;  %3426 = vmatprep.subr.bf16.mxu0 %v5430_v27 }
 0x22a   : > { %v1830_v59 = vadd.f32 %v1829_v23, %v6571_v41  ;;  %v1961_v44 = vmul.f32 0.5, %v1828_v38  ;;  %v2355_v3 = vpack.c.bf16 %v2287_v31, %v2285_v36  ;;  %5719 = vtanh.f32 %v1960_v54  ;;  %3555 = vmatprep.subr.bf16.mxu1 %v5433_v30  ;;  %3427 = vmatpush1.bf16.msra.mxu0 %v5428_v26 }
 0x22b   : > { %v5708_v43 = vpop.eup %5707  ;;  %v1831_v45 = vpop.f32.mrf.mxu0  ;;  %v2177_v61 = vmul.f32 0.5, %v5706_v42  ;;  %v2288_v6 = vadd.f32 0.5, %v2176_v28  ;;  %3556 = vmatpush1.bf16.msra.mxu1 %v5431_v37 }
 0x22c   : > { %v2178_v49 = vmul.f32 0.5, %v5708_v43  ;;  %v1962_v50 = vmul.f32 0.5, %v1830_v59  ;;  %v1832_v39 = vadd.f32 %v1831_v45, %v6576_v48  ;;  %5721 = vtanh.f32 %v1961_v44  ;;  %4955 = vmatprep.mubr.msk.bf16.mxu1 %vm2452_vm4, %v2355_v3 }
 0x22d   : > { %v1835_v4 = vpop.f32.mrf.mxu0  ;;  %v5710_v52 = vpop.eup %5709  ;;  %v2289_v10 = vadd.f32 0.5, %v2177_v61 }
 0x22e   : > { %5723 = vtanh.f32 %v1962_v50  ;;  %v1963_v53 = vmul.f32 0.5, %v1832_v39  ;;  %v1836_v56 = vadd.f32 %v1835_v4, %v6571_v41  ;;  %2742 = vmatmul.mubr.bf16.gmra.mxu1 %v2354_v47  ;;  %v2179_v55 = vmul.f32 0.5, %v5710_v52 }
 0x22f   : > { %v1837_v57 = vpop.f32.mrf.mxu0  ;;  %v2290_v58 = vadd.f32 0.5, %v2178_v49 }
 0x230   : > { %5725 = vtanh.f32 %v1963_v53  ;;  %v1838_v5 = vadd.f32 %v1837_v57, %v6576_v48  ;;  %v2291_v62 = vadd.f32 0.5, %v2179_v55  ;;  %v1964_v13 = vmul.f32 0.5, %v1836_v56 }
 0x231   : > { %v5712_v60 = vpop.eup %5711  ;;  %v1839_v11 = vpop.f32.mrf.mxu0  ;;  %v2356_v40 = vpack.c.bf16 %v2290_v58, %v2288_v6 }
 0x232   : > { %v5714_v12 = vpop.eup %5713  ;;  %v1965_v14 = vmul.f32 0.5, %v1838_v5  ;;  %v1840_v15 = vadd.f32 %v1839_v11, %v6571_v41  ;;  %v2357_v16 = vpack.c.bf16 %v2291_v62, %v2289_v10  ;;  %v2181_v7 = vmul.f32 0.5, %v5712_v60 }
 0x233   : > { %v1841_v46 = vpop.f32.mrf.mxu0  ;;  %v5716_v34 = vpop.eup %5715  ;;  %v2180_v63 = vmul.f32 0.5, %v5714_v12 }
 0x234   : > { %5727 = vtanh.f32 %v1965_v14  ;;  %v1842_v19 = vadd.f32 %v1841_v46, %v6576_v48  ;;  %v2182_v21 = vmul.f32 0.5, %v5716_v34  ;;  %v1966_v22 = vmul.f32 0.5, %v1840_v15  ;;  %4956 = vmatprep.mubr.msk.bf16.mxu1 %vm2452_vm4, %v2357_v16 }
 0x235   : > { %v5718_v20 = vpop.eup %5717  ;;  %v1845_v8 = vpop.f32.mrf.mxu0  ;;  %5729 = vtanh.f32 %v1964_v13  ;;  %v2293_v31 = vadd.f32 0.5, %v2181_v7  ;;  %v2292_v35 = vadd.f32 0.5, %v2180_v63  ;;  %v5434_v63 = vld [vmem:[%s7360_s4] ss:$8 sps:$4 sm:$0xff]  }
 0x236   : > { %v2183_v24 = vmul.f32 0.5, %v5718_v20  ;;  %v1967_v51 = vmul.f32 0.5, %v1842_v19  ;;  %v1846_v25 = vadd.f32 %v1845_v8, %v6571_v41  ;;  %2750 = vmatmul.mubr.bf16.gmra.mxu1 %v2356_v40  ;;  %v2294_v0 = vadd.f32 0.5, %v2182_v21 }
 0x237   : > { %5731 = vtanh.f32 %v1966_v22  ;;  %v1847_v9 = vpop.f32.mrf.mxu0  ;;  %v5720_v1 = vpop.eup %5719 }
 0x238   : > { %v2295_v54 = vadd.f32 0.5, %v2183_v24  ;;  %5733 = vtanh.f32 %v1967_v51  ;;  %v1968_v32 = vmul.f32 0.5, %v1846_v25  ;;  %v1848_v36 = vadd.f32 %v1847_v9, %v6576_v48 }
 0x239   : > { %v1849_v38 = vpop.f32.mrf.mxu0  ;;  %v5722_v23 = vpop.eup %5721  ;;  %v2358_v45 = vpack.c.bf16 %v2294_v0, %v2292_v35  ;;  %v2184_v39 = vmul.f32 0.5, %v5720_v1 }
 0x23a   : > { %v1850_v2 = vadd.f32 %v1849_v38, %v6571_v41  ;;  %v2359_v42 = vpack.c.bf16 %v2295_v54, %v2293_v31  ;;  %v1969_v43 = vmul.f32 0.5, %v1848_v36  ;;  %5735 = vtanh.f32 %v1968_v32  ;;  %v5437_v31 = vld [vmem:[%s7360_s4 + $0x120] ss:$8 sps:$4 sm:$0xff]   ;;  %v5439_v54 = vld [vmem:[%s7360_s4 + $0x124] ss:$8 sps:$4 sm:$0xff]  }
 0x23b   : > { %v5724_v59 = vpop.eup %5723  ;;  %v1851_v44 = vpop.f32.mrf.mxu0  ;;  %v2185_v61 = vmul.f32 0.5, %v5722_v23  ;;  %v2296_v60 = vadd.f32 0.5, %v2184_v39  ;;  %3557 = vmatprep.subr.bf16.mxu1 %v5439_v54  ;;  %v5457_v54 = vld [vmem:[%s7360_s4 + $0xb4] ss:$8 sps:$4 sm:$0xff]  }
 0x23c   : > { %v2186_v3 = vmul.f32 0.5, %v5724_v59  ;;  %v1970_v47 = vmul.f32 0.5, %v1850_v2  ;;  %v1852_v49 = vadd.f32 %v1851_v44, %v6576_v48  ;;  %4957 = vmatprep.mubr.msk.bf16.mxu1 %vm2452_vm4, %v2359_v42  ;;  %5737 = vtanh.f32 %v1969_v43  ;;  %3558 = vmatpush1.bf16.msra.mxu1 %v5437_v31 }
 0x23d   : > { %v5726_v50 = vpop.eup %5725  ;;  %v1855_v4 = vpop.f32.mrf.mxu0  ;;  %v2297_v10 = vadd.f32 0.5, %v2185_v61 }
 0x23e   : > { %v2187_v52 = vmul.f32 0.5, %v5726_v50  ;;  %5739 = vtanh.f32 %v1970_v47  ;;  %v1971_v28 = vmul.f32 0.5, %v1852_v49  ;;  %2758 = vmatmul.mubr.bf16.gmra.mxu1 %v2358_v45  ;;  %v2298_v53 = vadd.f32 0.5, %v2186_v3 }
 0x23f   : > { %v1856_v56 = vadd.f32 %v1855_v4, %v6571_v41  ;;  %v1857_v55 = vpop.f32.mrf.mxu0 }
 0x240   : > { %v2299_v57 = vadd.f32 0.5, %v2187_v52  ;;  %5741 = vtanh.f32 %v1971_v28  ;;  %v1858_v58 = vadd.f32 %v1857_v55, %v6576_v48  ;;  %v2360_v46 = vpack.c.bf16 %v2298_v53, %v2296_v60  ;;  %v5440_v60 = vld [vmem:[%s7360_s4 + $0xf0] ss:$8 sps:$4 sm:$0xff]  }
 0x241   : > { %v5728_v5 = vpop.eup %5727  ;;  %v1972_v62 = vmul.f32 0.5, %v1856_v56  ;;  %v1859_v11 = vpop.f32.mrf.mxu0 }
 0x242   : > { %v1973_v12 = vmul.f32 0.5, %v1858_v58  ;;  %v1860_v6 = vadd.f32 %v1859_v11, %v6571_v41  ;;  %v5730_v13 = vpop.eup %5729  ;;  %v2361_v15 = vpack.c.bf16 %v2299_v57, %v2297_v10  ;;  %v2189_v34 = vmul.f32 0.5, %v5728_v5  ;;  %v5436_v41 = vld [vmem:[%s7360_s4 + $0x4] ss:$8 sps:$4 sm:$0xff]   ;;  %v5442_v10 = vld [vmem:[%s7360_s4 + $0xf4] ss:$8 sps:$4 sm:$0xff]  }
 0x243   : > { %v1861_v14 = vpop.f32.mrf.mxu0  ;;  %v2188_v21 = vmul.f32 0.5, %v5730_v13  ;;  %3428 = vmatprep.subr.bf16.mxu0 %v5436_v41 }
 0x244   : > { %v5732_v16 = vpop.eup %5731  ;;  %5743 = vtanh.f32 %v1973_v12  ;;  %v1974_v7 = vmul.f32 0.5, %v1860_v6  ;;  %v1862_v19 = vadd.f32 %v1861_v14, %v6576_v48  ;;  %4958 = vmatprep.mubr.msk.bf16.mxu1 %vm2452_vm4, %v2361_v15  ;;  %v2301_v48 = vadd.f32 0.5, %v2189_v34  ;;  %3429 = vmatpush1.bf16.msra.mxu0 %v5434_v63  ;;  %v5443_v63 = vld [vmem:[%s7360_s4 + $0xe0] ss:$8 sps:$4 sm:$0xff]  }
 0x245   : > { %v5734_v40 = vpop.eup %5733  ;;  %v2190_v20 = vmul.f32 0.5, %v5732_v16  ;;  %5745 = vtanh.f32 %v1972_v62  ;;  %v2575_v24 = vpop.f32.mrf.mxu1  ;;  %v2300_v9 = vadd.f32 0.5, %v2188_v21  ;;  %3430 = vmatprep.subr.bf16.mxu0 %v5442_v10  ;;  %v5446_v21 = vld [vmem:[%s7360_s4 + $0x110] ss:$8 sps:$4 sm:$0xff]  }
 0x246   : > { %v2191_v22 = vmul.f32 0.5, %v5734_v40  ;;  %5747 = vtanh.f32 %v1974_v7  ;;  %v1975_v8 = vmul.f32 0.5, %v1862_v19  ;;  %2766 = vmatmul.mubr.bf16.gmra.mxu1 %v2360_v46 }
 0x247   : > { %v2302_v51 = vadd.f32 0.5, %v2190_v20  ;;  %v2577_v26 = vpop.f32.mrf.mxu1  ;;  %v5736_v27 = vpop.eup %5735  ;;  %v5445_v20 = vld [vmem:[%s7360_s4 + $0xe4] ss:$8 sps:$4 sm:$0xff]  }
 0x248   : > { %v2303_v25 = vadd.f32 0.5, %v2191_v22  ;;  %5749 = vtanh.f32 %v1975_v8  ;;  %v2192_v2 = vmul.f32 0.5, %v5736_v27  ;;  %3431 = vmatpush2.bf16.msra.mxu0 %v5440_v60  ;;  %v5448_v22 = vld [vmem:[%s7360_s4 + $0x114] ss:$8 sps:$4 sm:$0xff]  }
 0x249   : > { %v5738_v0 = vpop.eup %5737  ;;  %v2578_v37 = vpop.f32.mrf.mxu1  ;;  %v2362_v38 = vpack.c.bf16 %v2302_v51, %v2300_v9  ;;  %3432 = vmatprep.subr.bf16.mxu0 %v5445_v20  ;;  %3559 = vmatprep.subr.bf16.mxu1 %v5448_v22  ;;  %v5454_v9 = vld [vmem:[%s7360_s4 + $0xc4] ss:$8 sps:$4 sm:$0xff]  }
 0x24a   : > { %v2363_v30 = vpack.c.bf16 %v2303_v25, %v2301_v48  ;;  %v2193_v1 = vmul.f32 0.5, %v5738_v0  ;;  %v2304_v39 = vadd.f32 0.5, %v2192_v2  ;;  %3560 = vmatpush1.bf16.msra.mxu1 %v5446_v21  ;;  %v5449_v25 = vld [vmem:[%s7360_s4 + $0xd0] ss:$8 sps:$4 sm:$0xff]  }
 0x24b   : > { %v5740_v32 = vpop.eup %5739  ;;  %v2580_v36 = vpop.f32.mrf.mxu1 }
 0x24c   : > { %v2194_v35 = vmul.f32 0.5, %v5740_v32  ;;  %4959 = vmatprep.mubr.msk.bf16.mxu1 %vm2452_vm4, %v2363_v30  ;;  %v2305_v44 = vadd.f32 0.5, %v2193_v1  ;;  %3433 = vmatpush2.bf16.msra.mxu0 %v5443_v63  ;;  %v5455_v32 = vld [vmem:[%s7360_s4 + $0xb0] ss:$8 sps:$4 sm:$0xff]   ;;  %v5460_v36 = vld [vmem:[%s7360_s4 + $0xa4] ss:$8 sps:$4 sm:$0xff]  }
 0x24d   : > { %v5742_v23 = vpop.eup %5741  ;;  %v2583_v59 = vpop.f32.mrf.mxu1 }
 0x24e   : > { %v2195_v42 = vmul.f32 0.5, %v5742_v23  ;;  %2774 = vmatmul.mubr.bf16.gmra.mxu1 %v2362_v38  ;;  %v6818_v43 = vadd.f32 %v2583_v59, %v2575_v24  ;;  %v2306_v45 = vadd.f32 0.5, %v2194_v35  ;;  %v5451_v24 = vld [vmem:[%s7360_s4 + $0xd4] ss:$8 sps:$4 sm:$0xff]   ;;  %v5458_v38 = vld [vmem:[%s7360_s4 + $0xa0] ss:$8 sps:$4 sm:$0xff]  }
 0x24f   : > { %v2585_v47 = vpop.f32.mrf.mxu1  ;;  %3434 = vmatprep.subr.bf16.mxu0 %v5451_v24 }
 0x250   : > { %v2307_v3 = vadd.f32 0.5, %v2195_v42  ;;  %v2364_v57 = vpack.c.bf16 %v2306_v45, %v2304_v39  ;;  %3435 = vmatpush2.bf16.msra.mxu0 %v5449_v25  ;;  %v5463_v42 = vld [vmem:[%s7360_s4 + $0x94] ss:$8 sps:$4 sm:$0xff]   ;;  %v5461_v45 = vld [vmem:[%s7360_s4 + $0x90] ss:$8 sps:$4 sm:$0xff]  }
 0x251   : > { %v5744_v49 = vpop.eup %5743  ;;  %v2586_v61 = vpop.f32.mrf.mxu1  ;;  %3436 = vmatprep.subr.bf16.mxu0 %v5454_v9 }
 0x252   : > { %v5746_v50 = vpop.eup %5745  ;;  %v2365_v4 = vpack.c.bf16 %v2307_v3, %v2305_v44  ;;  %v6820_v28 = vadd.f32 %v2586_v61, %v2578_v37  ;;  %v2197_v53 = vmul.f32 0.5, %v5744_v49  ;;  %v5452_v37 = vld [vmem:[%s7360_s4 + $0xc0] ss:$8 sps:$4 sm:$0xff]   ;;  %v5469_v61 = vld [vmem:[%s7360_s4 + $0x84] ss:$8 sps:$4 sm:$0xff]  }
 0x253   : > { %v5748_v52 = vpop.eup %5747  ;;  %v2588_v55 = vpop.f32.mrf.mxu1  ;;  %v2196_v62 = vmul.f32 0.5, %v5746_v50  ;;  %v5464_v49 = vld [vmem:[%s7360_s4 + $0x100] ss:$8 sps:$4 sm:$0xff]   ;;  %v5466_v50 = vld [vmem:[%s7360_s4 + $0x104] ss:$8 sps:$4 sm:$0xff]  }
 0x254   : > { %v2198_v56 = vmul.f32 0.5, %v5748_v52  ;;  %4960 = vmatprep.mubr.msk.bf16.mxu1 %vm2452_vm4, %v2365_v4  ;;  %v2826_v5 = vpack.c.bf16 %v6820_v28, %v6818_v43  ;;  %v2309_v6 = vadd.f32 0.5, %v2197_v53  ;;  %3437 = vmatpush2.bf16.msra.mxu0 %v5452_v37  ;;  %v5467_v4 = vld [vmem:[%s7360_s4 + $0x80] ss:$8 sps:$4 sm:$0xff]  }
 0x255   : > { %v5750_v58 = vpop.eup %5749  ;;  %v2591_v12 = vpop.f32.mrf.mxu1  ;;  %v2308_v46 = vadd.f32 0.5, %v2196_v62  ;;  %3438 = vmatprep.subr.bf16.mxu0 %v5457_v54  ;;  %3561 = vmatprep.subr.bf16.mxu1 %v5466_v50  ;;  %v3108_v55 = vld [vmem:[%s7360_s4 + $0x1a0] sm:$0x33] }
 0x256   : > { %v2199_v11 = vmul.f32 0.5, %v5750_v58  ;;  %2782 = vmatmul.mubr.bf16.gmra.mxu1 %v2364_v57  ;;  %v2310_v13 = vadd.f32 0.5, %v2198_v56  ;;  %v5015_v58 = vcombine.high %v3108_v55, %v3108_v55  ;;  %v5014_v60 = vcombine.low %v3108_v55, %v3108_v55 }
 0x257   : > { %v2593_v15 = vpop.f32.mrf.mxu1  ;;  %3562 = vmatpush1.bf16.msra.mxu1 %v5464_v49 }
 0x258   : > { %v2311_v14 = vadd.f32 0.5, %v2199_v11  ;;  %v2366_v19 = vpack.c.bf16 %v2310_v13, %v2308_v46  ;;  %3439 = vmatpush2.bf16.msra.mxu0 %v5455_v32  ;;  %5016 = vmatprep.subr.msk.bf16.mxu1 %vm3407_vm5, %v5015_v58  ;;  %v3409_v62 = vsel %vm3407_vm5, %v5014_v60, 0 }
 0x259   : > { %v2594_v16 = vpop.f32.mrf.mxu1  ;;  %3440 = vmatprep.subr.bf16.mxu0 %v5460_v36 }
 0x25a   : > { %v2367_v34 = vpack.c.bf16 %v2311_v14, %v2309_v6  ;;  %v5472_v14 = vld [vmem:[%s7360_s4 + $0x190] ss:$8 sps:$4 sm:$0xff]  }
 0x25b   : > { %v2596_v7 = vpop.f32.mrf.mxu1  ;;  %3574 = vmatpush2.bf16.msra.mxu1 %v3409_v62 }
 0x25c   : > { %4961 = vmatprep.mubr.msk.bf16.mxu1 %vm2452_vm4, %v2367_v34  ;;  %3441 = vmatpush2.bf16.msra.mxu0 %v5458_v38  ;;  %v5475_v34 = vld [vmem:[%s7360_s4 + $0x180] ss:$8 sps:$4 sm:$0xff]   ;;  %v5477_v7 = vld [vmem:[%s7360_s4 + $0x184] ss:$8 sps:$4 sm:$0xff]  }
 0x25d   : > { %v2599_v40 = vpop.f32.mrf.mxu1  ;;  %3442 = vmatprep.subr.bf16.mxu0 %v5463_v42 }
 0x25e   : > { %2790 = vmatmul.mubr.bf16.gmra.mxu1 %v2366_v19  ;;  %v2800_v48 = vadd.f32 %v2599_v40, %v2591_v12  ;;  %v5474_v12 = vld [vmem:[%s7360_s4 + $0x194] ss:$8 sps:$4 sm:$0xff]  }
 0x25f   : > { %v2601_v41 = vpop.f32.mrf.mxu1  ;;  %3575 = vmatprep.subr.bf16.mxu1 %v5474_v12 }
 0x260   : > { %3443 = vmatpush2.bf16.msra.mxu0 %v5461_v45  ;;  %3576 = vmatpush2.bf16.msra.mxu1 %v5472_v14 }
 0x261   : > { %v2602_v8 = vpop.f32.mrf.mxu1  ;;  %3444 = vmatprep.subr.bf16.mxu0 %v5469_v61  ;;  %3577 = vmatprep.subr.bf16.mxu1 %v5477_v7 }
 0x262   : > { %v2801_v51 = vadd.f32 %v2602_v8, %v2594_v16 }
 0x263   : > { %v2604_v26 = vpop.f32.mrf.mxu1 }
 0x264   : > { %v6850_v27 = vpack.c.bf16 %v2801_v51, %v2800_v48  ;;  %3445 = vmatpush2.bf16.msra.mxu0 %v5467_v4  ;;  %3578 = vmatpush2.bf16.msra.mxu1 %v5475_v34 }
 0x265   : > { %v2607_v0 = vpop.f32.mrf.mxu1  ;;  %3970 = vmatprep.subr.bf16.mxu0 %v5866_v17 }
 0x266   : > { %2850 = vrot.lane.b32.xlu0 %v6850_v27, %s5867_s24 }
 0x267   : > { %v2609_v30 = vpop.f32.mrf.mxu1 }
 0x269   : > { %v2610_v31 = vpop.f32.mrf.mxu1 }
 0x26b   : > { %v2612_v1 = vpop.f32.mrf.mxu1 }
 0x26d   : > { %v2615_v35 = vpop.f32.mrf.mxu1 }
 0x26e   : > { %v2802_v59 = vadd.f32 %v2615_v35, %v2607_v0 }
 0x26f   : > { %v2617_v23 = vpop.f32.mrf.mxu1 }
 0x271   : > { %v2618_v2 = vpop.f32.mrf.mxu1 }
 0x272   : > { %v2803_v44 = vadd.f32 %v2618_v2, %v2610_v31 }
 0x273   : > { %v2620_v3 = vpop.f32.mrf.mxu1 }
 0x274   : > { %v6878_v47 = vpack.c.bf16 %v2803_v44, %v2802_v59 }
 0x275   : > { %v2623_v39 = vpop.f32.mrf.mxu1 }
 0x276   : > { %2871 = vrot.lane.b32.xlu1 %v6878_v47, %s5868_s22 }
 0x277   : > { %v2625_v52 = vpop.f32.mrf.mxu1 }
 0x279   : > { %v2626_v53 = vpop.f32.mrf.mxu1 }
 0x27b   : > { %v2628_v56 = vpop.f32.mrf.mxu1 }
 0x27e   : > { %v2631_v57 = vpop.f32.mrf.mxu1 }
 0x27f   : > { %v2804_v6 = vadd.f32 %v2631_v57, %v2623_v39 }
 0x280   : > { %v2633_v10 = vpop.f32.mrf.mxu1 }
 0x282   : > { %v2634_v11 = vpop.f32.mrf.mxu1 }
 0x283   : > { %v2805_v13 = vadd.f32 %v2634_v11, %v2626_v53 }
 0x284   : > { %v2636_v15 = vpop.f32.mrf.mxu1 }
 0x285   : > { %v6906_v46 = vpack.c.bf16 %v2805_v13, %v2804_v6 }
 0x286   : > { %v2639_v16 = vpop.f32.mrf.mxu1 }
 0x287   : > { %2892 = vrot.lane.b32.xlu0 %v6906_v46, %s5869_s16 }
 0x288   : > { %v2641_v19 = vpop.f32.mrf.mxu1 }
 0x28a   : > { %v2642_v40 = vpop.f32.mrf.mxu1 }
 0x28b   : > { %2852 = vrot.lane.b32.xlu0 %v6878_v47, %s5867_s24 }
 0x28c   : > { %v2644_v20 = vpop.f32.mrf.mxu1 }
 0x28e   : > { %v2647_v63 = vpop.f32.mrf.mxu1 }
 0x28f   : > { %v2806_v22 = vadd.f32 %v2647_v63, %v2639_v16 }
 0x290   : > { %v2649_v41 = vpop.f32.mrf.mxu1 }
 0x292   : > { %v2650_v21 = vpop.f32.mrf.mxu1 }
 0x293   : > { %v2807_v8 = vadd.f32 %v2650_v21, %v2642_v40 }
 0x294   : > { %v2652_v24 = vpop.f32.mrf.mxu1 }
 0x295   : > { %v6918_v48 = vpack.c.bf16 %v2807_v8, %v2806_v22 }
 0x296   : > { %v2655_v51 = vpop.f32.mrf.mxu1 }
 0x297   : > { %2894 = vrot.lane.b32.xlu0 %v6918_v48, %s5869_s16  ;;  %2913 = vrot.lane.b32.xlu1 %v6918_v48, %s5870_s17 }
 0x298   : > { %v2657_v25 = vpop.f32.mrf.mxu1 }
 0x29a   : > { %v2658_v26 = vpop.f32.mrf.mxu1 }
 0x29b   : > { %2854 = vrot.lane.b32.xlu0 %v6906_v46, %s5867_s24  ;;  %2873 = vrot.lane.b32.xlu1 %v6906_v46, %s5868_s22 }
 0x29c   : > { %v2660_v0 = vpop.f32.mrf.mxu1 }
 0x29e   : > { %v2663_v9 = vpop.f32.mrf.mxu1 }
 0x29f   : > { %v2808_v31 = vadd.f32 %v2663_v9, %v2655_v51 }
 0x2a0   : > { %v2665_v37 = vpop.f32.mrf.mxu1 }
 0x2a2   : > { %v2666_v30 = vpop.f32.mrf.mxu1 }
 0x2a3   : > { %v2809_v54 = vadd.f32 %v2666_v30, %v2658_v26 }
 0x2a4   : > { %v2668_v32 = vpop.f32.mrf.mxu1 }
 0x2a5   : > { %v6928_v1 = vpack.c.bf16 %v2809_v54, %v2808_v31 }
 0x2a6   : > { %v2671_v35 = vpop.f32.mrf.mxu1 }
 0x2a7   : > { %2896 = vrot.lane.b32.xlu0 %v6928_v1, %s5869_s16  ;;  %2915 = vrot.lane.b32.xlu1 %v6928_v1, %s5870_s17 }
 0x2a8   : > { %v2673_v36 = vpop.f32.mrf.mxu1 }
 0x2aa   : > { %v2674_v38 = vpop.f32.mrf.mxu1 }
 0x2ab   : > { %2856 = vrot.lane.b32.xlu0 %v6918_v48, %s5867_s24  ;;  %2875 = vrot.lane.b32.xlu1 %v6918_v48, %s5868_s22 }
 0x2ac   : > { %v2676_v23 = vpop.f32.mrf.mxu1 }
 0x2ae   : > { %v2679_v2 = vpop.f32.mrf.mxu1 }
 0x2af   : > { %v2810_v44 = vadd.f32 %v2679_v2, %v2671_v35 }
 0x2b0   : > { %v2681_v42 = vpop.f32.mrf.mxu1 }
 0x2b2   : > { %v2682_v59 = vpop.f32.mrf.mxu1 }
 0x2b3   : > { %v2811_v45 = vadd.f32 %v2682_v59, %v2674_v38 }
 0x2b4   : > { %v2684_v3 = vpop.f32.mrf.mxu1 }
 0x2b5   : > { %v6938_v49 = vpack.c.bf16 %v2811_v45, %v2810_v44 }
 0x2b6   : > { %v2687_v50 = vpop.f32.mrf.mxu1 }
 0x2b7   : > { %2898 = vrot.lane.b32.xlu0 %v6938_v49, %s5869_s16  ;;  %2917 = vrot.lane.b32.xlu1 %v6938_v49, %s5870_s17 }
 0x2b8   : > { %v2689_v39 = vpop.f32.mrf.mxu1 }
 0x2ba   : > { %v2690_v61 = vpop.f32.mrf.mxu1 }
 0x2bb   : > { %2858 = vrot.lane.b32.xlu0 %v6928_v1, %s5867_s24  ;;  %2877 = vrot.lane.b32.xlu1 %v6928_v1, %s5868_s22 }
 0x2bc   : > { %v2692_v4 = vpop.f32.mrf.mxu1 }
 0x2be   : > { %v2695_v52 = vpop.f32.mrf.mxu1 }
 0x2bf   : > { %v2812_v55 = vadd.f32 %v2695_v52, %v2687_v50 }
 0x2c0   : > { %v2697_v53 = vpop.f32.mrf.mxu1 }
 0x2c2   : > { %v2698_v56 = vpop.f32.mrf.mxu1 }
 0x2c3   : > { %v2813_v57 = vadd.f32 %v2698_v56, %v2690_v61 }
 0x2c4   : > { %v2700_v58 = vpop.f32.mrf.mxu1 }
 0x2c5   : > { %v6948_v60 = vpack.c.bf16 %v2813_v57, %v2812_v55 }
 0x2c6   : > { %v2703_v10 = vpop.f32.mrf.mxu1 }
 0x2c7   : > { %2900 = vrot.lane.b32.xlu0 %v6948_v60, %s5869_s16  ;;  %2919 = vrot.lane.b32.xlu1 %v6948_v60, %s5870_s17 }
 0x2c8   : > { %v2705_v62 = vpop.f32.mrf.mxu1 }
 0x2ca   : > { %v2706_v11 = vpop.f32.mrf.mxu1 }
 0x2cb   : > { %2860 = vrot.lane.b32.xlu0 %v6938_v49, %s5867_s24  ;;  %2879 = vrot.lane.b32.xlu1 %v6938_v49, %s5868_s22 }
 0x2cc   : > { %v2708_v12 = vpop.f32.mrf.mxu1 }
 0x2ce   : > { %v2711_v6 = vpop.f32.mrf.mxu1 }
 0x2cf   : > { %v2814_v15 = vadd.f32 %v2711_v6, %v2703_v10 }
 0x2d0   : > { %v2713_v13 = vpop.f32.mrf.mxu1 }
 0x2d2   : > { %v2714_v14 = vpop.f32.mrf.mxu1 }
 0x2d3   : > { %v2815_v16 = vadd.f32 %v2714_v14, %v2706_v11 }
 0x2d4   : > { %v2716_v34 = vpop.f32.mrf.mxu1 }
 0x2d5   : > { %v6958_v7 = vpack.c.bf16 %v2815_v16, %v2814_v15 }
 0x2d6   : > { %v2719_v19 = vpop.f32.mrf.mxu1 }
 0x2d7   : > { %2902 = vrot.lane.b32.xlu0 %v6958_v7, %s5869_s16  ;;  %2921 = vrot.lane.b32.xlu1 %v6958_v7, %s5870_s17 }
 0x2d8   : > { %v2721_v40 = vpop.f32.mrf.mxu1  ;;  %v2851_v38 = vpop.permute.xlu0 %2850 }
 0x2d9   : > { %v2936_v39 = vsel %vm2933_vm7, %v2826_v5, %v2851_v38 }
 0x2da   : > { %v2722_v20 = vpop.f32.mrf.mxu1 }
 0x2db   : > { %2862 = vrot.lane.b32.xlu0 %v6948_v60, %s5867_s24  ;;  %2881 = vrot.lane.b32.xlu1 %v6948_v60, %s5868_s22 }
 0x2dc   : > { %v2724_v63 = vpop.f32.mrf.mxu1 }
 0x2de   : > { %v2727_v41 = vpop.f32.mrf.mxu1 }
 0x2df   : > { %v2816_v8 = vadd.f32 %v2727_v41, %v2719_v19 }
 0x2e0   : > { %v2729_v21 = vpop.f32.mrf.mxu1 }
 0x2e2   : > { %v2730_v22 = vpop.f32.mrf.mxu1 }
 0x2e3   : > { %v2817_v24 = vadd.f32 %v2730_v22, %v2722_v20 }
 0x2e4   : > { %v2732_v51 = vpop.f32.mrf.mxu1 }
 0x2e5   : > { %v6968_v25 = vpack.c.bf16 %v2817_v24, %v2816_v8 }
 0x2e6   : > { %v2735_v26 = vpop.f32.mrf.mxu1 }
 0x2e7   : > { %2904 = vrot.lane.b32.xlu0 %v6968_v25, %s5869_s16  ;;  %2923 = vrot.lane.b32.xlu1 %v6968_v25, %s5870_s17 }
 0x2e8   : > { %v2737_v0 = vpop.f32.mrf.mxu1  ;;  %v2872_v2 = vpop.permute.xlu1 %2871 }
 0x2e9   : > { %v2975_v44 = vsel %vm2452_vm4, %v2851_v38, %v2872_v2 }
 0x2ea   : > { %v2738_v9 = vpop.f32.mrf.mxu1 }
 0x2eb   : > { %2864 = vrot.lane.b32.xlu0 %v6958_v7, %s5867_s24  ;;  %2883 = vrot.lane.b32.xlu1 %v6958_v7, %s5868_s22 }
 0x2ec   : > { %v2740_v37 = vpop.f32.mrf.mxu1 }
 0x2ee   : > { %v2743_v30 = vpop.f32.mrf.mxu1 }
 0x2ef   : > { %v2818_v32 = vadd.f32 %v2743_v30, %v2735_v26 }
 0x2f0   : > { %v2745_v31 = vpop.f32.mrf.mxu1 }
 0x2f2   : > { %v2746_v54 = vpop.f32.mrf.mxu1 }
 0x2f3   : > { %v2819_v35 = vadd.f32 %v2746_v54, %v2738_v9 }
 0x2f4   : > { %v2748_v36 = vpop.f32.mrf.mxu1 }
 0x2f5   : > { %v2836_v23 = vpack.c.bf16 %v2819_v35, %v2818_v32 }
 0x2f6   : > { %v2751_v42 = vpop.f32.mrf.mxu1 }
 0x2f7   : > { %2906 = vrot.lane.b32.xlu0 %v2836_v23, %s5869_s16  ;;  %2925 = vrot.lane.b32.xlu1 %v2836_v23, %s5870_s17 }
 0x2f8   : > { %v2753_v59 = vpop.f32.mrf.mxu1 }
 0x2f9   : > { %v2893_v45 = vpop.permute.xlu0 %2892 }
 0x2fa   : > { %v2754_v3 = vpop.f32.mrf.mxu1  ;;  %v2996_v50 = vsel %vm2994_vm6, %v2975_v44, %v2893_v45 }
 0x2fb   : > { %3446 = vmatprep.mubr.bf16.mxu0 %v2996_v50  ;;  %2866 = vrot.lane.b32.xlu0 %v6968_v25, %s5867_s24 }
 0x2fc   : > { %2885 = vrot.lane.b32.xlu1 %v6968_v25, %s5868_s22  ;;  %v2756_v61 = vpop.f32.mrf.mxu1  ;;  %3447 = vmatmul.mubr.bf16.vlgmr.msra.gmra.mxu0 %v2936_v39 }
 0x2fd   : > { %v2853_v5 = vpop.permute.xlu0 %2852 }
 0x2fe   : > { %v2759_v4 = vpop.f32.mrf.mxu1  ;;  %v2940_v34 = vsel %vm2933_vm7, %v6850_v27, %v2853_v5 }
 0x2ff   : > { %v2820_v56 = vadd.f32 %v2759_v4, %v2751_v42 }
 0x300   : > { %v2761_v52 = vpop.f32.mrf.mxu1 }
 0x302   : > { %v2762_v53 = vpop.f32.mrf.mxu1 }
 0x303   : > { %v2821_v55 = vadd.f32 %v2762_v53, %v2754_v3 }
 0x304   : > { %v2764_v57 = vpop.f32.mrf.mxu1 }
 0x305   : > { %v2837_v58 = vpack.c.bf16 %v2821_v55, %v2820_v56 }
 0x306   : > { %v2767_v10 = vpop.f32.mrf.mxu1 }
 0x307   : > { %2908 = vrot.lane.b32.xlu0 %v2837_v58, %s5869_s16  ;;  %2927 = vrot.lane.b32.xlu1 %v2837_v58, %s5870_s17 }
 0x308   : > { %v2769_v43 = vpop.f32.mrf.mxu1 }
 0x309   : > { %v2914_v28 = vpop.permute.xlu1 %2913  ;;  %v2895_v13 = vpop.permute.xlu0 %2894  ;;  %v5479_v43 = vld [vmem:[%s7362_s6 + $0x30] sm:$0xff]  }
 0x30a   : > { %v3027_v62 = vsel %vm3025_vm8, %v2893_v45, %v2914_v28  ;;  %v2770_v11 = vpop.f32.mrf.mxu1  ;;  %5017 = vmatprep.mubr.msk.bf16.mxu1 %vm3386_vm9, %v2914_v28 }
 0x30b   : > { %3580 = vmatmul.mubr.bf16.vlgmr.msra.gmra.mxu1 %v3027_v62  ;;  %2868 = vrot.lane.b32.xlu0 %v2836_v23, %s5867_s24 }
 0x30c   : > { %2887 = vrot.lane.b32.xlu1 %v2836_v23, %s5868_s22  ;;  %v2772_v12 = vpop.f32.mrf.mxu1 }
 0x30d   : > { %v2874_v6 = vpop.permute.xlu1 %2873  ;;  %v2855_v51 = vpop.permute.xlu0 %2854 }
 0x30e   : > { %v2977_v14 = vsel %vm2452_vm4, %v2853_v5, %v2874_v6  ;;  %v2775_v15 = vpop.f32.mrf.mxu1  ;;  %v2944_v32 = vsel %vm2933_vm7, %v6878_v47, %v2855_v51 }
 0x30f   : > { %v2999_v16 = vsel %vm2994_vm6, %v2977_v14, %v2895_v13  ;;  %v2822_v20 = vadd.f32 %v2775_v15, %v2767_v10  ;;  %v5481_v14 = vld [vmem:[%s7362_s6 + $0x20] sm:$0xff]  }
 0x310   : > { %v2777_v19 = vpop.f32.mrf.mxu1  ;;  %3456 = vmatprep.mubr.bf16.mxu0 %v2999_v16  ;;  %v5482_v16 = vld [vmem:[%s7362_s6 + $0x18] sm:$0xff]  }
 0x311   : > { %3457 = vmatmul.mubr.bf16.gmra.mxu0 %v2940_v34  ;;  %v5483_v34 = vld [vmem:[%s7362_s6 + $0x10] sm:$0xff]  }
 0x312   : > { %v2778_v40 = vpop.f32.mrf.mxu1 }
 0x313   : > { %v2823_v63 = vadd.f32 %v2778_v40, %v2770_v11 }
 0x314   : > { %v2780_v41 = vpop.f32.mrf.mxu1 }
 0x315   : > { %v2838_v21 = vpack.c.bf16 %v2823_v63, %v2822_v20  ;;  %v5484_v20 = vld [vmem:[%s7362_s6 + $0x8] sm:$0xff]  }
 0x316   : > { %v2783_v22 = vpop.f32.mrf.mxu1 }
 0x317   : > { %2910 = vrot.lane.b32.xlu0 %v2838_v21, %s5869_s16  ;;  %2929 = vrot.lane.b32.xlu1 %v2838_v21, %s5870_s17 }
 0x318   : > { %v2785_v8 = vpop.f32.mrf.mxu1 }
 0x319   : > { %v2916_v24 = vpop.permute.xlu1 %2915  ;;  %v2897_v37 = vpop.permute.xlu0 %2896  ;;  %v5485_v8 = vld [vmem:[%s7362_s6] sm:$0xff]  }
 0x31a   : > { %v3030_v26 = vsel %vm3025_vm8, %v2895_v13, %v2916_v24  ;;  %v2786_v0 = vpop.f32.mrf.mxu1  ;;  %5018 = vmatprep.mubr.msk.bf16.mxu1 %vm3386_vm9, %v2916_v24 }
 0x31b   : > { %3590 = vmatmul.mubr.bf16.gmra.mxu1 %v3030_v26  ;;  %2889 = vrot.lane.b32.xlu1 %v2837_v58, %s5868_s22  ;;  %v5487_v26 = vld [vmem:[%s7362_s6 + $0x40] sm:$0xff]  }
 0x31c   : > { %v2788_v27 = vpop.f32.mrf.mxu1 }
 0x31d   : > { %v2876_v9 = vpop.permute.xlu1 %2875  ;;  %v2857_v44 = vpop.permute.xlu0 %2856 }
 0x31e   : > { %v2979_v30 = vsel %vm2452_vm4, %v2855_v51, %v2876_v9  ;;  %v2791_v31 = vpop.f32.mrf.mxu1  ;;  %v2948_v61 = vsel %vm2933_vm7, %v6906_v46, %v2857_v44  ;;  %v5478_v46 = vld [vmem:[%s7362_s6 + $0x38] sm:$0xff]   ;;  %v5486_v51 = vld [vmem:[%s7362_s6 + $0x48] sm:$0xff]  }
 0x31f   : > { %v3002_v54 = vsel %vm2994_vm6, %v2979_v30, %v2897_v37  ;;  %v2824_v38 = vadd.f32 %v2791_v31, %v2783_v22  ;;  %3971 = vmatpush1.bf16.msra.mxu0 %v5478_v46 }
 0x320   : > { %v2793_v35 = vpop.f32.mrf.mxu1  ;;  %3466 = vmatprep.mubr.bf16.mxu0 %v3002_v54  ;;  %3972 = vmatprep.subr.bf16.mxu0 %v5866_v17 }
 0x321   : > { %3467 = vmatmul.mubr.bf16.gmra.mxu0 %v2944_v32 }
 0x322   : > { %v2794_v36 = vpop.f32.mrf.mxu1 }
 0x323   : > { %v2825_v23 = vadd.f32 %v2794_v36, %v2786_v0  ;;  %3973 = vmatpush1.bf16.msra.mxu0 %v5479_v43 }
 0x324   : > { %v2796_v2 = vpop.f32.mrf.mxu1  ;;  %3974 = vmatprep.subr.bf16.mxu0 %v5866_v17 }
 0x325   : > { %v2839_v42 = vpack.c.bf16 %v2825_v23, %v2824_v38 }
 0x327   : > { %2931 = vrot.lane.b32.xlu1 %v2839_v42, %s5870_s17 }
 0x329   : > { %v2918_v59 = vpop.permute.xlu1 %2917  ;;  %v2899_v50 = vpop.permute.xlu0 %2898 }
 0x32a   : > { %v3033_v45 = vsel %vm3025_vm8, %v2897_v37, %v2918_v59  ;;  %5019 = vmatprep.mubr.msk.bf16.mxu1 %vm3386_vm9, %v2918_v59 }
 0x32b   : > { %3600 = vmatmul.mubr.bf16.gmra.mxu1 %v3033_v45 }
 0x32d   : > { %v2878_v3 = vpop.permute.xlu1 %2877  ;;  %v2859_v52 = vpop.permute.xlu0 %2858 }
 0x32e   : > { %v2981_v47 = vsel %vm2452_vm4, %v2857_v44, %v2878_v3  ;;  %v2952_v10 = vsel %vm2933_vm7, %v6918_v48, %v2859_v52  ;;  %v5480_v48 = vld [vmem:[%s7362_s6 + $0x28] sm:$0xff]  }
 0x32f   : > { %v3005_v39 = vsel %vm2994_vm6, %v2981_v47, %v2899_v50  ;;  %3975 = vmatpush1.bf16.msra.mxu0 %v5480_v48 }
 0x330   : > { %3476 = vmatprep.mubr.bf16.mxu0 %v3005_v39  ;;  %3976 = vmatprep.subr.bf16.mxu0 %v5866_v17 }
 0x331   : > { %3477 = vmatmul.mubr.bf16.gmra.mxu0 %v2948_v61 }
 0x333   : > { %3977 = vmatpush1.bf16.msra.mxu0 %v5481_v14 }
 0x334   : > { %3978 = vmatprep.subr.bf16.mxu0 %v5866_v17 }
 0x337   : > { %3979 = vmatpush1.bf16.msra.mxu0 %v5482_v16 }
 0x338   : > { %3980 = vmatprep.subr.bf16.mxu0 %v5866_v17 }
 0x339   : > { %v2920_v4 = vpop.permute.xlu1 %2919  ;;  %v2901_v55 = vpop.permute.xlu0 %2900 }
 0x33a   : > { %v3036_v53 = vsel %vm3025_vm8, %v2899_v50, %v2920_v4  ;;  %5020 = vmatprep.mubr.msk.bf16.mxu1 %vm3386_vm9, %v2920_v4 }
 0x33b   : > { %3610 = vmatmul.mubr.bf16.gmra.mxu1 %v3036_v53  ;;  %3981 = vmatpush1.bf16.msra.mxu0 %v5483_v34 }
 0x33c   : > { %3982 = vmatprep.subr.bf16.mxu0 %v5866_v17 }
 0x33d   : > { %v2880_v56 = vpop.permute.xlu1 %2879  ;;  %v2861_v5 = vpop.permute.xlu0 %2860 }
 0x33e   : > { %v2983_v57 = vsel %vm2452_vm4, %v2859_v52, %v2880_v56  ;;  %v2956_v15 = vsel %vm2933_vm7, %v6928_v1, %v2861_v5  ;;  %v3109_v52 = vld [vmem:[%s7361_s5] sm:$0x3] }
 0x33f   : > { %v3008_v58 = vsel %vm2994_vm6, %v2983_v57, %v2901_v55  ;;  %3983 = vmatpush1.bf16.msra.mxu0 %v5484_v20  ;;  %v7098_v56 = vrot.slane %v3109_v52, %v1383_v18 }
 0x340   : > { %3486 = vmatprep.mubr.bf16.mxu0 %v3008_v58  ;;  %3984 = vmatprep.subr.bf16.mxu0 %v5866_v17 }
 0x341   : > { %3487 = vmatmul.mubr.bf16.gmra.mxu0 %v2952_v10 }
 0x343   : > { %3985 = vmatpush1.bf16.msra.mxu0 %v5485_v8 }
 0x344   : > { %3998 = vmatprep.subr.bf16.mxu0 %v5866_v17 }
 0x347   : > { %3999 = vmatpush2.bf16.msra.mxu0 %v5486_v51 }
 0x348   : > { %4000 = vmatprep.subr.bf16.mxu0 %v5866_v17 }
 0x349   : > { %v2922_v28 = vpop.permute.xlu1 %2921  ;;  %v2903_v12 = vpop.permute.xlu0 %2902 }
 0x34a   : > { %v3039_v62 = vsel %vm3025_vm8, %v2901_v55, %v2922_v28  ;;  %5021 = vmatprep.mubr.msk.bf16.mxu1 %vm3386_vm9, %v2922_v28 }
 0x34b   : > { %3620 = vmatmul.mubr.bf16.gmra.mxu1 %v3039_v62  ;;  %4001 = vmatpush2.bf16.msra.mxu0 %v5487_v26 }
 0x34d   : > { %v2882_v11 = vpop.permute.xlu1 %2881  ;;  %v2863_v40 = vpop.permute.xlu0 %2862 }
 0x34e   : > { %v2985_v6 = vsel %vm2452_vm4, %v2861_v5, %v2882_v11  ;;  %v2960_v24 = vsel %vm2933_vm7, %v6938_v49, %v2863_v40 }
 0x34f   : > { %v3011_v13 = vsel %vm2994_vm6, %v2985_v6, %v2903_v12 }
 0x350   : > { %3496 = vmatprep.mubr.bf16.mxu0 %v3011_v13 }
 0x351   : > { %3497 = vmatmul.mubr.bf16.gmra.mxu0 %v2956_v15 }
 0x359   : > { %v2924_v19 = vpop.permute.xlu1 %2923  ;;  %v2905_v41 = vpop.permute.xlu0 %2904 }
 0x35a   : > { %v3042_v1 = vsel %vm3025_vm8, %v2903_v12, %v2924_v19  ;;  %5022 = vmatprep.mubr.msk.bf16.mxu1 %vm3386_vm9, %v2924_v19 }
 0x35b   : > { %3630 = vmatmul.mubr.bf16.gmra.mxu1 %v3042_v1 }
 0x35d   : > { %v2884_v63 = vpop.permute.xlu1 %2883  ;;  %v2865_v49 = vpop.permute.xlu0 %2864 }
 0x35e   : > { %v2987_v21 = vsel %vm2452_vm4, %v2863_v40, %v2884_v63  ;;  %v2964_v17 = vsel %vm2933_vm7, %v6948_v60, %v2865_v49 }
 0x35f   : > { %v3014_v22 = vsel %vm2994_vm6, %v2987_v21, %v2905_v41 }
 0x360   : > { %3506 = vmatprep.mubr.bf16.mxu0 %v3014_v22 }
 0x361   : > { %3507 = vmatmul.mubr.bf16.gmra.mxu0 %v2960_v24 }
 0x369   : > { %v2926_v0 = vpop.permute.xlu1 %2925  ;;  %v2907_v37 = vpop.permute.xlu0 %2906 }
 0x36a   : > { %v3045_v27 = vsel %vm3025_vm8, %v2905_v41, %v2926_v0  ;;  %5023 = vmatprep.mubr.msk.bf16.mxu1 %vm3386_vm9, %v2926_v0 }
 0x36b   : > { %3640 = vmatmul.mubr.bf16.gmra.mxu1 %v3045_v27 }
 0x36d   : > { %v2867_v35 = vpop.permute.xlu0 %2866 }
 0x36e   : > { %v2886_v9 = vpop.permute.xlu1 %2885  ;;  %v2968_v42 = vsel %vm2933_vm7, %v6958_v7, %v2867_v35 }
 0x36f   : > { %v2989_v30 = vsel %vm2452_vm4, %v2865_v49, %v2886_v9 }
 0x370   : > { %v3017_v31 = vsel %vm2994_vm6, %v2989_v30, %v2907_v37 }
 0x371   : > { %3516 = vmatprep.mubr.bf16.mxu0 %v3017_v31 }
 0x372   : > { %3517 = vmatmul.mubr.bf16.gmra.mxu0 %v2964_v17 }
 0x379   : > { %v2928_v54 = vpop.permute.xlu1 %2927  ;;  %v2909_v38 = vpop.permute.xlu0 %2908 }
 0x37a   : > { %v3048_v32 = vsel %vm3025_vm8, %v2907_v37, %v2928_v54  ;;  %5024 = vmatprep.mubr.msk.bf16.mxu1 %vm3386_vm9, %v2928_v54 }
 0x37b   : > { %3650 = vmatmul.mubr.bf16.gmra.mxu1 %v3048_v32 }
 0x37d   : > { %v2869_v59 = vpop.permute.xlu0 %2868 }
 0x37e   : > { %v2888_v36 = vpop.permute.xlu1 %2887  ;;  %v2972_v39 = vsel %vm2933_vm7, %v6968_v25, %v2869_v59  ;;  %v7102_v25 = vrot.slane %v3109_v52, %v1387_v33 }
 0x37f   : > { %v2991_v23 = vsel %vm2452_vm4, %v2867_v35, %v2888_v36 }
 0x380   : > { %v3020_v2 = vsel %vm2994_vm6, %v2991_v23, %v2909_v38 }
 0x381   : > { %3526 = vmatprep.mubr.bf16.mxu0 %v3020_v2 }
 0x382   : > { %3527 = vmatmul.mubr.bf16.gmra.mxu0 %v2968_v42 }
 0x389   : > { %v2930_v60 = vpop.permute.xlu1 %2929  ;;  %v2911_v3 = vpop.permute.xlu0 %2910 }
 0x38a   : > { %v3051_v44 = vsel %vm3025_vm8, %v2909_v38, %v2930_v60  ;;  %5025 = vmatprep.mubr.msk.bf16.mxu1 %vm3386_vm9, %v2930_v60 }
 0x38b   : > { %3660 = vmatmul.mubr.bf16.gmra.mxu1 %v3051_v44 }
 0x38d   : > { %v2890_v45 = vpop.permute.xlu1 %2889 }
 0x38e   : > { %v2993_v50 = vsel %vm2452_vm4, %v2869_v59, %v2890_v45 }
 0x38f   : > { %v3023_v47 = vsel %vm2994_vm6, %v2993_v50, %v2911_v3 }
 0x390   : > { %3536 = vmatprep.mubr.bf16.mxu0 %v3023_v47 }
 0x391   : > { %3537 = vmatmul.mubr.bf16.gmra.mxu0 %v2972_v39 }
 0x399   : > { %v2932_v7 = vpop.permute.xlu1 %2931 }
 0x39a   : > { %v3054_v61 = vsel %vm3025_vm8, %v2911_v3, %v2932_v7  ;;  %5026 = vmatprep.mubr.msk.bf16.mxu1 %vm3386_vm9, %v2932_v7 }
 0x39b   : > { %3670 = vmatmul.mubr.bf16.gmra.mxu1 %v3054_v61 }
 0x3bc   : > { %v3448_v4 = vpop.f32.mrf.mxu0 }
 0x3bd   : > { %v3449_v57 = vadd.f32 %v3448_v4, %v7098_v56 }
 0x3be   : > { %v3450_v53 = vpop.f32.mrf.mxu0 }
 0x3bf   : > { %v3451_v10 = vadd.f32 %v3450_v53, %v7102_v25 }
 0x3c0   : > { %v3452_v55 = vpop.f32.mrf.mxu0 }
 0x3c1   : > { %v3453_v5 = vadd.f32 %v3452_v55, %v7098_v56 }
 0x3c2   : > { %v3454_v43 = vpop.f32.mrf.mxu0 }
 0x3c3   : > { %v3455_v18 = vadd.f32 %v3454_v43, %v7102_v25 }
 0x3cb   : > { %v3581_v58 = vpop.f32.mrf.mxu1 }
 0x3cc   : > { %v3582_v46 = vadd.f32 %v3581_v58, %v3449_v57 }
 0x3cd   : > { %v3583_v28 = vpop.f32.mrf.mxu1 }
 0x3ce   : > { %v3584_v62 = vadd.f32 %v3583_v28, %v3451_v10  ;;  %v3680_v48 = vmul.f32 0.5, %v3582_v46 }
 0x3cf   : > { %v3585_v11 = vpop.f32.mrf.mxu1 }
 0x3d0   : > { %v3681_v12 = vmul.f32 0.5, %v3584_v62  ;;  %v3586_v29 = vadd.f32 %v3585_v11, %v3453_v5 }
 0x3d1   : > { %v3587_v33 = vpop.f32.mrf.mxu1  ;;  %v3458_v13 = vpop.f32.mrf.mxu0 }
 0x3d2   : > { %5751 = vtanh.f32 %v3681_v12  ;;  %v3682_v6 = vmul.f32 0.5, %v3586_v29  ;;  %v3588_v14 = vadd.f32 %v3587_v33, %v3455_v18  ;;  %v3459_v34 = vadd.f32 %v3458_v13, %v7098_v56 }
 0x3d3   : > { %5753 = vtanh.f32 %v3680_v48  ;;  %v3460_v16 = vpop.f32.mrf.mxu0 }
 0x3d4   : > { %5755 = vtanh.f32 %v3682_v6  ;;  %v3683_v15 = vmul.f32 0.5, %v3588_v14  ;;  %v3461_v1 = vadd.f32 %v3460_v16, %v7102_v25 }
 0x3d5   : > { %v3462_v19 = vpop.f32.mrf.mxu0 }
 0x3d6   : > { %5757 = vtanh.f32 %v3683_v15  ;;  %v3463_v8 = vadd.f32 %v3462_v19, %v7098_v56 }
 0x3d7   : > { %v3464_v41 = vpop.f32.mrf.mxu0 }
 0x3d8   : > { %v3465_v49 = vadd.f32 %v3464_v41, %v7102_v25 }
 0x3db   : > { %v3591_v40 = vpop.f32.mrf.mxu1 }
 0x3dc   : > { %v3592_v20 = vadd.f32 %v3591_v40, %v3459_v34 }
 0x3dd   : > { %v3593_v63 = vpop.f32.mrf.mxu1 }
 0x3de   : > { %v3594_v21 = vadd.f32 %v3593_v63, %v3461_v1  ;;  %v3684_v26 = vmul.f32 0.5, %v3592_v20 }
 0x3df   : > { %v5752_v22 = vpop.eup %5751  ;;  %v3595_v24 = vpop.f32.mrf.mxu1 }
 0x3e0   : > { %v5754_v51 = vpop.eup %5753  ;;  %v3685_v0 = vmul.f32 0.5, %v3594_v21  ;;  %v3596_v9 = vadd.f32 %v3595_v24, %v3463_v8  ;;  %v3761_v31 = vmul.f32 0.5, %v5752_v22 }
 0x3e1   : > { %v5756_v27 = vpop.eup %5755  ;;  %v3468_v37 = vpop.f32.mrf.mxu0  ;;  %v3760_v32 = vmul.f32 0.5, %v5754_v51 }
 0x3e2   : > { %v3597_v30 = vpop.f32.mrf.mxu1  ;;  %v3762_v17 = vmul.f32 0.5, %v5756_v27  ;;  %5759 = vtanh.f32 %v3685_v0  ;;  %v3686_v35 = vmul.f32 0.5, %v3596_v9  ;;  %v3801_v60 = vadd.f32 0.5, %v3761_v31 }
 0x3e3   : > { %v5758_v54 = vpop.eup %5757  ;;  %v3598_v36 = vadd.f32 %v3597_v30, %v3465_v49  ;;  %5761 = vtanh.f32 %v3684_v26  ;;  %v3470_v42 = vpop.f32.mrf.mxu0  ;;  %v3800_v44 = vadd.f32 0.5, %v3760_v32  ;;  %v3469_v47 = vadd.f32 %v3468_v37, %v7098_v56 }
 0x3e4   : > { %v3763_v38 = vmul.f32 0.5, %v5758_v54  ;;  %v3802_v23 = vadd.f32 0.5, %v3762_v17  ;;  %5763 = vtanh.f32 %v3686_v35  ;;  %v3471_v7 = vadd.f32 %v3470_v42, %v7102_v25 }
 0x3e5   : > { %v3687_v2 = vmul.f32 0.5, %v3598_v36  ;;  %v3472_v50 = vpop.f32.mrf.mxu0 }
 0x3e6   : > { %v3803_v59 = vadd.f32 0.5, %v3763_v38  ;;  %v3840_v3 = vpack.c.bf16 %v3802_v23, %v3800_v44  ;;  %v3473_v55 = vadd.f32 %v3472_v50, %v7098_v56 }
 0x3e7   : > { %5765 = vtanh.f32 %v3687_v2  ;;  %v3474_v4 = vpop.f32.mrf.mxu0 }
 0x3e8   : > { %v3841_v45 = vpack.c.bf16 %v3803_v59, %v3801_v60  ;;  %v3475_v46 = vadd.f32 %v3474_v4, %v7102_v25 }
 0x3ea   : > { %5037 = vmatprep.mubr.msk.bf16.mxu0 %vm1132_vm0, %v3841_v45 }
 0x3eb   : > { %v3601_v39 = vpop.f32.mrf.mxu1  ;;  %4003 = vmatmul.mubr.bf16.vlgmr.msra.gmra.mxu0 %v3840_v3 }
 0x3ec   : > { %v3602_v61 = vadd.f32 %v3601_v39, %v3469_v47 }
 0x3ed   : > { %v3603_v52 = vpop.f32.mrf.mxu1 }
 0x3ee   : > { %v3604_v53 = vadd.f32 %v3603_v52, %v3471_v7  ;;  %v3688_v57 = vmul.f32 0.5, %v3602_v61 }
 0x3ef   : > { %v3605_v58 = vpop.f32.mrf.mxu1  ;;  %v5760_v10 = vpop.eup %5759 }
 0x3f0   : > { %v3689_v43 = vmul.f32 0.5, %v3604_v53  ;;  %v5762_v28 = vpop.eup %5761  ;;  %v3606_v5 = vadd.f32 %v3605_v58, %v3473_v55  ;;  %v3765_v12 = vmul.f32 0.5, %v5760_v10 }
 0x3f1   : > { %v3478_v62 = vpop.f32.mrf.mxu0  ;;  %v3607_v48 = vpop.f32.mrf.mxu1  ;;  %v3764_v13 = vmul.f32 0.5, %v5762_v28 }
 0x3f2   : > { %v5764_v11 = vpop.eup %5763  ;;  %5767 = vtanh.f32 %v3689_v43  ;;  %v3608_v18 = vadd.f32 %v3607_v48, %v3475_v46  ;;  %v3690_v33 = vmul.f32 0.5, %v3606_v5  ;;  %v3805_v19 = vadd.f32 0.5, %v3765_v12 }
 0x3f3   : > { %v3766_v29 = vmul.f32 0.5, %v5764_v11  ;;  %5769 = vtanh.f32 %v3688_v57  ;;  %v3480_v16 = vpop.f32.mrf.mxu0  ;;  %v3804_v1 = vadd.f32 0.5, %v3764_v13  ;;  %v3479_v41 = vadd.f32 %v3478_v62, %v7098_v56 }
 0x3f4   : > { %v5766_v6 = vpop.eup %5765  ;;  %v3691_v14 = vmul.f32 0.5, %v3608_v18  ;;  %5771 = vtanh.f32 %v3690_v33  ;;  %v3481_v8 = vadd.f32 %v3480_v16, %v7102_v25 }
 0x3f5   : > { %v3767_v15 = vmul.f32 0.5, %v5766_v6  ;;  %v3806_v34 = vadd.f32 0.5, %v3766_v29  ;;  %v3482_v20 = vpop.f32.mrf.mxu0 }
 0x3f6   : > { %5773 = vtanh.f32 %v3691_v14  ;;  %v3483_v49 = vadd.f32 %v3482_v20, %v7098_v56 }
 0x3f7   : > { %v3807_v40 = vadd.f32 0.5, %v3767_v15  ;;  %v3842_v21 = vpack.c.bf16 %v3806_v34, %v3804_v1  ;;  %v3484_v51 = vpop.f32.mrf.mxu0 }
 0x3f8   : > { %v3485_v31 = vadd.f32 %v3484_v51, %v7102_v25 }
 0x3f9   : > { %v3843_v63 = vpack.c.bf16 %v3807_v40, %v3805_v19 }
 0x3fb   : > { %5038 = vmatprep.mubr.msk.bf16.mxu0 %vm1132_vm0, %v3843_v63  ;;  %v3611_v22 = vpop.f32.mrf.mxu1 }
 0x3fc   : > { %v3612_v24 = vadd.f32 %v3611_v22, %v3479_v41  ;;  %4011 = vmatmul.mubr.bf16.gmra.mxu0 %v3842_v21 }
 0x3fd   : > { %v3613_v26 = vpop.f32.mrf.mxu1 }
 0x3fe   : > { %v3614_v0 = vadd.f32 %v3613_v26, %v3481_v8  ;;  %v3692_v9 = vmul.f32 0.5, %v3612_v24 }
 0x3ff   : > { %v5768_v27 = vpop.eup %5767  ;;  %v3615_v37 = vpop.f32.mrf.mxu1 }
 0x400   : > { %v5770_v30 = vpop.eup %5769  ;;  %v3693_v17 = vmul.f32 0.5, %v3614_v0  ;;  %v3616_v54 = vadd.f32 %v3615_v37, %v3483_v49  ;;  %v3769_v38 = vmul.f32 0.5, %v5768_v27 }
 0x401   : > { %v3488_v32 = vpop.f32.mrf.mxu0  ;;  %v3617_v35 = vpop.f32.mrf.mxu1  ;;  %v3768_v42 = vmul.f32 0.5, %v5770_v30 }
 0x402   : > { %v5772_v36 = vpop.eup %5771  ;;  %5775 = vtanh.f32 %v3693_v17  ;;  %v3618_v23 = vadd.f32 %v3617_v35, %v3485_v31  ;;  %v3694_v59 = vmul.f32 0.5, %v3616_v54  ;;  %v3809_v47 = vadd.f32 0.5, %v3769_v38 }
 0x403   : > { %v5774_v2 = vpop.eup %5773  ;;  %v3770_v60 = vmul.f32 0.5, %v5772_v36  ;;  %5777 = vtanh.f32 %v3692_v9  ;;  %v3490_v50 = vpop.f32.mrf.mxu0  ;;  %v3808_v7 = vadd.f32 0.5, %v3768_v42  ;;  %v3489_v53 = vadd.f32 %v3488_v32, %v7098_v56 }
 0x404   : > { %v3771_v44 = vmul.f32 0.5, %v5774_v2  ;;  %v3695_v45 = vmul.f32 0.5, %v3618_v23  ;;  %5779 = vtanh.f32 %v3694_v59  ;;  %v3491_v57 = vadd.f32 %v3490_v50, %v7102_v25 }
 0x405   : > { %v3810_v3 = vadd.f32 0.5, %v3770_v60  ;;  %v3492_v4 = vpop.f32.mrf.mxu0 }
 0x406   : > { %v3811_v39 = vadd.f32 0.5, %v3771_v44  ;;  %5781 = vtanh.f32 %v3695_v45  ;;  %v3493_v5 = vadd.f32 %v3492_v4, %v7098_v56 }
 0x407   : > { %v3844_v52 = vpack.c.bf16 %v3810_v3, %v3808_v7  ;;  %v3494_v10 = vpop.f32.mrf.mxu0 }
 0x408   : > { %v3845_v61 = vpack.c.bf16 %v3811_v39, %v3809_v47  ;;  %v3495_v18 = vadd.f32 %v3494_v10, %v7102_v25 }
 0x40a   : > { %5039 = vmatprep.mubr.msk.bf16.mxu0 %vm1132_vm0, %v3845_v61 }
 0x40b   : > { %v3621_v55 = vpop.f32.mrf.mxu1  ;;  %4019 = vmatmul.mubr.bf16.gmra.mxu0 %v3844_v52 }
 0x40c   : > { %v3622_v58 = vadd.f32 %v3621_v55, %v3489_v53 }
 0x40d   : > { %v3623_v46 = vpop.f32.mrf.mxu1 }
 0x40e   : > { %v3624_v43 = vadd.f32 %v3623_v46, %v3491_v57  ;;  %v3696_v62 = vmul.f32 0.5, %v3622_v58 }
 0x40f   : > { %v5776_v28 = vpop.eup %5775  ;;  %v3625_v48 = vpop.f32.mrf.mxu1 }
 0x410   : > { %v5778_v11 = vpop.eup %5777  ;;  %v3697_v12 = vmul.f32 0.5, %v3624_v43  ;;  %v3626_v29 = vadd.f32 %v3625_v48, %v3493_v5  ;;  %v3773_v14 = vmul.f32 0.5, %v5776_v28 }
 0x411   : > { %v3498_v33 = vpop.f32.mrf.mxu0  ;;  %v3627_v6 = vpop.f32.mrf.mxu1  ;;  %v3772_v34 = vmul.f32 0.5, %v5778_v11 }
 0x412   : > { %v5780_v13 = vpop.eup %5779  ;;  %5783 = vtanh.f32 %v3697_v12  ;;  %v3628_v15 = vadd.f32 %v3627_v6, %v3495_v18  ;;  %v3698_v40 = vmul.f32 0.5, %v3626_v29  ;;  %v3813_v21 = vadd.f32 0.5, %v3773_v14 }
 0x413   : > { %v5782_v16 = vpop.eup %5781  ;;  %v3774_v19 = vmul.f32 0.5, %v5780_v13  ;;  %5785 = vtanh.f32 %v3696_v62  ;;  %v3500_v41 = vpop.f32.mrf.mxu0  ;;  %v3812_v8 = vadd.f32 0.5, %v3772_v34  ;;  %v3499_v0 = vadd.f32 %v3498_v33, %v7098_v56 }
 0x414   : > { %v3775_v1 = vmul.f32 0.5, %v5782_v16  ;;  %v3699_v20 = vmul.f32 0.5, %v3628_v15  ;;  %5787 = vtanh.f32 %v3698_v40  ;;  %v3501_v49 = vadd.f32 %v3500_v41, %v7102_v25 }
 0x415   : > { %v3814_v63 = vadd.f32 0.5, %v3774_v19  ;;  %v3502_v51 = vpop.f32.mrf.mxu0  ;;  %v5488_v19 = vld [vmem:[%s7363_s7 + $0x48] sm:$0xff]   ;;  %v5871_v41 = vmov 0.0  }
 0x416   : > { %v3815_v22 = vadd.f32 0.5, %v3775_v1  ;;  %5789 = vtanh.f32 %v3699_v20  ;;  %v3503_v54 = vadd.f32 %v3502_v51, %v7098_v56  ;;  %5185 = vmatprep.subr.bf16.mxu1 %v5871_v41  ;;  %5241 = vmatprep.subr.bf16.mxu0 %v5871_v41 }
 0x417   : > { %v3846_v26 = vpack.c.bf16 %v3814_v63, %v3812_v8  ;;  %v3504_v37 = vpop.f32.mrf.mxu0  ;;  %5186 = vmatpush3.bf16.msra.mxu1 %v5488_v19  ;;  %5195 = vmatprep.mubr.msk.bf16.mxu1 %vm5872_vm10, %v5871_v41 }
 0x418   : > { %v3847_v24 = vpack.c.bf16 %v3815_v22, %v3813_v21  ;;  %v3505_v38 = vadd.f32 %v3504_v37, %v7102_v25  ;;  %5187 = vmatprep.subr.bf16.mxu1 %v5871_v41 }
 0x41a   : > { %5040 = vmatprep.mubr.msk.bf16.mxu0 %vm1132_vm0, %v3847_v24 }
 0x41b   : > { %v3631_v27 = vpop.f32.mrf.mxu1  ;;  %4027 = vmatmul.mubr.bf16.gmra.mxu0 %v3846_v26 }
 0x41c   : > { %v3632_v9 = vadd.f32 %v3631_v27, %v3499_v0 }
 0x41d   : > { %v3633_v30 = vpop.f32.mrf.mxu1 }
 0x41e   : > { %v3634_v31 = vadd.f32 %v3633_v30, %v3501_v49  ;;  %v3700_v32 = vmul.f32 0.5, %v3632_v9 }
 0x41f   : > { %v5784_v17 = vpop.eup %5783  ;;  %v3635_v35 = vpop.f32.mrf.mxu1 }
 0x420   : > { %v5786_v36 = vpop.eup %5785  ;;  %v3701_v23 = vmul.f32 0.5, %v3634_v31  ;;  %v3636_v2 = vadd.f32 %v3635_v35, %v3503_v54  ;;  %v3777_v44 = vmul.f32 0.5, %v5784_v17 }
 0x421   : > { %v3508_v42 = vpop.f32.mrf.mxu0  ;;  %v3637_v60 = vpop.f32.mrf.mxu1  ;;  %v3776_v50 = vmul.f32 0.5, %v5786_v36 }
 0x422   : > { %v5788_v59 = vpop.eup %5787  ;;  %5791 = vtanh.f32 %v3701_v23  ;;  %v3638_v45 = vadd.f32 %v3637_v60, %v3505_v38  ;;  %v3702_v39 = vmul.f32 0.5, %v3636_v2  ;;  %v3817_v53 = vadd.f32 0.5, %v3777_v44 }
 0x423   : > { %v5790_v3 = vpop.eup %5789  ;;  %v3778_v47 = vmul.f32 0.5, %v5788_v59  ;;  %5793 = vtanh.f32 %v3700_v32  ;;  %v3510_v52 = vpop.f32.mrf.mxu0  ;;  %v3816_v57 = vadd.f32 0.5, %v3776_v50  ;;  %v3509_v43 = vadd.f32 %v3508_v42, %v7098_v56 }
 0x424   : > { %v3779_v7 = vmul.f32 0.5, %v5790_v3  ;;  %v3703_v61 = vmul.f32 0.5, %v3638_v45  ;;  %5795 = vtanh.f32 %v3702_v39  ;;  %v3511_v5 = vadd.f32 %v3510_v52, %v7102_v25 }
 0x425   : > { %v3818_v4 = vadd.f32 0.5, %v3778_v47  ;;  %v3512_v10 = vpop.f32.mrf.mxu0 }
 0x426   : > { %v3819_v55 = vadd.f32 0.5, %v3779_v7  ;;  %5797 = vtanh.f32 %v3703_v61  ;;  %v3513_v29 = vadd.f32 %v3512_v10, %v7098_v56  ;;  %v5489_v10 = vld [vmem:[%s7363_s7 + $0x40] sm:$0xff]  }
 0x427   : > { %v3848_v46 = vpack.c.bf16 %v3818_v4, %v3816_v57  ;;  %v3514_v48 = vpop.f32.mrf.mxu0  ;;  %5188 = vmatpush3.bf16.msra.mxu1 %v5489_v10 }
 0x428   : > { %v3849_v58 = vpack.c.bf16 %v3819_v55, %v3817_v53  ;;  %v3515_v14 = vadd.f32 %v3514_v48, %v7102_v25  ;;  %5189 = vmatprep.subr.bf16.mxu1 %v5871_v41 }
 0x42a   : > { %5041 = vmatprep.mubr.msk.bf16.mxu0 %vm1132_vm0, %v3849_v58 }
 0x42b   : > { %v3641_v28 = vpop.f32.mrf.mxu1  ;;  %4035 = vmatmul.mubr.bf16.gmra.mxu0 %v3848_v46 }
 0x42c   : > { %v3642_v62 = vadd.f32 %v3641_v28, %v3509_v43 }
 0x42d   : > { %v3643_v11 = vpop.f32.mrf.mxu1 }
 0x42e   : > { %v3644_v18 = vadd.f32 %v3643_v11, %v3511_v5  ;;  %v3704_v33 = vmul.f32 0.5, %v3642_v62 }
 0x42f   : > { %v5792_v12 = vpop.eup %5791  ;;  %v3645_v6 = vpop.f32.mrf.mxu1 }
 0x430   : > { %v5794_v13 = vpop.eup %5793  ;;  %v3705_v15 = vmul.f32 0.5, %v3644_v18  ;;  %v3646_v16 = vadd.f32 %v3645_v6, %v3513_v29  ;;  %v3781_v1 = vmul.f32 0.5, %v5792_v12 }
 0x431   : > { %v3647_v34 = vpop.f32.mrf.mxu1  ;;  %v5796_v40 = vpop.eup %5795  ;;  %v3780_v22 = vmul.f32 0.5, %v5794_v13 }
 0x432   : > { %5799 = vtanh.f32 %v3705_v15  ;;  %v3518_v20 = vpop.f32.mrf.mxu0  ;;  %v3648_v63 = vadd.f32 %v3647_v34, %v3515_v14  ;;  %v3782_v8 = vmul.f32 0.5, %v5796_v40  ;;  %v3706_v24 = vmul.f32 0.5, %v3646_v16 }
 0x433   : > { %v5798_v21 = vpop.eup %5797  ;;  %5801 = vtanh.f32 %v3704_v33  ;;  %v3821_v49 = vadd.f32 0.5, %v3781_v1  ;;  %v3820_v37 = vadd.f32 0.5, %v3780_v22  ;;  %v3519_v54 = vadd.f32 %v3518_v20, %v7098_v56 }
 0x434   : > { %v3783_v51 = vmul.f32 0.5, %v5798_v21  ;;  %v3707_v26 = vmul.f32 0.5, %v3648_v63  ;;  %v3822_v0 = vadd.f32 0.5, %v3782_v8  ;;  %5803 = vtanh.f32 %v3706_v24  ;;  %v3520_v27 = vpop.f32.mrf.mxu0 }
 0x435   : > { %v3521_v35 = vadd.f32 %v3520_v27, %v7102_v25 }
 0x436   : > { %v3823_v9 = vadd.f32 0.5, %v3783_v51  ;;  %5805 = vtanh.f32 %v3707_v26  ;;  %v3522_v31 = vpop.f32.mrf.mxu0  ;;  %v3850_v17 = vpack.c.bf16 %v3822_v0, %v3820_v37  ;;  %v5490_v26 = vld [vmem:[%s7363_s7 + $0x38] sm:$0xff]  }
 0x437   : > { %v3523_v60 = vadd.f32 %v3522_v31, %v7098_v56  ;;  %5190 = vmatpush3.bf16.msra.mxu1 %v5490_v26 }
 0x438   : > { %v3851_v30 = vpack.c.bf16 %v3823_v9, %v3821_v49  ;;  %v3524_v38 = vpop.f32.mrf.mxu0  ;;  %5191 = vmatprep.subr.bf16.mxu1 %v5871_v41 }
 0x439   : > { %v3525_v3 = vadd.f32 %v3524_v38, %v7102_v25 }
 0x43a   : > { %5042 = vmatprep.mubr.msk.bf16.mxu0 %vm1132_vm0, %v3851_v30 }
 0x43b   : > { %v3651_v32 = vpop.f32.mrf.mxu1  ;;  %4043 = vmatmul.mubr.bf16.gmra.mxu0 %v3850_v17 }
 0x43c   : > { %v3652_v36 = vadd.f32 %v3651_v32, %v3519_v54 }
 0x43d   : > { %v3653_v23 = vpop.f32.mrf.mxu1 }
 0x43e   : > { %v3654_v2 = vadd.f32 %v3653_v23, %v3521_v35  ;;  %v3708_v59 = vmul.f32 0.5, %v3652_v36 }
 0x43f   : > { %v5800_v42 = vpop.eup %5799  ;;  %v3655_v44 = vpop.f32.mrf.mxu1 }
 0x440   : > { %v5802_v45 = vpop.eup %5801  ;;  %v3709_v50 = vmul.f32 0.5, %v3654_v2  ;;  %v3656_v47 = vadd.f32 %v3655_v44, %v3523_v60  ;;  %v3785_v61 = vmul.f32 0.5, %v5800_v42 }
 0x441   : > { %v3657_v39 = vpop.f32.mrf.mxu1  ;;  %v5804_v7 = vpop.eup %5803  ;;  %v3784_v55 = vmul.f32 0.5, %v5802_v45  ;;  %v5491_v45 = vld [vmem:[%s7363_s7 + $0x30] sm:$0xff]  }
 0x442   : > { %5807 = vtanh.f32 %v3709_v50  ;;  %v3528_v4 = vpop.f32.mrf.mxu0  ;;  %v3658_v52 = vadd.f32 %v3657_v39, %v3525_v3  ;;  %v3786_v57 = vmul.f32 0.5, %v5804_v7  ;;  %v3710_v58 = vmul.f32 0.5, %v3656_v47  ;;  %5192 = vmatpush3.bf16.msra.mxu1 %v5491_v45 }
 0x443   : > { %v5806_v53 = vpop.eup %5805  ;;  %5809 = vtanh.f32 %v3708_v59  ;;  %v3825_v62 = vadd.f32 0.5, %v3785_v61  ;;  %v3824_v11 = vadd.f32 0.5, %v3784_v55  ;;  %v3529_v33 = vadd.f32 %v3528_v4, %v7098_v56  ;;  %5193 = vmatprep.subr.bf16.mxu1 %v5871_v41  ;;  %v5492_v55 = vld [vmem:[%s7363_s7 + $0x28] sm:$0xff]  }
 0x444   : > { %v3787_v46 = vmul.f32 0.5, %v5806_v53  ;;  %v3711_v43 = vmul.f32 0.5, %v3658_v52  ;;  %v3826_v28 = vadd.f32 0.5, %v3786_v57  ;;  %5811 = vtanh.f32 %v3710_v58  ;;  %v3530_v5 = vpop.f32.mrf.mxu0 }
 0x445   : > { %v3531_v13 = vadd.f32 %v3530_v5, %v7102_v25 }
 0x446   : > { %v3827_v48 = vadd.f32 0.5, %v3787_v46  ;;  %5813 = vtanh.f32 %v3711_v43  ;;  %v3532_v12 = vpop.f32.mrf.mxu0  ;;  %v3852_v29 = vpack.c.bf16 %v3826_v28, %v3824_v11  ;;  %5194 = vmatpush3.bf16.msra.mxu1 %v5492_v55  ;;  %v5494_v55 = vld [vmem:[%s7363_s7 + $0x18] sm:$0xff]  }
 0x447   : > { %v3533_v40 = vadd.f32 %v3532_v12, %v7098_v56  ;;  %5199 = vmatprep.subr.bf16.mxu1 %v5871_v41 }
 0x448   : > { %v3853_v18 = vpack.c.bf16 %v3827_v48, %v3825_v62  ;;  %v3534_v15 = vpop.f32.mrf.mxu0 }
 0x449   : > { %v3535_v21 = vadd.f32 %v3534_v15, %v7102_v25 }
 0x44a   : > { %5043 = vmatprep.mubr.msk.bf16.mxu0 %vm1132_vm0, %v3853_v18 }
 0x44b   : > { %v3661_v6 = vpop.f32.mrf.mxu1  ;;  %4051 = vmatmul.mubr.bf16.gmra.mxu0 %v3852_v29 }
 0x44c   : > { %v3662_v14 = vadd.f32 %v3661_v6, %v3529_v33 }
 0x44d   : > { %v3663_v16 = vpop.f32.mrf.mxu1 }
 0x44e   : > { %v3664_v34 = vadd.f32 %v3663_v16, %v3531_v13  ;;  %v3712_v1 = vmul.f32 0.5, %v3662_v14 }
 0x44f   : > { %v5808_v19 = vpop.eup %5807  ;;  %v3665_v20 = vpop.f32.mrf.mxu1 }
 0x450   : > { %v5810_v63 = vpop.eup %5809  ;;  %v3713_v22 = vmul.f32 0.5, %v3664_v34  ;;  %v3666_v8 = vadd.f32 %v3665_v20, %v3533_v40  ;;  %v3789_v27 = vmul.f32 0.5, %v5808_v19 }
 0x451   : > { %v3538_v24 = vpop.f32.mrf.mxu0  ;;  %v3667_v51 = vpop.f32.mrf.mxu1  ;;  %v3788_v37 = vmul.f32 0.5, %v5810_v63 }
 0x452   : > { %v5812_v0 = vpop.eup %5811  ;;  %5815 = vtanh.f32 %v3713_v22  ;;  %v3668_v49 = vadd.f32 %v3667_v51, %v3535_v21  ;;  %v3714_v31 = vmul.f32 0.5, %v3666_v8  ;;  %v3829_v36 = vadd.f32 0.5, %v3789_v27  ;;  %v5498_v8 = vld [vmem:[%s7363_s7 + $0xc0] sm:$0xff]  }
 0x453   : > { %v5814_v9 = vpop.eup %5813  ;;  %v3790_v30 = vmul.f32 0.5, %v5812_v0  ;;  %5817 = vtanh.f32 %v3712_v1  ;;  %v3540_v35 = vpop.f32.mrf.mxu0  ;;  %v3828_v23 = vadd.f32 0.5, %v3788_v37  ;;  %v3539_v59 = vadd.f32 %v3538_v24, %v7098_v56  ;;  %5242 = vmatpush3.bf16.msra.mxu0 %v5498_v8  ;;  %v5511_v37 = vld [vmem:[%s7363_s7 + $0xa8] sm:$0xff]  }
 0x454   : > { %v3791_v17 = vmul.f32 0.5, %v5814_v9  ;;  %v3715_v54 = vmul.f32 0.5, %v3668_v49  ;;  %5819 = vtanh.f32 %v3714_v31  ;;  %v3541_v3 = vadd.f32 %v3540_v35, %v7102_v25  ;;  %5243 = vmatprep.subr.bf16.mxu0 %v5871_v41  ;;  %v5503_v49 = vld [vmem:[%s7363_s7 + $0xb8] sm:$0xff]   ;;  %v5506_v9 = vld [vmem:[%s7363_s7 + $0xb0] sm:$0xff]  }
 0x455   : > { %v3830_v32 = vadd.f32 0.5, %v3790_v30  ;;  %v3542_v42 = vpop.f32.mrf.mxu0 }
 0x456   : > { %v3831_v38 = vadd.f32 0.5, %v3791_v17  ;;  %5821 = vtanh.f32 %v3715_v54  ;;  %v3543_v4 = vadd.f32 %v3542_v42, %v7098_v56 }
 0x457   : > { %v3854_v60 = vpack.c.bf16 %v3830_v32, %v3828_v23  ;;  %v3544_v47 = vpop.f32.mrf.mxu0  ;;  %5244 = vmatpush3.bf16.msra.mxu0 %v5503_v49  ;;  %v5512_v32 = vld [vmem:[%s7363_s7 + $0xa0] sm:$0xff]  }
 0x458   : > { %v3855_v2 = vpack.c.bf16 %v3831_v38, %v3829_v36  ;;  %v3545_v58 = vadd.f32 %v3544_v47, %v7102_v25  ;;  %5245 = vmatprep.subr.bf16.mxu0 %v5871_v41 }
 0x45a   : > { %5044 = vmatprep.mubr.msk.bf16.mxu0 %vm1132_vm0, %v3855_v2 }
 0x45b   : > { %v3671_v44 = vpop.f32.mrf.mxu1  ;;  %4059 = vmatmul.mubr.bf16.gmra.mxu0 %v3854_v60 }
 0x45c   : > { %v3672_v50 = vadd.f32 %v3671_v44, %v3539_v59  ;;  %5246 = vmatpush3.bf16.msra.mxu0 %v5506_v9 }
 0x45d   : > { %v3673_v39 = vpop.f32.mrf.mxu1  ;;  %5247 = vmatprep.subr.bf16.mxu0 %v5871_v41 }
 0x45e   : > { %v3674_v7 = vadd.f32 %v3673_v39, %v3541_v3  ;;  %v3716_v52 = vmul.f32 0.5, %v3672_v50 }
 0x45f   : > { %v5816_v61 = vpop.eup %5815  ;;  %v3675_v53 = vpop.f32.mrf.mxu1 }
 0x460   : > { %v5818_v57 = vpop.eup %5817  ;;  %v3717_v10 = vmul.f32 0.5, %v3674_v7  ;;  %v3676_v46 = vadd.f32 %v3675_v53, %v3543_v4  ;;  %v3793_v5 = vmul.f32 0.5, %v5816_v61  ;;  %5248 = vmatpush3.bf16.msra.mxu0 %v5511_v37 }
 0x461   : > { %v3677_v43 = vpop.f32.mrf.mxu1  ;;  %v5820_v28 = vpop.eup %5819  ;;  %v3792_v48 = vmul.f32 0.5, %v5818_v57  ;;  %5249 = vmatprep.subr.bf16.mxu0 %v5871_v41  ;;  %v5495_v57 = vld [vmem:[%s7363_s7 + $0x10] sm:$0xff]  }
 0x462   : > { %5823 = vtanh.f32 %v3717_v10  ;;  %v3678_v62 = vadd.f32 %v3677_v43, %v3545_v58  ;;  %v3794_v11 = vmul.f32 0.5, %v5820_v28  ;;  %v3718_v18 = vmul.f32 0.5, %v3676_v46  ;;  %v5496_v46 = vld [vmem:[%s7363_s7 + $0x8] sm:$0xff]  }
 0x463   : > { %v5822_v56 = vpop.eup %5821  ;;  %5825 = vtanh.f32 %v3716_v52  ;;  %v3833_v33 = vadd.f32 0.5, %v3793_v5  ;;  %v3832_v13 = vadd.f32 0.5, %v3792_v48  ;;  %v5493_v52 = vld [vmem:[%s7363_s7 + $0x20] sm:$0xff]  }
 0x464   : > { %v3795_v25 = vmul.f32 0.5, %v5822_v56  ;;  %v3719_v12 = vmul.f32 0.5, %v3678_v62  ;;  %v3834_v29 = vadd.f32 0.5, %v3794_v11  ;;  %5827 = vtanh.f32 %v3718_v18  ;;  %5250 = vmatpush3.bf16.msra.mxu0 %v5512_v32  ;;  %v5497_v5 = vld [vmem:[%s7363_s7] sm:$0xff]   ;;  %v5499_v62 = vld [vmem:[%s7363_s7 + $0x70] sm:$0xff]   ;;  %v5500_v56 = vld [vmem:[%s7363_s7 + $0x68] sm:$0xff]  }
 0x465   : > { %5275 = vmatprep.subr.bf16.mxu0 %v5871_v41  ;;  %v5501_v18 = vld [vmem:[%s7363_s7 + $0x60] sm:$0xff]  }
 0x466   : > { %v3835_v6 = vadd.f32 0.5, %v3795_v25  ;;  %5829 = vtanh.f32 %v3719_v12  ;;  %v3856_v15 = vpack.c.bf16 %v3834_v29, %v3832_v13  ;;  %v5502_v29 = vld [vmem:[%s7363_s7 + $0x58] sm:$0xff]  }
 0x468   : > { %v3857_v14 = vpack.c.bf16 %v3835_v6, %v3833_v33  ;;  %v5504_v33 = vld [vmem:[%s7363_s7 + $0x50] sm:$0xff]  }
 0x46a   : > { %5045 = vmatprep.mubr.msk.bf16.mxu0 %vm1132_vm0, %v3857_v14  ;;  %v5505_v14 = vld [vmem:[%s7363_s7 + $0x98] sm:$0xff]  }
 0x46b   : > { %4067 = vmatmul.mubr.bf16.gmra.mxu0 %v3856_v15 }
 0x46f   : > { %v5824_v16 = vpop.eup %5823 }
 0x470   : > { %v5826_v34 = vpop.eup %5825  ;;  %v3797_v40 = vmul.f32 0.5, %v5824_v16 }
 0x471   : > { %v5828_v19 = vpop.eup %5827  ;;  %v3796_v20 = vmul.f32 0.5, %v5826_v34 }
 0x472   : > { %v3798_v63 = vmul.f32 0.5, %v5828_v19  ;;  %v3837_v24 = vadd.f32 0.5, %v3797_v40  ;;  %v5507_v19 = vld [vmem:[%s7363_s7 + $0x90] sm:$0xff]  }
 0x473   : > { %v5830_v1 = vpop.eup %5829  ;;  %v3836_v26 = vadd.f32 0.5, %v3796_v20  ;;  %v5508_v20 = vld [vmem:[%s7363_s7 + $0x88] sm:$0xff]  }
 0x474   : > { %v3799_v21 = vmul.f32 0.5, %v5830_v1  ;;  %v3838_v22 = vadd.f32 0.5, %v3798_v63  ;;  %v5509_v63 = vld [vmem:[%s7363_s7 + $0x80] sm:$0xff]  }
 0x476   : > { %v3839_v51 = vadd.f32 0.5, %v3799_v21  ;;  %v3858_v27 = vpack.c.bf16 %v3838_v22, %v3836_v26  ;;  %v5510_v21 = vld [vmem:[%s7363_s7 + $0x78] sm:$0xff]  }
 0x478   : > { %v3859_v0 = vpack.c.bf16 %v3839_v51, %v3837_v24 }
 0x47a   : > { %5046 = vmatprep.mubr.msk.bf16.mxu0 %vm1132_vm0, %v3859_v0 }
 0x47b   : > { %4075 = vmatmul.mubr.bf16.gmra.mxu0 %v3858_v27 }
 0x47c   : > { %5251 = vmatprep.mubr.msk.bf16.mxu0 %vm5872_vm10, %v5871_v41 }
 0x4ab   : > { %v4004_v30 = vpop.f32.mrf.mxu0 }
 0x4ad   : > { %v4006_v31 = vpop.f32.mrf.mxu0 }
 0x4af   : > { %v4007_v17 = vpop.f32.mrf.mxu0 }
 0x4b1   : > { %v4009_v54 = vpop.f32.mrf.mxu0 }
 0x4bc   : > { %v4012_v35 = vpop.f32.mrf.mxu0 }
 0x4bd   : > { %v4083_v23 = vadd.f32 %v4012_v35, %v4004_v30 }
 0x4be   : > { %v4014_v36 = vpop.f32.mrf.mxu0 }
 0x4c0   : > { %v4015_v38 = vpop.f32.mrf.mxu0 }
 0x4c1   : > { %v4084_v2 = vadd.f32 %v4015_v38, %v4007_v17 }
 0x4c2   : > { %v4017_v42 = vpop.f32.mrf.mxu0 }
 0x4c3   : > { %v4093_v60 = vpack.c.bf16 %v4084_v2, %v4083_v23  ;;  %v5513_v23 = vld [vmem:[%s7365_s9 + $0x38] ss:$0 sps:$4 sm:$0xff]   ;;  %v5514_v42 = vld [vmem:[%s7365_s9 + $0x30] sm:$0xff]  }
 0x4c4   : > { %v4618_v2 = vsel %vm2537_vm3, %v5513_v23, 0 }
 0x4cb   : > { %v4020_v59 = vpop.f32.mrf.mxu0 }
 0x4cd   : > { %v4022_v44 = vpop.f32.mrf.mxu0 }
 0x4ce   : > { %v5517_v44 = vld [vmem:[%s7365_s9 + $0x18] sm:$0xff]  }
 0x4cf   : > { %v4023_v45 = vpop.f32.mrf.mxu0 }
 0x4d1   : > { %v4025_v3 = vpop.f32.mrf.mxu0 }
 0x4d2   : > { %v5519_v3 = vld [vmem:[%s7365_s9 + $0x8] sm:$0xff]  }
 0x4db   : > { %v4028_v50 = vpop.f32.mrf.mxu0 }
 0x4dc   : > { %v4085_v7 = vadd.f32 %v4028_v50, %v4020_v59  ;;  %v5516_v59 = vld [vmem:[%s7365_s9 + $0x20] sm:$0xff]  }
 0x4dd   : > { %v4030_v47 = vpop.f32.mrf.mxu0  ;;  %v5520_v50 = vld [vmem:[%s7365_s9] sm:$0xff]  }
 0x4df   : > { %v4031_v39 = vpop.f32.mrf.mxu0 }
 0x4e0   : > { %v4086_v61 = vadd.f32 %v4031_v39, %v4023_v45  ;;  %v5518_v45 = vld [vmem:[%s7365_s9 + $0x10] sm:$0xff]  }
 0x4e1   : > { %v4033_v4 = vpop.f32.mrf.mxu0 }
 0x4e2   : > { %v4094_v53 = vpack.c.bf16 %v4086_v61, %v4085_v7 }
 0x4e4   : > { %5196 = vmatmul.mubr.msk.bf16.vlgmr.msra.gmra.mxu1 %vm3025_vm8, %v4094_v53 }
 0x4e5   : > { %5200 = vmatpush3.bf16.msra.mxu1 %v5493_v52  ;;  %5209 = vmatprep.mubr.msk.bf16.mxu1 %vm5872_vm10, %v5871_v41 }
 0x4e6   : > { %5201 = vmatprep.subr.bf16.mxu1 %v5871_v41 }
 0x4e9   : > { %5202 = vmatpush3.bf16.msra.mxu1 %v5494_v55 }
 0x4ea   : > { %5203 = vmatprep.subr.bf16.mxu1 %v5871_v41 }
 0x4eb   : > { %v4036_v58 = vpop.f32.mrf.mxu0 }
 0x4ed   : > { %5204 = vmatpush3.bf16.msra.mxu1 %v5495_v57  ;;  %v4038_v10 = vpop.f32.mrf.mxu0 }
 0x4ee   : > { %5205 = vmatprep.subr.bf16.mxu1 %v5871_v41 }
 0x4ef   : > { %v4039_v43 = vpop.f32.mrf.mxu0 }
 0x4f1   : > { %5206 = vmatpush3.bf16.msra.mxu1 %v5496_v46  ;;  %v4041_v28 = vpop.f32.mrf.mxu0 }
 0x4f2   : > { %5207 = vmatprep.subr.bf16.mxu1 %v5871_v41 }
 0x4f5   : > { %5208 = vmatpush3.bf16.msra.mxu1 %v5497_v5 }
 0x4f6   : > { %5213 = vmatprep.subr.bf16.mxu1 %v5871_v41 }
 0x4f8   : > { %5210 = vmatmul.mubr.msk.bf16.vlgmr.msra.gmra.mxu1 %vm3025_vm8, %v4093_v60  ;;  %v5515_v60 = vld [vmem:[%s7365_s9 + $0x28] sm:$0xff]  }
 0x4f9   : > { %5214 = vmatpush3.bf16.msra.mxu1 %v5499_v62  ;;  %5223 = vmatprep.mubr.msk.bf16.mxu1 %vm5872_vm10, %v5871_v41 }
 0x4fa   : > { %5215 = vmatprep.subr.bf16.mxu1 %v5871_v41 }
 0x4fb   : > { %v4044_v48 = vpop.f32.mrf.mxu0 }
 0x4fc   : > { %v4087_v13 = vadd.f32 %v4044_v48, %v4036_v58 }
 0x4fd   : > { %5216 = vmatpush3.bf16.msra.mxu1 %v5500_v56  ;;  %v4046_v11 = vpop.f32.mrf.mxu0 }
 0x4fe   : > { %5217 = vmatprep.subr.bf16.mxu1 %v5871_v41 }
 0x4ff   : > { %v4047_v25 = vpop.f32.mrf.mxu0 }
 0x500   : > { %v4088_v6 = vadd.f32 %v4047_v25, %v4039_v43 }
 0x501   : > { %5218 = vmatpush3.bf16.msra.mxu1 %v5501_v18  ;;  %v4049_v12 = vpop.f32.mrf.mxu0 }
 0x502   : > { %5219 = vmatprep.subr.bf16.mxu1 %v5871_v41  ;;  %v4095_v15 = vpack.c.bf16 %v4088_v6, %v4087_v13  ;;  %v5117_v12 = vld [vmem:[%s7364_s8] ss:$0 sm:$0xff] }
 0x505   : > { %5220 = vmatpush3.bf16.msra.mxu1 %v5502_v29 }
 0x506   : > { %5221 = vmatprep.subr.bf16.mxu1 %v5871_v41 }
 0x509   : > { %5222 = vmatpush3.bf16.msra.mxu1 %v5504_v33 }
 0x50a   : > { %5227 = vmatprep.subr.bf16.mxu1 %v5871_v41 }
 0x50b   : > { %v4052_v16 = vpop.f32.mrf.mxu0 }
 0x50c   : > { %5224 = vmatmul.mubr.msk.bf16.vlgmr.msra.gmra.mxu1 %vm3025_vm8, %v4095_v15 }
 0x50d   : > { %v4054_v34 = vpop.f32.mrf.mxu0  ;;  %5228 = vmatpush3.bf16.msra.mxu1 %v5505_v14  ;;  %5237 = vmatprep.mubr.msk.bf16.mxu1 %vm5872_vm10, %v5871_v41 }
 0x50e   : > { %5229 = vmatprep.subr.bf16.mxu1 %v5871_v41 }
 0x50f   : > { %v4055_v40 = vpop.f32.mrf.mxu0 }
 0x511   : > { %v4057_v1 = vpop.f32.mrf.mxu0  ;;  %5230 = vmatpush3.bf16.msra.mxu1 %v5507_v19 }
 0x512   : > { %5231 = vmatprep.subr.bf16.mxu1 %v5871_v41 }
 0x515   : > { %5232 = vmatpush3.bf16.msra.mxu1 %v5508_v20 }
 0x516   : > { %5233 = vmatprep.subr.bf16.mxu1 %v5871_v41 }
 0x519   : > { %5234 = vmatpush3.bf16.msra.mxu1 %v5509_v63 }
 0x51a   : > { %5235 = vmatprep.subr.bf16.mxu1 %v5871_v41 }
 0x51b   : > { %v4060_v22 = vpop.f32.mrf.mxu0 }
 0x51c   : > { %v4089_v51 = vadd.f32 %v4060_v22, %v4052_v16 }
 0x51d   : > { %v4062_v8 = vpop.f32.mrf.mxu0  ;;  %5236 = vmatpush3.bf16.msra.mxu1 %v5510_v21 }
 0x51e   : > { %5255 = vmatprep.subr.bf16.mxu1 %v5871_v41 }
 0x51f   : > { %v4063_v24 = vpop.f32.mrf.mxu0 }
 0x520   : > { %v4090_v26 = vadd.f32 %v4063_v24, %v4055_v40 }
 0x521   : > { %v4065_v0 = vpop.f32.mrf.mxu0 }
 0x522   : > { %v4096_v27 = vpack.c.bf16 %v4090_v26, %v4089_v51  ;;  %v5521_v26 = vld [vmem:[%s7367_s11 + $0x28] ss:$0 sps:$4 sm:$0x33]  }
 0x523   : > { %v4725_v0 = vsel %vm3407_vm5, %v5521_v26, 0 }
 0x524   : > { %5238 = vmatmul.mubr.msk.bf16.vlgmr.msra.gmra.mxu1 %vm3025_vm8, %v4096_v27  ;;  %v5522_v27 = vld [vmem:[%s7367_s11 + $0x20] sm:$0xff]  }
 0x525   : > { %5271 = vmatprep.mubr.msk.bf16.mxu1 %vm5872_vm10, %v5871_v41  ;;  %5256 = vmatpush3.bf16.msra.mxu1 %v4618_v2 }
 0x526   : > { %5257 = vmatprep.subr.bf16.mxu1 %v5871_v41 }
 0x529   : > { %5258 = vmatpush3.bf16.msra.mxu1 %v5514_v42 }
 0x52a   : > { %5259 = vmatprep.subr.bf16.mxu1 %v5871_v41 }
 0x52b   : > { %v4068_v49 = vpop.f32.mrf.mxu0 }
 0x52d   : > { %v4070_v9 = vpop.f32.mrf.mxu0  ;;  %5260 = vmatpush3.bf16.msra.mxu1 %v5515_v60 }
 0x52e   : > { %5261 = vmatprep.subr.bf16.mxu1 %v5871_v41  ;;  %v5524_v9 = vld [vmem:[%s7367_s11 + $0x10] sm:$0xff]  }
 0x52f   : > { %v4071_v37 = vpop.f32.mrf.mxu0 }
 0x531   : > { %v4073_v30 = vpop.f32.mrf.mxu0  ;;  %5262 = vmatpush3.bf16.msra.mxu1 %v5516_v59 }
 0x532   : > { %5263 = vmatprep.subr.bf16.mxu1 %v5871_v41  ;;  %v5526_v30 = vld [vmem:[%s7367_s11] sm:$0xff]  }
 0x535   : > { %5264 = vmatpush3.bf16.msra.mxu1 %v5517_v44 }
 0x536   : > { %5265 = vmatprep.subr.bf16.mxu1 %v5871_v41 }
 0x539   : > { %5266 = vmatpush3.bf16.msra.mxu1 %v5518_v45 }
 0x53a   : > { %5267 = vmatprep.subr.bf16.mxu1 %v5871_v41 }
 0x53b   : > { %v4076_v31 = vpop.f32.mrf.mxu0 }
 0x53c   : > { %v4091_v32 = vadd.f32 %v4076_v31, %v4068_v49  ;;  %v5523_v49 = vld [vmem:[%s7367_s11 + $0x18] sm:$0xff]   ;;  %v5118_v31 = vld [vmem:[%s7366_s10] ss:$0 sm:$0xff] }
 0x53d   : > { %v4078_v17 = vpop.f32.mrf.mxu0  ;;  %5268 = vmatpush3.bf16.msra.mxu1 %v5519_v3 }
 0x53e   : > { %5269 = vmatprep.subr.bf16.mxu1 %v5871_v41 }
 0x53f   : > { %v4079_v54 = vpop.f32.mrf.mxu0 }
 0x540   : > { %v4092_v35 = vadd.f32 %v4079_v54, %v4071_v37  ;;  %v5525_v37 = vld [vmem:[%s7367_s11 + $0x8] sm:$0xff]  }
 0x541   : > { %v4081_v36 = vpop.f32.mrf.mxu0  ;;  %5270 = vmatpush3.bf16.msra.mxu1 %v5520_v50  ;;  %v5128_v50 = vld [vmem:[%s7368_s12] ss:$0 sm:$0xff] }
 0x542   : > { %v4097_v38 = vpack.c.bf16 %v4092_v35, %v4091_v32 }
 0x544   : > { %5252 = vmatmul.mubr.msk.bf16.vlgmr.msra.gmra.mxu0 %vm3025_vm8, %v4097_v38 }
 0x545   : > { %5287 = vmatprep.mubr.msk.bf16.mxu0 %vm5872_vm10, %v5871_v41  ;;  %5276 = vmatpush3.bf16.msra.mxu0 %v4725_v0 }
 0x546   : > { %5277 = vmatprep.subr.bf16.mxu0 %v5871_v41 }
 0x549   : > { %5278 = vmatpush3.bf16.msra.mxu0 %v5522_v27 }
 0x54a   : > { %5279 = vmatprep.subr.bf16.mxu0 %v5871_v41 }
 0x54d   : > { %5280 = vmatpush3.bf16.msra.mxu0 %v5523_v49 }
 0x54e   : > { %5281 = vmatprep.subr.bf16.mxu0 %v5871_v41 }
 0x551   : > { %5282 = vmatpush3.bf16.msra.mxu0 %v5524_v9 }
 0x552   : > { %5283 = vmatprep.subr.bf16.mxu0 %v5871_v41 }
 0x555   : > { %5284 = vmatpush3.bf16.msra.mxu0 %v5525_v37 }
 0x556   : > { %5285 = vmatprep.subr.bf16.mxu0 %v5871_v41 }
 0x559   : > { %5286 = vmatpush3.bf16.msra.mxu0 %v5526_v30 }
 0x5a4   : > { %v4186_v47 = vpop.f32.mrf.mxu1 }
 0x5a6   : > { %v5197_v39 = vpop.f32.mrf.mxu1 }
 0x5a8   : > { %v4189_v7 = vpop.f32.mrf.mxu1 }
 0x5aa   : > { %v5198_v61 = vpop.f32.mrf.mxu1 }
 0x5b8   : > { %v4260_v4 = vpop.f32.mrf.mxu1 }
 0x5b9   : > { %v4261_v52 = vadd.f32 %v4260_v4, %v4186_v47 }
 0x5ba   : > { %v5211_v53 = vpop.f32.mrf.mxu1 }
 0x5bc   : > { %v4263_v55 = vpop.f32.mrf.mxu1 }
 0x5bd   : > { %v4264_v57 = vadd.f32 %v4263_v55, %v4189_v7 }
 0x5be   : > { %v5212_v58 = vpop.f32.mrf.mxu1 }
 0x5cc   : > { %v4345_v10 = vpop.f32.mrf.mxu1 }
 0x5cd   : > { %v4352_v11 = vadd.f32 %v4345_v10, %v4261_v52 }
 0x5ce   : > { %v5225_v46 = vpop.f32.mrf.mxu1 }
 0x5d0   : > { %v4348_v43 = vpop.f32.mrf.mxu1 }
 0x5d1   : > { %v4353_v29 = vadd.f32 %v4348_v43, %v4264_v57 }
 0x5d2   : > { %v5226_v28 = vpop.f32.mrf.mxu1 }
 0x5e4   : > { %v4432_v5 = vpop.f32.mrf.mxu1 }
 0x5e5   : > { %v4439_v18 = vadd.f32 %v4432_v5, %v4352_v11 }
 0x5e6   : > { %v5239_v62 = vpop.f32.mrf.mxu1 }
 0x5e8   : > { %v4435_v56 = vpop.f32.mrf.mxu1 }
 0x5e9   : > { %v4440_v13 = vadd.f32 %v4435_v56, %v4353_v29 }
 0x5ea   : > { %v5240_v48 = vpop.f32.mrf.mxu1 }
 0x604   : > { %v4519_v25 = vpop.f32.mrf.mxu0 }
 0x605   : > { %v4526_v33 = vadd.f32 %v4519_v25, %v4439_v18 }
 0x606   : > { %v5253_v6 = vpop.f32.mrf.mxu0 }
 0x607   : > { %v4535_v14 = vadd.f32 %v5117_v12, %v4526_v33 }
 0x608   : > { %v4522_v15 = vpop.f32.mrf.mxu0 }
 0x609   : > { %v4537_v16 = vmul.f32 0.5, %v4535_v14  ;;  %v4527_v34 = vadd.f32 %v4522_v15, %v4440_v13 }
 0x60a   : > { %v5254_v19 = vpop.f32.mrf.mxu0 }
 0x60b   : > { %5831 = vtanh.f32 %v4537_v16  ;;  %v4536_v40 = vadd.f32 %v5117_v12, %v4527_v34 }
 0x60d   : > { %v4538_v1 = vmul.f32 0.5, %v4536_v40 }
 0x60f   : > { %5833 = vtanh.f32 %v4538_v1 }
 0x618   : > { %v5832_v20 = vpop.eup %5831 }
 0x619   : > { %v4541_v63 = vmul.f32 0.5, %v5832_v20 }
 0x61b   : > { %v4543_v8 = vadd.f32 0.5, %v4541_v63 }
 0x61c   : > { %v5834_v21 = vpop.eup %5833 }
 0x61d   : > { %v4542_v22 = vmul.f32 0.5, %v5834_v21 }
 0x61f   : > { %v4544_v24 = vadd.f32 0.5, %v4542_v22 }
 0x621   : > { %v4545_v51 = vpack.c.bf16 %v4544_v24, %v4543_v8 }
 0x623   : > { %5272 = vmatmul.mubr.msk.bf16.vlgmr.msra.gmra.mxu1 %vm4613_vm11, %v4545_v51 }
 0x6e3   : > { %v4654_v17 = vpop.f32.mrf.mxu1 }
 0x6e4   : > { %v4655_v54 = vadd.f32 %v5118_v31, %v4654_v17 }
 0x6e5   : > { %v5273_v32 = vpop.f32.mrf.mxu1 }
 0x6e6   : > { %v4661_v35 = vmul.f32 0.5, %v4655_v54 }
 0x6e7   : > { %v4657_v36 = vpop.f32.mrf.mxu1 }
 0x6e8   : > { %5835 = vtanh.f32 %v4661_v35  ;;  %v4658_v38 = vadd.f32 %v5118_v31, %v4657_v36 }
 0x6e9   : > { %v5274_v23 = vpop.f32.mrf.mxu1 }
 0x6ea   : > { %v4662_v2 = vmul.f32 0.5, %v4658_v38 }
 0x6ec   : > { %5837 = vtanh.f32 %v4662_v2 }
 0x6f5   : > { %v5836_v41 = vpop.eup %5835 }
 0x6f6   : > { %v4665_v42 = vmul.f32 0.5, %v5836_v41 }
 0x6f8   : > { %v4667_v44 = vadd.f32 0.5, %v4665_v42 }
 0x6f9   : > { %v5838_v60 = vpop.eup %5837 }
 0x6fa   : > { %v4666_v59 = vmul.f32 0.5, %v5838_v60 }
 0x6fc   : > { %v4668_v45 = vadd.f32 0.5, %v4666_v59 }
 0x6fe   : > { %v4669_v3 = vpack.c.bf16 %v4668_v45, %v4667_v44 }
 0x700   : > { %5288 = vmatmul.mubr.msk.bf16.vlgmr.msra.gmra.mxu0 %vm2933_vm7, %v4669_v3 }
 0x7c0   : > { %v4761_v47 = vpop.f32.mrf.mxu0 }
 0x7c1   : > { %v4762_v39 = vadd.f32 %v5128_v50, %v4761_v47 }
 0x7c2   : > { %v5289_v7 = vpop.f32.mrf.mxu0 }
 0x7c3   : > { %4768 = vst [vmem:[%s737_s18] sm:$0xff] %v4762_v39 }
 0x7c4   : > { %v4764_v61 = vpop.f32.mrf.mxu0 }
 0x7c5   : > { %v4765_v4 = vadd.f32 %v5128_v50, %v4764_v61 }
 0x7c6   : > { %v5290_v52 = vpop.f32.mrf.mxu0 }
 0x7c7   : > { %4769 = vst [vmem:[%s737_s18 + $0x8] sm:$0xff] %v4765_v4 }
 0x7c8 PF: > { %p20_p9 = scmp.ge.s32.totalorder %s5960_s29, 4   ;;  %s7370_s25 = smov %s5857_s26 }
 0x7c9   : > { %s7371_s26 = smov %s5969_s15  ;;  %s7372_s27 = smov %s5960_s29 }
 0x7ca   :  { %22 = sbr.rel (!%p20_p9) target bundleno = 2 (0x2), region = 152 }

</bundles_post_ra>
